<compile_context>
chip_gen: v6e
topology: v6e:2x2x1
jax: 0.10.0
libtpu: 0.0.40
codegen_flags: <defaults>
</compile_context>

<pallas_src>
import jax
import jax.numpy as jnp
from jax import lax
from jax.experimental import pallas as pl
from jax.experimental.pallas import tpu as pltpu

_VMEM_LIMIT = 48 * 1024 * 1024   # < v7x 64 MiB physical; raises v5e's 16 MiB default
_BN_EPS = 1e-5                   # PyTorch BatchNorm2d default


def _round_up(x, m):
    return (x + m - 1) // m * m


def _pad_lanes(n):
    # 256-aligned output tiles feed the full 2x256^2 MXU on v6e/v7x.
    return _round_up(n, 256) if n >= 256 else _round_up(n, 128)


# ----------------------------------------------------------------------------
# Pallas kernels
# ----------------------------------------------------------------------------
def gemm_stats_kernel(x_ref, w_ref, y_ref, stats_ref, acc_ref):
    """bf16 GEMM tile, f32 VMEM accumulation over the K grid axis, plus
    per-channel (sum, sum_sq) partials accumulated across all M/K tiles."""
    m_i = pl.program_id(1)
    k_i = pl.program_id(2)

    @pl.when(k_i == 0)
    def _():
        acc_ref[...] = jnp.zeros_like(acc_ref)

    @pl.when(jnp.logical_and(m_i == 0, k_i == 0))
    def _():
        stats_ref[...] = jnp.zeros_like(stats_ref)

    acc_ref[...] += jnp.dot(x_ref[0], w_ref[0],
                            preferred_element_type=jnp.float32)

    @pl.when(k_i == pl.num_programs(2) - 1)
    def _():
        y = acc_ref[...]
        y_ref[0] = y.astype(y_ref.dtype)           # bf16 activation stream
        stats_ref[0] += jnp.concatenate(
            [jnp.sum(y, axis=0, keepdims=True),
             jnp.sum(y * y, axis=0, keepdims=True)], axis=0)


def gemm_kernel(x_ref, w_ref, y_ref, acc_ref):
    """Plain bf16 GEMM tile with f32 accumulation over the K grid axis."""
    k_i = pl.program_id(2)

    @pl.when(k_i == 0)
    def _():
        acc_ref[...] = jnp.zeros_like(acc_ref)

    acc_ref[...] += jnp.dot(x_ref[0], w_ref[0],
                            preferred_element_type=jnp.float32)

    @pl.when(k_i == pl.num_programs(2) - 1)
    def _():
        y_ref[0] = acc_ref[...].astype(y_ref.dtype)


def scale_shift_relu_kernel(y_ref, scale_ref, shift_ref, o_ref):
    """Fused BatchNorm-apply (precomputed per-channel scale/shift) + ReLU."""
    y = y_ref[0].astype(jnp.float32)
    o_ref[0] = jnp.maximum(y * scale_ref[...] + shift_ref[...],
                           0.0).astype(o_ref.dtype)


# ----------------------------------------------------------------------------
# Pallas wrappers
# ----------------------------------------------------------------------------
def _pick_tiles(M, K):
    Kp = _round_up(K, 128)
    tile_k = Kp if Kp <= 2048 else 1024
    Kp = _round_up(Kp, tile_k)
    cap = 1024
    while cap > 8 and cap * tile_k * 2 > 4 * 1024 * 1024:   # lhs tile <= 4 MiB bf16
        cap //= 2
    tile_m = min(cap, _round_up(M, 8))
    while tile_m > 8 and M % tile_m != 0:   # prefer an exact divisor: no M-pad copy
        tile_m //= 2
    if tile_m % 8 != 0:
        tile_m = 8
    Mp = _round_up(M, tile_m)
    return Mp, Kp, tile_m, tile_k


def _gemm_pallas(lhs, rhs, tile_m, tile_k, *, with_stats):
    G, Mp, Kp = lhs.shape
    Cp = rhs.shape[2]
    n_m, n_k = Mp // tile_m, Kp // tile_k

    in_specs = [pl.BlockSpec((1, tile_m, tile_k), lambda g, m, k: (g, m, k)),
                # weight block stays VMEM-resident across the M axis
                pl.BlockSpec((1, tile_k, Cp), lambda g, m, k: (g, k, 0))]
    y_spec = pl.BlockSpec((1, tile_m, Cp), lambda g, m, k: (g, m, 0))
    scratch = [pltpu.VMEM((tile_m, Cp), jnp.float32)]

    if with_stats:
        return pl.pallas_call(
            gemm_stats_kernel,
            out_shape=(jax.ShapeDtypeStruct((G, Mp, Cp), jnp.bfloat16),
                       jax.ShapeDtypeStruct((G, 2, Cp), jnp.float32)),
            grid=(G, n_m, n_k),
            in_specs=in_specs,
            out_specs=(y_spec,
                       pl.BlockSpec((1, 2, Cp), lambda g, m, k: (g, 0, 0))),
            scratch_shapes=scratch,
            compiler_params=pltpu.CompilerParams(
                # Sub-pixel groups are independent -> megacore-parallel on v7x;
                # per-group stats accumulate across M and K tiles -> arbitrary.
                dimension_semantics=("parallel", "arbitrary", "arbitrary"),
                vmem_limit_bytes=_VMEM_LIMIT),
        )(lhs, rhs)

    return pl.pallas_call(
        gemm_kernel,
        out_shape=jax.ShapeDtypeStruct((G, Mp, Cp), jnp.bfloat16),
        grid=(G, n_m, n_k),
        in_specs=in_specs,
        out_specs=y_spec,
        scratch_shapes=scratch,
        compiler_params=pltpu.CompilerParams(
            dimension_semantics=("parallel", "parallel", "arbitrary"),
            vmem_limit_bytes=_VMEM_LIMIT),
    )(lhs, rhs)


def _scale_shift_relu_pallas(y, scale, shift, tile_m):
    G, Mp, Cp = y.shape
    n_m = Mp // tile_m
    blk = pl.BlockSpec((1, tile_m, Cp), lambda g, m: (g, m, 0))
    vec = pl.BlockSpec((1, Cp), lambda g, m: (0, 0))
    return pl.pallas_call(
        scale_shift_relu_kernel,
        out_shape=jax.ShapeDtypeStruct((G, Mp, Cp), jnp.bfloat16),
        grid=(G, n_m),
        in_specs=[blk, vec, vec],
        out_specs=blk,
        compiler_params=pltpu.CompilerParams(
            dimension_semantics=("parallel", "parallel"),
            vmem_limit_bytes=_VMEM_LIMIT),
    )(y, scale, shift)


# ----------------------------------------------------------------------------
# ConvTranspose lowering (plain-JAX glue): patch / weight matrices, NHWC
# ----------------------------------------------------------------------------
def _patches_stride1(x, k, padding):
    """ConvT(stride=1) == stride-1 conv of edge-padded input with the flipped
    kernel.  Returns (1, N*Ho*Wo, k*k*Cin) patches, K ordered (i, j, Cin)."""
    N, H, W, C = x.shape
    e = k - 1 - padding
    xp = jnp.pad(x, ((0, 0), (e, e), (e, e), (0, 0)))
    Ho = H + 2 * e - (k - 1)
    Wo = W + 2 * e - (k - 1)
    taps = [xp[:, i:i + Ho, j:j + Wo, :] for i in range(k) for j in range(k)]
    p = jnp.stack(taps, axis=3).reshape(N * Ho * Wo, k * k * C)
    return p[None], Ho, Wo


def _weights_stride1(w_ct, k):
    # Patch tap (i, j) multiplies w[..., k-1-i, k-1-j] (flipped kernel).
    cin, cout = w_ct.shape[0], w_ct.shape[1]
    wm = jnp.flip(w_ct, axis=(2, 3)).transpose(2, 3, 0, 1).reshape(k * k * cin, cout)
    return wm[None]


_SUBPIX_TAPS = ((3, 1), (2, 0))   # kernel indices for output parity 0 / 1


def _patches_stride2(x):
    """Sub-pixel decomposition of ConvT(k=4, s=2, p=1): 4 independent stride-1
    2x2 convolutions.  Returns (4, N*H*W, 4*Cin), group g = rh*2 + rw,
    K ordered (th, tw, Cin)."""
    N, H, W, C = x.shape
    groups = []
    for rh in range(2):
        for rw in range(2):
            ph = (1, 0) if rh == 0 else (0, 1)
            pw = (1, 0) if rw == 0 else (0, 1)
            xp = jnp.pad(x, ((0, 0), ph, pw, (0, 0)))
            taps = [xp[:, th:th + H, tw:tw + W, :]
                    for th in range(2) for tw in range(2)]
            groups.append(jnp.stack(taps, axis=3).reshape(N * H * W, 4 * C))
    return jnp.stack(groups, axis=0)


def _weights_stride2(w_ct):
    cin, cout = w_ct.shape[0], w_ct.shape[1]
    groups = []
    for rh in range(2):
        for rw in range(2):
            taps = [w_ct[:, :, _SUBPIX_TAPS[rh][th], _SUBPIX_TAPS[rw][tw]]
                    for th in range(2) for tw in range(2)]
            groups.append(jnp.stack(taps, axis=0).reshape(4 * cin, cout))
    return jnp.stack(groups, axis=0)


def _assemble_output(y, N, h_g, w_g, cout, stride):
    """(G, N*h_g*w_g, Cout) per-group results -> (N, Ho, Wo, Cout) NHWC."""
    y = y.reshape(y.shape[0], N, h_g, w_g, cout)
    if stride == 1:
        return y[0]
    y = y.reshape(2, 2, N, h_g, w_g, cout).transpose(2, 3, 0, 4, 1, 5)
    return y.reshape(N, 2 * h_g, 2 * w_g, cout)


def conv_transpose_layer(x, w_ct, gamma, beta, *, stride, padding, bn_relu):
    """ConvTranspose2d(bias=False) [+ BatchNorm2d(train-mode) + ReLU | + Tanh]."""
    N, H, W, Cin = x.shape
    Cin2, Cout, k, k2 = w_ct.shape
    assert Cin == Cin2 and k == k2
    x = x.astype(jnp.bfloat16)

    if stride == 1:
        lhs, h_g, w_g = _patches_stride1(x, k, padding)
        rhs = _weights_stride1(w_ct, k)
    else:
        assert stride == 2 and k == 4 and padding == 1
        lhs = _patches_stride2(x)
        rhs = _weights_stride2(w_ct)
        h_g, w_g = H, W                      # per-sub-pixel output spatial size

    G, M, K = lhs.shape
    Mp, Kp, tile_m, tile_k = _pick_tiles(M, K)
    Cp = _pad_lanes(Cout)

    lhs = jnp.pad(lhs, ((0, 0), (0, Mp - M), (0, Kp - K)))
    rhs = jnp.pad(rhs, ((0, 0), (0, Kp - K), (0, Cp - Cout))).astype(jnp.bfloat16)

    if not bn_relu:
        y = _gemm_pallas(lhs, rhs, tile_m, tile_k, with_stats=False)
        y = y[:, :M, :Cout].astype(jnp.float32)
        out = _assemble_output(y, N, h_g, w_g, Cout, stride)
        # Tanh on the sliced (M, nc) result in JAX: no padded-lane EUP work,
        # kernel store stays lane-dense bf16.
        return jnp.tanh(out)

    y, stats_g = _gemm_pallas(lhs, rhs, tile_m, tile_k, with_stats=True)

    # Fold training-mode BatchNorm into per-channel scale/shift (O(C) JAX math).
    # Var = E[y^2] - E[y]^2 in f32, clamped at 0; zero-padded rows/channels do
    # not perturb the statistics because `count` uses the true row count.
    stats = jnp.sum(stats_g, axis=0)               # reduce per-group partials
    count = float(G * M)
    mean = stats[0] / count
    var = jnp.maximum(stats[1] / count - mean * mean, 0.0)
    inv_std = lax.rsqrt(var + _BN_EPS)
    gamma_p = jnp.pad(gamma, (0, Cp - Cout)).astype(jnp.float32)
    beta_p = jnp.pad(beta, (0, Cp - Cout)).astype(jnp.float32)
    scale = (gamma_p * inv_std).reshape(1, Cp)
    shift = (beta_p - mean * gamma_p * inv_std).reshape(1, Cp)

    out = _scale_shift_relu_pallas(y, scale, shift, tile_m)
    out = out[:, :M, :Cout]
    return _assemble_output(out, N, h_g, w_g, Cout, stride)


# ----------------------------------------------------------------------------
# Generator
# ----------------------------------------------------------------------------
def make_params(key, nz, ngf, nc):
    specs = [
        (nz,      ngf * 8),   # ConvT1 + BN + ReLU   (stride 1, pad 0)
        (ngf * 8, ngf * 4),   # ConvT2 + BN + ReLU   (stride 2, pad 1)
        (ngf * 4, ngf * 2),   # ConvT3 + BN + ReLU
        (ngf * 2, ngf),       # ConvT4 + BN + ReLU
        (ngf,     nc),        # ConvT5 + Tanh
    ]
    params = []
    for cin, cout in specs:
        key, kw_, kg, kb = jax.random.split(key, 4)
        w = 0.02 * jax.random.normal(kw_, (cin, cout, 4, 4), jnp.float32)
        gamma = 1.0 + 0.02 * jax.random.normal(kg, (cout,), jnp.float32)
        beta = 0.02 * jax.random.normal(kb, (cout,), jnp.float32)
        params.append((w, gamma, beta))
    return params


def generator_forward(z, params):
    # z: (N, nz, 1, 1) NCHW (PyTorch layout); output: (N, nc, 64, 64) NCHW.
    h = z.transpose(0, 2, 3, 1)  # -> NHWC, kept channels-last end-to-end
    h = conv_transpose_layer(h, *params[0], stride=1, padding=0, bn_relu=True)
    h = conv_transpose_layer(h, *params[1], stride=2, padding=1, bn_relu=True)
    h = conv_transpose_layer(h, *params[2], stride=2, padding=1, bn_relu=True)
    h = conv_transpose_layer(h, *params[3], stride=2, padding=1, bn_relu=True)
    h = conv_transpose_layer(h, *params[4], stride=2, padding=1, bn_relu=False)
    return h.transpose(0, 3, 1, 2)  # -> NCHW


if __name__ == "__main__":
    # config: size_of_z_latent=16, number_of_generator_feature=8, number_channels=3
    nz, ngf, nc = 16, 8, 3
    batch = 2

    key = jax.random.PRNGKey(0)
    key, kz = jax.random.split(key)
    z = jax.random.normal(kz, (batch, nz, 1, 1), jnp.float32)
    params = make_params(key, nz, ngf, nc)

    out = jax.jit(generator_forward)(z, params)
    out = jax.block_until_ready(out)

    assert out.shape == (batch, nc, 64, 64), out.shape
    assert bool(jnp.all(jnp.isfinite(out)))
    assert bool(jnp.all((out >= -1.0) & (out <= 1.0)))  # tanh output range
    print("KERNEL_OK")
</pallas_src>

<mosaic_0001>
module attributes {stable_mosaic.version = 11 : i64} {
  func.func @gemm_stats_kernel(%arg0: i32, %arg1: i32, %arg2: i32, %arg3: memref<1x32x256xbf16, #tpu.memory_space<vmem>>, %arg4: memref<1x256x128xbf16, #tpu.memory_space<vmem>>, %arg5: memref<1x32x128xbf16, #tpu.memory_space<vmem>>, %arg6: memref<1x2x128xf32, #tpu.memory_space<vmem>>, %arg7: memref<32x128xf32, #tpu.memory_space<vmem>>) attributes {dimension_semantics = [#tpu.dimension_semantics<parallel>, #tpu.dimension_semantics<arbitrary>, #tpu.dimension_semantics<arbitrary>], iteration_bounds = array<i64: 1, 1, 1>, scalar_prefetch = 0 : i64, scratch_operands = 1 : i64, tpu.core_type = #tpu.core_type<tc>, window_params = [{transform_indices = @transform_0, window_bounds = array<i64: 1, 32, 256>}, {transform_indices = @transform_1, window_bounds = array<i64: 1, 256, 128>}, {transform_indices = @transform_2, window_bounds = array<i64: 1, 32, 128>}, {transform_indices = @transform_3, window_bounds = array<i64: 1, 2, 128>}]} {
    %c0_i32 = arith.constant 0 : i32
    %0 = arith.cmpi eq, %arg2, %c0_i32 : i32
    %1 = arith.extui %0 : i1 to i32
    %c0_i32_0 = arith.constant 0 : i32
    %2 = arith.cmpi ne, %1, %c0_i32_0 : i32
    scf.if %2 {
      %cst_15 = arith.constant 0.000000e+00 : f32
      %19 = vector.broadcast %cst_15 : f32 to vector<32x128xf32>
      %c0_16 = arith.constant 0 : index
      %c0_17 = arith.constant 0 : index
      %20 = vector.load %arg7[%c0_16, %c0_17] : memref<32x128xf32, #tpu.memory_space<vmem>>, vector<32x128xf32>
      tpu.vector_store %arg7[%c0_16, %c0_17], %19 {strides = array<i32>} : memref<32x128xf32, #tpu.memory_space<vmem>>, vector<32x128xf32>,
    } else {
    }
    %c0_i32_1 = arith.constant 0 : i32
    %3 = arith.cmpi eq, %arg1, %c0_i32_1 : i32
    %c0_i32_2 = arith.constant 0 : i32
    %4 = arith.cmpi eq, %arg2, %c0_i32_2 : i32
    %5 = arith.andi %3, %4 : i1
    %6 = arith.extui %5 : i1 to i32
    %c0_i32_3 = arith.constant 0 : i32
    %7 = arith.cmpi ne, %6, %c0_i32_3 : i32
    scf.if %7 {
      %cst_15 = arith.constant 0.000000e+00 : f32
      %19 = vector.broadcast %cst_15 : f32 to vector<1x2x128xf32>
      %c0_16 = arith.constant 0 : index
      %c0_17 = arith.constant 0 : index
      %c0_18 = arith.constant 0 : index
      %20 = vector.load %arg6[%c0_16, %c0_17, %c0_18] : memref<1x2x128xf32, #tpu.memory_space<vmem>>, vector<1x2x128xf32>
      tpu.vector_store %arg6[%c0_16, %c0_17, %c0_18], %19 {strides = array<i32>} : memref<1x2x128xf32, #tpu.memory_space<vmem>>, vector<1x2x128xf32>,
    } else {
    }
    %c0 = arith.constant 0 : index
    %c0_4 = arith.constant 0 : index
    %8 = vector.load %arg7[%c0, %c0_4] : memref<32x128xf32, #tpu.memory_space<vmem>>, vector<32x128xf32>
    %c0_5 = arith.constant 0 : index
    %c0_6 = arith.constant 0 : index
    %c0_7 = arith.constant 0 : index
    %9 = vector.load %arg3[%c0_5, %c0_6, %c0_7] : memref<1x32x256xbf16, #tpu.memory_space<vmem>>, vector<1x32x256xbf16>
    %10 = vector.shape_cast %9 : vector<1x32x256xbf16> to vector<32x256xbf16>
    %c0_8 = arith.constant 0 : index
    %c0_9 = arith.constant 0 : index
    %c0_10 = arith.constant 0 : index
    %11 = vector.load %arg4[%c0_8, %c0_9, %c0_10] : memref<1x256x128xbf16, #tpu.memory_space<vmem>>, vector<1x256x128xbf16>
    %12 = vector.shape_cast %11 : vector<1x256x128xbf16> to vector<256x128xbf16>
    %cst = arith.constant dense<0.000000e+00> : vector<32x128xf32>
    %13 = tpu.matmul %10, %12, %cst {dimension_numbers = #tpu.dot_dimension_numbers<[1], [0], [0], [1], [0, 0, 1, 1], [], []>} : vector<32x256xbf16>, vector<256x128xbf16>, vector<32x128xf32> -> vector<32x128xf32>
    %14 = arith.addf %8, %13 : vector<32x128xf32>
    %c0_11 = arith.constant 0 : index
    %c0_12 = arith.constant 0 : index
    %15 = vector.load %arg7[%c0_11, %c0_12] : memref<32x128xf32, #tpu.memory_space<vmem>>, vector<32x128xf32>
    tpu.vector_store %arg7[%c0_11, %c0_12], %14 {strides = array<i32>} : memref<32x128xf32, #tpu.memory_space<vmem>>, vector<32x128xf32>,
    %c0_i32_13 = arith.constant 0 : i32
    %16 = arith.cmpi eq, %arg2, %c0_i32_13 : i32
    %17 = arith.extui %16 : i1 to i32
    %c0_i32_14 = arith.constant 0 : i32
    %18 = arith.cmpi ne, %17, %c0_i32_14 : i32
    scf.if %18 {
      %c0_15 = arith.constant 0 : index
      %c0_16 = arith.constant 0 : index
      %19 = vector.load %arg7[%c0_15, %c0_16] : memref<32x128xf32, #tpu.memory_space<vmem>>, vector<32x128xf32>
      %20 = arith.truncf %19 : vector<32x128xf32> to vector<32x128xbf16>
      %c0_17 = arith.constant 0 : index
      %c0_18 = arith.constant 0 : index
      %c0_19 = arith.constant 0 : index
      %21 = vector.load %arg5[%c0_17, %c0_18, %c0_19] : memref<1x32x128xbf16, #tpu.memory_space<vmem>>, vector<1x32x128xbf16>
      %22 = vector.shape_cast %21 : vector<1x32x128xbf16> to vector<32x128xbf16>
      %23 = vector.shape_cast %20 : vector<32x128xbf16> to vector<1x32x128xbf16>
      tpu.vector_store %arg5[%c0_17, %c0_18, %c0_19], %23 {strides = array<i32>} : memref<1x32x128xbf16, #tpu.memory_space<vmem>>, vector<1x32x128xbf16>,
      %c0_20 = arith.constant 0 : index
      %c0_21 = arith.constant 0 : index
      %c0_22 = arith.constant 0 : index
      %24 = vector.load %arg6[%c0_20, %c0_21, %c0_22] : memref<1x2x128xf32, #tpu.memory_space<vmem>>, vector<1x2x128xf32>
      %25 = vector.shape_cast %24 : vector<1x2x128xf32> to vector<2x128xf32>
      %cst_23 = arith.constant dense<0.000000e+00> : vector<128xf32>
      %26 = vector.multi_reduction <add>, %19, %cst_23 [0] : vector<32x128xf32> to vector<128xf32>
      %27 = vector.shape_cast %26 : vector<128xf32> to vector<1x128xf32>
      %28 = arith.mulf %19, %19 : vector<32x128xf32>
      %cst_24 = arith.constant dense<0.000000e+00> : vector<128xf32>
      %29 = vector.multi_reduction <add>, %28, %cst_24 [0] : vector<32x128xf32> to vector<128xf32>
      %30 = vector.shape_cast %29 : vector<128xf32> to vector<1x128xf32>
      %31 = tpu.concatenate %27, %30 in 0 : vector<1x128xf32>, vector<1x128xf32> -> vector<2x128xf32>
      %32 = arith.addf %25, %31 : vector<2x128xf32>
      %c0_25 = arith.constant 0 : index
      %c0_26 = arith.constant 0 : index
      %c0_27 = arith.constant 0 : index
      %33 = vector.load %arg6[%c0_25, %c0_26, %c0_27] : memref<1x2x128xf32, #tpu.memory_space<vmem>>, vector<1x2x128xf32>
      %34 = vector.shape_cast %33 : vector<1x2x128xf32> to vector<2x128xf32>
      %35 = vector.shape_cast %32 : vector<2x128xf32> to vector<1x2x128xf32>
      tpu.vector_store %arg6[%c0_25, %c0_26, %c0_27], %35 {strides = array<i32>} : memref<1x2x128xf32, #tpu.memory_space<vmem>>, vector<1x2x128xf32>,
    } else {
    }
    return
  }
  func.func @transform_0(%arg0: i32, %arg1: i32, %arg2: i32) -> (i32, i32, i32) {
    %c0_i32 = arith.constant 0 : i32
    return %arg0, %arg1, %arg2 : i32, i32, i32
  }
  func.func @transform_1(%arg0: i32, %arg1: i32, %arg2: i32) -> (i32, i32, i32) {
    %c0_i32 = arith.constant 0 : i32
    %c0_i32_0 = arith.constant 0 : i32
    return %arg0, %arg2, %c0_i32 : i32, i32, i32
  }
  func.func @transform_2(%arg0: i32, %arg1: i32, %arg2: i32) -> (i32, i32, i32) {
    %c0_i32 = arith.constant 0 : i32
    %c0_i32_0 = arith.constant 0 : i32
    return %arg0, %arg1, %c0_i32 : i32, i32, i32
  }
  func.func @transform_3(%arg0: i32, %arg1: i32, %arg2: i32) -> (i32, i32, i32) {
    %c0_i32 = arith.constant 0 : i32
    %c0_i32_0 = arith.constant 0 : i32
    %c0_i32_1 = arith.constant 0 : i32
    return %arg0, %c0_i32, %c0_i32_0 : i32, i32, i32
  }
}

module attributes {stable_mosaic.version = 11 : i64} {
  func.func @scale_shift_relu_kernel(%arg0: i32, %arg1: i32, %arg2: memref<1x32x128xbf16, #tpu.memory_space<vmem>>, %arg3: memref<1x128xf32, #tpu.memory_space<vmem>>, %arg4: memref<1x128xf32, #tpu.memory_space<vmem>>, %arg5: memref<1x32x128xbf16, #tpu.memory_space<vmem>>) attributes {dimension_semantics = [#tpu.dimension_semantics<parallel>, #tpu.dimension_semantics<parallel>], iteration_bounds = array<i64: 1, 1>, scalar_prefetch = 0 : i64, scratch_operands = 0 : i64, tpu.core_type = #tpu.core_type<tc>, window_params = [{transform_indices = @transform_0, window_bounds = array<i64: 1, 32, 128>}, {pipeline_mode = #tpu.pipeline_mode<synchronous>, transform_indices = @transform_1, window_bounds = array<i64: 1, 128>}, {pipeline_mode = #tpu.pipeline_mode<synchronous>, transform_indices = @transform_2, window_bounds = array<i64: 1, 128>}, {transform_indices = @transform_3, window_bounds = array<i64: 1, 32, 128>}]} {
    %c0 = arith.constant 0 : index
    %c0_0 = arith.constant 0 : index
    %c0_1 = arith.constant 0 : index
    %0 = vector.load %arg2[%c0, %c0_0, %c0_1] : memref<1x32x128xbf16, #tpu.memory_space<vmem>>, vector<1x32x128xbf16>
    %1 = vector.shape_cast %0 : vector<1x32x128xbf16> to vector<32x128xbf16>
    %2 = arith.extf %1 : vector<32x128xbf16> to vector<32x128xf32>
    %c0_2 = arith.constant 0 : index
    %c0_3 = arith.constant 0 : index
    %3 = vector.load %arg3[%c0_2, %c0_3] : memref<1x128xf32, #tpu.memory_space<vmem>>, vector<1x128xf32>
    %4 = vector.broadcast %3 : vector<1x128xf32> to vector<32x128xf32>
    %5 = arith.mulf %2, %4 : vector<32x128xf32>
    %c0_4 = arith.constant 0 : index
    %c0_5 = arith.constant 0 : index
    %6 = vector.load %arg4[%c0_4, %c0_5] : memref<1x128xf32, #tpu.memory_space<vmem>>, vector<1x128xf32>
    %7 = vector.broadcast %6 : vector<1x128xf32> to vector<32x128xf32>
    %8 = arith.addf %5, %7 : vector<32x128xf32>
    %cst = arith.constant 0.000000e+00 : f32
    %9 = vector.broadcast %cst : f32 to vector<32x128xf32>
    %10 = arith.maximumf %8, %9 : vector<32x128xf32>
    %11 = arith.truncf %10 : vector<32x128xf32> to vector<32x128xbf16>
    %c0_6 = arith.constant 0 : index
    %c0_7 = arith.constant 0 : index
    %c0_8 = arith.constant 0 : index
    %12 = vector.load %arg5[%c0_6, %c0_7, %c0_8] : memref<1x32x128xbf16, #tpu.memory_space<vmem>>, vector<1x32x128xbf16>
    %13 = vector.shape_cast %12 : vector<1x32x128xbf16> to vector<32x128xbf16>
    %14 = vector.shape_cast %11 : vector<32x128xbf16> to vector<1x32x128xbf16>
    tpu.vector_store %arg5[%c0_6, %c0_7, %c0_8], %14 {strides = array<i32>} : memref<1x32x128xbf16, #tpu.memory_space<vmem>>, vector<1x32x128xbf16>,
    return
  }
  func.func @transform_0(%arg0: i32, %arg1: i32) -> (i32, i32, i32) {
    %c0_i32 = arith.constant 0 : i32
    %c0_i32_0 = arith.constant 0 : i32
    return %arg0, %arg1, %c0_i32 : i32, i32, i32
  }
  func.func @transform_1(%arg0: i32, %arg1: i32) -> (i32, i32) {
    %c0_i32 = arith.constant 0 : i32
    %c0_i32_0 = arith.constant 0 : i32
    %c0_i32_1 = arith.constant 0 : i32
    return %c0_i32, %c0_i32_0 : i32, i32
  }
  func.func @transform_2(%arg0: i32, %arg1: i32) -> (i32, i32) {
    %c0_i32 = arith.constant 0 : i32
    %c0_i32_0 = arith.constant 0 : i32
    %c0_i32_1 = arith.constant 0 : i32
    return %c0_i32, %c0_i32_0 : i32, i32
  }
  func.func @transform_3(%arg0: i32, %arg1: i32) -> (i32, i32, i32) {
    %c0_i32 = arith.constant 0 : i32
    %c0_i32_0 = arith.constant 0 : i32
    return %arg0, %arg1, %c0_i32 : i32, i32, i32
  }
}

module attributes {stable_mosaic.version = 11 : i64} {
  func.func @gemm_stats_kernel(%arg0: i32, %arg1: i32, %arg2: i32, %arg3: memref<1x32x256xbf16, #tpu.memory_space<vmem>>, %arg4: memref<1x256x128xbf16, #tpu.memory_space<vmem>>, %arg5: memref<1x32x128xbf16, #tpu.memory_space<vmem>>, %arg6: memref<1x2x128xf32, #tpu.memory_space<vmem>>, %arg7: memref<32x128xf32, #tpu.memory_space<vmem>>) attributes {dimension_semantics = [#tpu.dimension_semantics<parallel>, #tpu.dimension_semantics<arbitrary>, #tpu.dimension_semantics<arbitrary>], iteration_bounds = array<i64: 4, 1, 1>, scalar_prefetch = 0 : i64, scratch_operands = 1 : i64, tpu.core_type = #tpu.core_type<tc>, window_params = [{transform_indices = @transform_0, window_bounds = array<i64: 1, 32, 256>}, {transform_indices = @transform_1, window_bounds = array<i64: 1, 256, 128>}, {transform_indices = @transform_2, window_bounds = array<i64: 1, 32, 128>}, {transform_indices = @transform_3, window_bounds = array<i64: 1, 2, 128>}]} {
    %c0_i32 = arith.constant 0 : i32
    %0 = arith.cmpi eq, %arg2, %c0_i32 : i32
    %1 = arith.extui %0 : i1 to i32
    %c0_i32_0 = arith.constant 0 : i32
    %2 = arith.cmpi ne, %1, %c0_i32_0 : i32
    scf.if %2 {
      %cst_15 = arith.constant 0.000000e+00 : f32
      %19 = vector.broadcast %cst_15 : f32 to vector<32x128xf32>
      %c0_16 = arith.constant 0 : index
      %c0_17 = arith.constant 0 : index
      %20 = vector.load %arg7[%c0_16, %c0_17] : memref<32x128xf32, #tpu.memory_space<vmem>>, vector<32x128xf32>
      tpu.vector_store %arg7[%c0_16, %c0_17], %19 {strides = array<i32>} : memref<32x128xf32, #tpu.memory_space<vmem>>, vector<32x128xf32>,
    } else {
    }
    %c0_i32_1 = arith.constant 0 : i32
    %3 = arith.cmpi eq, %arg1, %c0_i32_1 : i32
    %c0_i32_2 = arith.constant 0 : i32
    %4 = arith.cmpi eq, %arg2, %c0_i32_2 : i32
    %5 = arith.andi %3, %4 : i1
    %6 = arith.extui %5 : i1 to i32
    %c0_i32_3 = arith.constant 0 : i32
    %7 = arith.cmpi ne, %6, %c0_i32_3 : i32
    scf.if %7 {
      %cst_15 = arith.constant 0.000000e+00 : f32
      %19 = vector.broadcast %cst_15 : f32 to vector<1x2x128xf32>
      %c0_16 = arith.constant 0 : index
      %c0_17 = arith.constant 0 : index
      %c0_18 = arith.constant 0 : index
      %20 = vector.load %arg6[%c0_16, %c0_17, %c0_18] : memref<1x2x128xf32, #tpu.memory_space<vmem>>, vector<1x2x128xf32>
      tpu.vector_store %arg6[%c0_16, %c0_17, %c0_18], %19 {strides = array<i32>} : memref<1x2x128xf32, #tpu.memory_space<vmem>>, vector<1x2x128xf32>,
    } else {
    }
    %c0 = arith.constant 0 : index
    %c0_4 = arith.constant 0 : index
    %8 = vector.load %arg7[%c0, %c0_4] : memref<32x128xf32, #tpu.memory_space<vmem>>, vector<32x128xf32>
    %c0_5 = arith.constant 0 : index
    %c0_6 = arith.constant 0 : index
    %c0_7 = arith.constant 0 : index
    %9 = vector.load %arg3[%c0_5, %c0_6, %c0_7] : memref<1x32x256xbf16, #tpu.memory_space<vmem>>, vector<1x32x256xbf16>
    %10 = vector.shape_cast %9 : vector<1x32x256xbf16> to vector<32x256xbf16>
    %c0_8 = arith.constant 0 : index
    %c0_9 = arith.constant 0 : index
    %c0_10 = arith.constant 0 : index
    %11 = vector.load %arg4[%c0_8, %c0_9, %c0_10] : memref<1x256x128xbf16, #tpu.memory_space<vmem>>, vector<1x256x128xbf16>
    %12 = vector.shape_cast %11 : vector<1x256x128xbf16> to vector<256x128xbf16>
    %cst = arith.constant dense<0.000000e+00> : vector<32x128xf32>
    %13 = tpu.matmul %10, %12, %cst {dimension_numbers = #tpu.dot_dimension_numbers<[1], [0], [0], [1], [0, 0, 1, 1], [], []>} : vector<32x256xbf16>, vector<256x128xbf16>, vector<32x128xf32> -> vector<32x128xf32>
    %14 = arith.addf %8, %13 : vector<32x128xf32>
    %c0_11 = arith.constant 0 : index
    %c0_12 = arith.constant 0 : index
    %15 = vector.load %arg7[%c0_11, %c0_12] : memref<32x128xf32, #tpu.memory_space<vmem>>, vector<32x128xf32>
    tpu.vector_store %arg7[%c0_11, %c0_12], %14 {strides = array<i32>} : memref<32x128xf32, #tpu.memory_space<vmem>>, vector<32x128xf32>,
    %c0_i32_13 = arith.constant 0 : i32
    %16 = arith.cmpi eq, %arg2, %c0_i32_13 : i32
    %17 = arith.extui %16 : i1 to i32
    %c0_i32_14 = arith.constant 0 : i32
    %18 = arith.cmpi ne, %17, %c0_i32_14 : i32
    scf.if %18 {
      %c0_15 = arith.constant 0 : index
      %c0_16 = arith.constant 0 : index
      %19 = vector.load %arg7[%c0_15, %c0_16] : memref<32x128xf32, #tpu.memory_space<vmem>>, vector<32x128xf32>
      %20 = arith.truncf %19 : vector<32x128xf32> to vector<32x128xbf16>
      %c0_17 = arith.constant 0 : index
      %c0_18 = arith.constant 0 : index
      %c0_19 = arith.constant 0 : index
      %21 = vector.load %arg5[%c0_17, %c0_18, %c0_19] : memref<1x32x128xbf16, #tpu.memory_space<vmem>>, vector<1x32x128xbf16>
      %22 = vector.shape_cast %21 : vector<1x32x128xbf16> to vector<32x128xbf16>
      %23 = vector.shape_cast %20 : vector<32x128xbf16> to vector<1x32x128xbf16>
      tpu.vector_store %arg5[%c0_17, %c0_18, %c0_19], %23 {strides = array<i32>} : memref<1x32x128xbf16, #tpu.memory_space<vmem>>, vector<1x32x128xbf16>,
      %c0_20 = arith.constant 0 : index
      %c0_21 = arith.constant 0 : index
      %c0_22 = arith.constant 0 : index
      %24 = vector.load %arg6[%c0_20, %c0_21, %c0_22] : memref<1x2x128xf32, #tpu.memory_space<vmem>>, vector<1x2x128xf32>
      %25 = vector.shape_cast %24 : vector<1x2x128xf32> to vector<2x128xf32>
      %cst_23 = arith.constant dense<0.000000e+00> : vector<128xf32>
      %26 = vector.multi_reduction <add>, %19, %cst_23 [0] : vector<32x128xf32> to vector<128xf32>
      %27 = vector.shape_cast %26 : vector<128xf32> to vector<1x128xf32>
      %28 = arith.mulf %19, %19 : vector<32x128xf32>
      %cst_24 = arith.constant dense<0.000000e+00> : vector<128xf32>
      %29 = vector.multi_reduction <add>, %28, %cst_24 [0] : vector<32x128xf32> to vector<128xf32>
      %30 = vector.shape_cast %29 : vector<128xf32> to vector<1x128xf32>
      %31 = tpu.concatenate %27, %30 in 0 : vector<1x128xf32>, vector<1x128xf32> -> vector<2x128xf32>
      %32 = arith.addf %25, %31 : vector<2x128xf32>
      %c0_25 = arith.constant 0 : index
      %c0_26 = arith.constant 0 : index
      %c0_27 = arith.constant 0 : index
      %33 = vector.load %arg6[%c0_25, %c0_26, %c0_27] : memref<1x2x128xf32, #tpu.memory_space<vmem>>, vector<1x2x128xf32>
      %34 = vector.shape_cast %33 : vector<1x2x128xf32> to vector<2x128xf32>
      %35 = vector.shape_cast %32 : vector<2x128xf32> to vector<1x2x128xf32>
      tpu.vector_store %arg6[%c0_25, %c0_26, %c0_27], %35 {strides = array<i32>} : memref<1x2x128xf32, #tpu.memory_space<vmem>>, vector<1x2x128xf32>,
    } else {
    }
    return
  }
  func.func @transform_0(%arg0: i32, %arg1: i32, %arg2: i32) -> (i32, i32, i32) {
    %c0_i32 = arith.constant 0 : i32
    return %arg0, %arg1, %arg2 : i32, i32, i32
  }
  func.func @transform_1(%arg0: i32, %arg1: i32, %arg2: i32) -> (i32, i32, i32) {
    %c0_i32 = arith.constant 0 : i32
    %c0_i32_0 = arith.constant 0 : i32
    return %arg0, %arg2, %c0_i32 : i32, i32, i32
  }
  func.func @transform_2(%arg0: i32, %arg1: i32, %arg2: i32) -> (i32, i32, i32) {
    %c0_i32 = arith.constant 0 : i32
    %c0_i32_0 = arith.constant 0 : i32
    return %arg0, %arg1, %c0_i32 : i32, i32, i32
  }
  func.func @transform_3(%arg0: i32, %arg1: i32, %arg2: i32) -> (i32, i32, i32) {
    %c0_i32 = arith.constant 0 : i32
    %c0_i32_0 = arith.constant 0 : i32
    %c0_i32_1 = arith.constant 0 : i32
    return %arg0, %c0_i32, %c0_i32_0 : i32, i32, i32
  }
}

module attributes {stable_mosaic.version = 11 : i64} {
  func.func @scale_shift_relu_kernel(%arg0: i32, %arg1: i32, %arg2: memref<1x32x128xbf16, #tpu.memory_space<vmem>>, %arg3: memref<1x128xf32, #tpu.memory_space<vmem>>, %arg4: memref<1x128xf32, #tpu.memory_space<vmem>>, %arg5: memref<1x32x128xbf16, #tpu.memory_space<vmem>>) attributes {dimension_semantics = [#tpu.dimension_semantics<parallel>, #tpu.dimension_semantics<parallel>], iteration_bounds = array<i64: 4, 1>, scalar_prefetch = 0 : i64, scratch_operands = 0 : i64, tpu.core_type = #tpu.core_type<tc>, window_params = [{transform_indices = @transform_0, window_bounds = array<i64: 1, 32, 128>}, {pipeline_mode = #tpu.pipeline_mode<synchronous>, transform_indices = @transform_1, window_bounds = array<i64: 1, 128>}, {pipeline_mode = #tpu.pipeline_mode<synchronous>, transform_indices = @transform_2, window_bounds = array<i64: 1, 128>}, {transform_indices = @transform_3, window_bounds = array<i64: 1, 32, 128>}]} {
    %c0 = arith.constant 0 : index
    %c0_0 = arith.constant 0 : index
    %c0_1 = arith.constant 0 : index
    %0 = vector.load %arg2[%c0, %c0_0, %c0_1] : memref<1x32x128xbf16, #tpu.memory_space<vmem>>, vector<1x32x128xbf16>
    %1 = vector.shape_cast %0 : vector<1x32x128xbf16> to vector<32x128xbf16>
    %2 = arith.extf %1 : vector<32x128xbf16> to vector<32x128xf32>
    %c0_2 = arith.constant 0 : index
    %c0_3 = arith.constant 0 : index
    %3 = vector.load %arg3[%c0_2, %c0_3] : memref<1x128xf32, #tpu.memory_space<vmem>>, vector<1x128xf32>
    %4 = vector.broadcast %3 : vector<1x128xf32> to vector<32x128xf32>
    %5 = arith.mulf %2, %4 : vector<32x128xf32>
    %c0_4 = arith.constant 0 : index
    %c0_5 = arith.constant 0 : index
    %6 = vector.load %arg4[%c0_4, %c0_5] : memref<1x128xf32, #tpu.memory_space<vmem>>, vector<1x128xf32>
    %7 = vector.broadcast %6 : vector<1x128xf32> to vector<32x128xf32>
    %8 = arith.addf %5, %7 : vector<32x128xf32>
    %cst = arith.constant 0.000000e+00 : f32
    %9 = vector.broadcast %cst : f32 to vector<32x128xf32>
    %10 = arith.maximumf %8, %9 : vector<32x128xf32>
    %11 = arith.truncf %10 : vector<32x128xf32> to vector<32x128xbf16>
    %c0_6 = arith.constant 0 : index
    %c0_7 = arith.constant 0 : index
    %c0_8 = arith.constant 0 : index
    %12 = vector.load %arg5[%c0_6, %c0_7, %c0_8] : memref<1x32x128xbf16, #tpu.memory_space<vmem>>, vector<1x32x128xbf16>
    %13 = vector.shape_cast %12 : vector<1x32x128xbf16> to vector<32x128xbf16>
    %14 = vector.shape_cast %11 : vector<32x128xbf16> to vector<1x32x128xbf16>
    tpu.vector_store %arg5[%c0_6, %c0_7, %c0_8], %14 {strides = array<i32>} : memref<1x32x128xbf16, #tpu.memory_space<vmem>>, vector<1x32x128xbf16>,
    return
  }
  func.func @transform_0(%arg0: i32, %arg1: i32) -> (i32, i32, i32) {
    %c0_i32 = arith.constant 0 : i32
    %c0_i32_0 = arith.constant 0 : i32
    return %arg0, %arg1, %c0_i32 : i32, i32, i32
  }
  func.func @transform_1(%arg0: i32, %arg1: i32) -> (i32, i32) {
    %c0_i32 = arith.constant 0 : i32
    %c0_i32_0 = arith.constant 0 : i32
    %c0_i32_1 = arith.constant 0 : i32
    return %c0_i32, %c0_i32_0 : i32, i32
  }
  func.func @transform_2(%arg0: i32, %arg1: i32) -> (i32, i32) {
    %c0_i32 = arith.constant 0 : i32
    %c0_i32_0 = arith.constant 0 : i32
    %c0_i32_1 = arith.constant 0 : i32
    return %c0_i32, %c0_i32_0 : i32, i32
  }
  func.func @transform_3(%arg0: i32, %arg1: i32) -> (i32, i32, i32) {
    %c0_i32 = arith.constant 0 : i32
    %c0_i32_0 = arith.constant 0 : i32
    return %arg0, %arg1, %c0_i32 : i32, i32, i32
  }
}

module attributes {stable_mosaic.version = 11 : i64} {
  func.func @gemm_stats_kernel(%arg0: i32, %arg1: i32, %arg2: i32, %arg3: memref<1x128x128xbf16, #tpu.memory_space<vmem>>, %arg4: memref<1x128x128xbf16, #tpu.memory_space<vmem>>, %arg5: memref<1x128x128xbf16, #tpu.memory_space<vmem>>, %arg6: memref<1x2x128xf32, #tpu.memory_space<vmem>>, %arg7: memref<128x128xf32, #tpu.memory_space<vmem>>) attributes {dimension_semantics = [#tpu.dimension_semantics<parallel>, #tpu.dimension_semantics<arbitrary>, #tpu.dimension_semantics<arbitrary>], iteration_bounds = array<i64: 4, 1, 1>, scalar_prefetch = 0 : i64, scratch_operands = 1 : i64, tpu.core_type = #tpu.core_type<tc>, window_params = [{transform_indices = @transform_0, window_bounds = array<i64: 1, 128, 128>}, {transform_indices = @transform_1, window_bounds = array<i64: 1, 128, 128>}, {transform_indices = @transform_2, window_bounds = array<i64: 1, 128, 128>}, {transform_indices = @transform_3, window_bounds = array<i64: 1, 2, 128>}]} {
    %c0_i32 = arith.constant 0 : i32
    %0 = arith.cmpi eq, %arg2, %c0_i32 : i32
    %1 = arith.extui %0 : i1 to i32
    %c0_i32_0 = arith.constant 0 : i32
    %2 = arith.cmpi ne, %1, %c0_i32_0 : i32
    scf.if %2 {
      %cst_15 = arith.constant 0.000000e+00 : f32
      %19 = vector.broadcast %cst_15 : f32 to vector<128x128xf32>
      %c0_16 = arith.constant 0 : index
      %c0_17 = arith.constant 0 : index
      %20 = vector.load %arg7[%c0_16, %c0_17] : memref<128x128xf32, #tpu.memory_space<vmem>>, vector<128x128xf32>
      tpu.vector_store %arg7[%c0_16, %c0_17], %19 {strides = array<i32>} : memref<128x128xf32, #tpu.memory_space<vmem>>, vector<128x128xf32>,
    } else {
    }
    %c0_i32_1 = arith.constant 0 : i32
    %3 = arith.cmpi eq, %arg1, %c0_i32_1 : i32
    %c0_i32_2 = arith.constant 0 : i32
    %4 = arith.cmpi eq, %arg2, %c0_i32_2 : i32
    %5 = arith.andi %3, %4 : i1
    %6 = arith.extui %5 : i1 to i32
    %c0_i32_3 = arith.constant 0 : i32
    %7 = arith.cmpi ne, %6, %c0_i32_3 : i32
    scf.if %7 {
      %cst_15 = arith.constant 0.000000e+00 : f32
      %19 = vector.broadcast %cst_15 : f32 to vector<1x2x128xf32>
      %c0_16 = arith.constant 0 : index
      %c0_17 = arith.constant 0 : index
      %c0_18 = arith.constant 0 : index
      %20 = vector.load %arg6[%c0_16, %c0_17, %c0_18] : memref<1x2x128xf32, #tpu.memory_space<vmem>>, vector<1x2x128xf32>
      tpu.vector_store %arg6[%c0_16, %c0_17, %c0_18], %19 {strides = array<i32>} : memref<1x2x128xf32, #tpu.memory_space<vmem>>, vector<1x2x128xf32>,
    } else {
    }
    %c0 = arith.constant 0 : index
    %c0_4 = arith.constant 0 : index
    %8 = vector.load %arg7[%c0, %c0_4] : memref<128x128xf32, #tpu.memory_space<vmem>>, vector<128x128xf32>
    %c0_5 = arith.constant 0 : index
    %c0_6 = arith.constant 0 : index
    %c0_7 = arith.constant 0 : index
    %9 = vector.load %arg3[%c0_5, %c0_6, %c0_7] : memref<1x128x128xbf16, #tpu.memory_space<vmem>>, vector<1x128x128xbf16>
    %10 = vector.shape_cast %9 : vector<1x128x128xbf16> to vector<128x128xbf16>
    %c0_8 = arith.constant 0 : index
    %c0_9 = arith.constant 0 : index
    %c0_10 = arith.constant 0 : index
    %11 = vector.load %arg4[%c0_8, %c0_9, %c0_10] : memref<1x128x128xbf16, #tpu.memory_space<vmem>>, vector<1x128x128xbf16>
    %12 = vector.shape_cast %11 : vector<1x128x128xbf16> to vector<128x128xbf16>
    %cst = arith.constant dense<0.000000e+00> : vector<128x128xf32>
    %13 = tpu.matmul %10, %12, %cst {dimension_numbers = #tpu.dot_dimension_numbers<[1], [0], [0], [1], [0, 0, 1, 1], [], []>} : vector<128x128xbf16>, vector<128x128xbf16>, vector<128x128xf32> -> vector<128x128xf32>
    %14 = arith.addf %8, %13 : vector<128x128xf32>
    %c0_11 = arith.constant 0 : index
    %c0_12 = arith.constant 0 : index
    %15 = vector.load %arg7[%c0_11, %c0_12] : memref<128x128xf32, #tpu.memory_space<vmem>>, vector<128x128xf32>
    tpu.vector_store %arg7[%c0_11, %c0_12], %14 {strides = array<i32>} : memref<128x128xf32, #tpu.memory_space<vmem>>, vector<128x128xf32>,
    %c0_i32_13 = arith.constant 0 : i32
    %16 = arith.cmpi eq, %arg2, %c0_i32_13 : i32
    %17 = arith.extui %16 : i1 to i32
    %c0_i32_14 = arith.constant 0 : i32
    %18 = arith.cmpi ne, %17, %c0_i32_14 : i32
    scf.if %18 {
      %c0_15 = arith.constant 0 : index
      %c0_16 = arith.constant 0 : index
      %19 = vector.load %arg7[%c0_15, %c0_16] : memref<128x128xf32, #tpu.memory_space<vmem>>, vector<128x128xf32>
      %20 = arith.truncf %19 : vector<128x128xf32> to vector<128x128xbf16>
      %c0_17 = arith.constant 0 : index
      %c0_18 = arith.constant 0 : index
      %c0_19 = arith.constant 0 : index
      %21 = vector.load %arg5[%c0_17, %c0_18, %c0_19] : memref<1x128x128xbf16, #tpu.memory_space<vmem>>, vector<1x128x128xbf16>
      %22 = vector.shape_cast %21 : vector<1x128x128xbf16> to vector<128x128xbf16>
      %23 = vector.shape_cast %20 : vector<128x128xbf16> to vector<1x128x128xbf16>
      tpu.vector_store %arg5[%c0_17, %c0_18, %c0_19], %23 {strides = array<i32>} : memref<1x128x128xbf16, #tpu.memory_space<vmem>>, vector<1x128x128xbf16>,
      %c0_20 = arith.constant 0 : index
      %c0_21 = arith.constant 0 : index
      %c0_22 = arith.constant 0 : index
      %24 = vector.load %arg6[%c0_20, %c0_21, %c0_22] : memref<1x2x128xf32, #tpu.memory_space<vmem>>, vector<1x2x128xf32>
      %25 = vector.shape_cast %24 : vector<1x2x128xf32> to vector<2x128xf32>
      %cst_23 = arith.constant dense<0.000000e+00> : vector<128xf32>
      %26 = vector.multi_reduction <add>, %19, %cst_23 [0] : vector<128x128xf32> to vector<128xf32>
      %27 = vector.shape_cast %26 : vector<128xf32> to vector<1x128xf32>
      %28 = arith.mulf %19, %19 : vector<128x128xf32>
      %cst_24 = arith.constant dense<0.000000e+00> : vector<128xf32>
      %29 = vector.multi_reduction <add>, %28, %cst_24 [0] : vector<128x128xf32> to vector<128xf32>
      %30 = vector.shape_cast %29 : vector<128xf32> to vector<1x128xf32>
      %31 = tpu.concatenate %27, %30 in 0 : vector<1x128xf32>, vector<1x128xf32> -> vector<2x128xf32>
      %32 = arith.addf %25, %31 : vector<2x128xf32>
      %c0_25 = arith.constant 0 : index
      %c0_26 = arith.constant 0 : index
      %c0_27 = arith.constant 0 : index
      %33 = vector.load %arg6[%c0_25, %c0_26, %c0_27] : memref<1x2x128xf32, #tpu.memory_space<vmem>>, vector<1x2x128xf32>
      %34 = vector.shape_cast %33 : vector<1x2x128xf32> to vector<2x128xf32>
      %35 = vector.shape_cast %32 : vector<2x128xf32> to vector<1x2x128xf32>
      tpu.vector_store %arg6[%c0_25, %c0_26, %c0_27], %35 {strides = array<i32>} : memref<1x2x128xf32, #tpu.memory_space<vmem>>, vector<1x2x128xf32>,
    } else {
    }
    return
  }
  func.func @transform_0(%arg0: i32, %arg1: i32, %arg2: i32) -> (i32, i32, i32) {
    %c0_i32 = arith.constant 0 : i32
    return %arg0, %arg1, %arg2 : i32, i32, i32
  }
  func.func @transform_1(%arg0: i32, %arg1: i32, %arg2: i32) -> (i32, i32, i32) {
    %c0_i32 = arith.constant 0 : i32
    %c0_i32_0 = arith.constant 0 : i32
    return %arg0, %arg2, %c0_i32 : i32, i32, i32
  }
  func.func @transform_2(%arg0: i32, %arg1: i32, %arg2: i32) -> (i32, i32, i32) {
    %c0_i32 = arith.constant 0 : i32
    %c0_i32_0 = arith.constant 0 : i32
    return %arg0, %arg1, %c0_i32 : i32, i32, i32
  }
  func.func @transform_3(%arg0: i32, %arg1: i32, %arg2: i32) -> (i32, i32, i32) {
    %c0_i32 = arith.constant 0 : i32
    %c0_i32_0 = arith.constant 0 : i32
    %c0_i32_1 = arith.constant 0 : i32
    return %arg0, %c0_i32, %c0_i32_0 : i32, i32, i32
  }
}

module attributes {stable_mosaic.version = 11 : i64} {
  func.func @scale_shift_relu_kernel(%arg0: i32, %arg1: i32, %arg2: memref<1x128x128xbf16, #tpu.memory_space<vmem>>, %arg3: memref<1x128xf32, #tpu.memory_space<vmem>>, %arg4: memref<1x128xf32, #tpu.memory_space<vmem>>, %arg5: memref<1x128x128xbf16, #tpu.memory_space<vmem>>) attributes {dimension_semantics = [#tpu.dimension_semantics<parallel>, #tpu.dimension_semantics<parallel>], iteration_bounds = array<i64: 4, 1>, scalar_prefetch = 0 : i64, scratch_operands = 0 : i64, tpu.core_type = #tpu.core_type<tc>, window_params = [{transform_indices = @transform_0, window_bounds = array<i64: 1, 128, 128>}, {pipeline_mode = #tpu.pipeline_mode<synchronous>, transform_indices = @transform_1, window_bounds = array<i64: 1, 128>}, {pipeline_mode = #tpu.pipeline_mode<synchronous>, transform_indices = @transform_2, window_bounds = array<i64: 1, 128>}, {transform_indices = @transform_3, window_bounds = array<i64: 1, 128, 128>}]} {
    %c0 = arith.constant 0 : index
    %c0_0 = arith.constant 0 : index
    %c0_1 = arith.constant 0 : index
    %0 = vector.load %arg2[%c0, %c0_0, %c0_1] : memref<1x128x128xbf16, #tpu.memory_space<vmem>>, vector<1x128x128xbf16>
    %1 = vector.shape_cast %0 : vector<1x128x128xbf16> to vector<128x128xbf16>
    %2 = arith.extf %1 : vector<128x128xbf16> to vector<128x128xf32>
    %c0_2 = arith.constant 0 : index
    %c0_3 = arith.constant 0 : index
    %3 = vector.load %arg3[%c0_2, %c0_3] : memref<1x128xf32, #tpu.memory_space<vmem>>, vector<1x128xf32>
    %4 = vector.broadcast %3 : vector<1x128xf32> to vector<128x128xf32>
    %5 = arith.mulf %2, %4 : vector<128x128xf32>
    %c0_4 = arith.constant 0 : index
    %c0_5 = arith.constant 0 : index
    %6 = vector.load %arg4[%c0_4, %c0_5] : memref<1x128xf32, #tpu.memory_space<vmem>>, vector<1x128xf32>
    %7 = vector.broadcast %6 : vector<1x128xf32> to vector<128x128xf32>
    %8 = arith.addf %5, %7 : vector<128x128xf32>
    %cst = arith.constant 0.000000e+00 : f32
    %9 = vector.broadcast %cst : f32 to vector<128x128xf32>
    %10 = arith.maximumf %8, %9 : vector<128x128xf32>
    %11 = arith.truncf %10 : vector<128x128xf32> to vector<128x128xbf16>
    %c0_6 = arith.constant 0 : index
    %c0_7 = arith.constant 0 : index
    %c0_8 = arith.constant 0 : index
    %12 = vector.load %arg5[%c0_6, %c0_7, %c0_8] : memref<1x128x128xbf16, #tpu.memory_space<vmem>>, vector<1x128x128xbf16>
    %13 = vector.shape_cast %12 : vector<1x128x128xbf16> to vector<128x128xbf16>
    %14 = vector.shape_cast %11 : vector<128x128xbf16> to vector<1x128x128xbf16>
    tpu.vector_store %arg5[%c0_6, %c0_7, %c0_8], %14 {strides = array<i32>} : memref<1x128x128xbf16, #tpu.memory_space<vmem>>, vector<1x128x128xbf16>,
    return
  }
  func.func @transform_0(%arg0: i32, %arg1: i32) -> (i32, i32, i32) {
    %c0_i32 = arith.constant 0 : i32
    %c0_i32_0 = arith.constant 0 : i32
    return %arg0, %arg1, %c0_i32 : i32, i32, i32
  }
  func.func @transform_1(%arg0: i32, %arg1: i32) -> (i32, i32) {
    %c0_i32 = arith.constant 0 : i32
    %c0_i32_0 = arith.constant 0 : i32
    %c0_i32_1 = arith.constant 0 : i32
    return %c0_i32, %c0_i32_0 : i32, i32
  }
  func.func @transform_2(%arg0: i32, %arg1: i32) -> (i32, i32) {
    %c0_i32 = arith.constant 0 : i32
    %c0_i32_0 = arith.constant 0 : i32
    %c0_i32_1 = arith.constant 0 : i32
    return %c0_i32, %c0_i32_0 : i32, i32
  }
  func.func @transform_3(%arg0: i32, %arg1: i32) -> (i32, i32, i32) {
    %c0_i32 = arith.constant 0 : i32
    %c0_i32_0 = arith.constant 0 : i32
    return %arg0, %arg1, %c0_i32 : i32, i32, i32
  }
}

module attributes {stable_mosaic.version = 11 : i64} {
  func.func @gemm_stats_kernel(%arg0: i32, %arg1: i32, %arg2: i32, %arg3: memref<1x512x128xbf16, #tpu.memory_space<vmem>>, %arg4: memref<1x128x128xbf16, #tpu.memory_space<vmem>>, %arg5: memref<1x512x128xbf16, #tpu.memory_space<vmem>>, %arg6: memref<1x2x128xf32, #tpu.memory_space<vmem>>, %arg7: memref<512x128xf32, #tpu.memory_space<vmem>>) attributes {dimension_semantics = [#tpu.dimension_semantics<parallel>, #tpu.dimension_semantics<arbitrary>, #tpu.dimension_semantics<arbitrary>], iteration_bounds = array<i64: 4, 1, 1>, scalar_prefetch = 0 : i64, scratch_operands = 1 : i64, tpu.core_type = #tpu.core_type<tc>, window_params = [{transform_indices = @transform_0, window_bounds = array<i64: 1, 512, 128>}, {transform_indices = @transform_1, window_bounds = array<i64: 1, 128, 128>}, {transform_indices = @transform_2, window_bounds = array<i64: 1, 512, 128>}, {transform_indices = @transform_3, window_bounds = array<i64: 1, 2, 128>}]} {
    %c0_i32 = arith.constant 0 : i32
    %0 = arith.cmpi eq, %arg2, %c0_i32 : i32
    %1 = arith.extui %0 : i1 to i32
    %c0_i32_0 = arith.constant 0 : i32
    %2 = arith.cmpi ne, %1, %c0_i32_0 : i32
    scf.if %2 {
      %cst_15 = arith.constant 0.000000e+00 : f32
      %19 = vector.broadcast %cst_15 : f32 to vector<512x128xf32>
      %c0_16 = arith.constant 0 : index
      %c0_17 = arith.constant 0 : index
      %20 = vector.load %arg7[%c0_16, %c0_17] : memref<512x128xf32, #tpu.memory_space<vmem>>, vector<512x128xf32>
      tpu.vector_store %arg7[%c0_16, %c0_17], %19 {strides = array<i32>} : memref<512x128xf32, #tpu.memory_space<vmem>>, vector<512x128xf32>,
    } else {
    }
    %c0_i32_1 = arith.constant 0 : i32
    %3 = arith.cmpi eq, %arg1, %c0_i32_1 : i32
    %c0_i32_2 = arith.constant 0 : i32
    %4 = arith.cmpi eq, %arg2, %c0_i32_2 : i32
    %5 = arith.andi %3, %4 : i1
    %6 = arith.extui %5 : i1 to i32
    %c0_i32_3 = arith.constant 0 : i32
    %7 = arith.cmpi ne, %6, %c0_i32_3 : i32
    scf.if %7 {
      %cst_15 = arith.constant 0.000000e+00 : f32
      %19 = vector.broadcast %cst_15 : f32 to vector<1x2x128xf32>
      %c0_16 = arith.constant 0 : index
      %c0_17 = arith.constant 0 : index
      %c0_18 = arith.constant 0 : index
      %20 = vector.load %arg6[%c0_16, %c0_17, %c0_18] : memref<1x2x128xf32, #tpu.memory_space<vmem>>, vector<1x2x128xf32>
      tpu.vector_store %arg6[%c0_16, %c0_17, %c0_18], %19 {strides = array<i32>} : memref<1x2x128xf32, #tpu.memory_space<vmem>>, vector<1x2x128xf32>,
    } else {
    }
    %c0 = arith.constant 0 : index
    %c0_4 = arith.constant 0 : index
    %8 = vector.load %arg7[%c0, %c0_4] : memref<512x128xf32, #tpu.memory_space<vmem>>, vector<512x128xf32>
    %c0_5 = arith.constant 0 : index
    %c0_6 = arith.constant 0 : index
    %c0_7 = arith.constant 0 : index
    %9 = vector.load %arg3[%c0_5, %c0_6, %c0_7] : memref<1x512x128xbf16, #tpu.memory_space<vmem>>, vector<1x512x128xbf16>
    %10 = vector.shape_cast %9 : vector<1x512x128xbf16> to vector<512x128xbf16>
    %c0_8 = arith.constant 0 : index
    %c0_9 = arith.constant 0 : index
    %c0_10 = arith.constant 0 : index
    %11 = vector.load %arg4[%c0_8, %c0_9, %c0_10] : memref<1x128x128xbf16, #tpu.memory_space<vmem>>, vector<1x128x128xbf16>
    %12 = vector.shape_cast %11 : vector<1x128x128xbf16> to vector<128x128xbf16>
    %cst = arith.constant dense<0.000000e+00> : vector<512x128xf32>
    %13 = tpu.matmul %10, %12, %cst {dimension_numbers = #tpu.dot_dimension_numbers<[1], [0], [0], [1], [0, 0, 1, 1], [], []>} : vector<512x128xbf16>, vector<128x128xbf16>, vector<512x128xf32> -> vector<512x128xf32>
    %14 = arith.addf %8, %13 : vector<512x128xf32>
    %c0_11 = arith.constant 0 : index
    %c0_12 = arith.constant 0 : index
    %15 = vector.load %arg7[%c0_11, %c0_12] : memref<512x128xf32, #tpu.memory_space<vmem>>, vector<512x128xf32>
    tpu.vector_store %arg7[%c0_11, %c0_12], %14 {strides = array<i32>} : memref<512x128xf32, #tpu.memory_space<vmem>>, vector<512x128xf32>,
    %c0_i32_13 = arith.constant 0 : i32
    %16 = arith.cmpi eq, %arg2, %c0_i32_13 : i32
    %17 = arith.extui %16 : i1 to i32
    %c0_i32_14 = arith.constant 0 : i32
    %18 = arith.cmpi ne, %17, %c0_i32_14 : i32
    scf.if %18 {
      %c0_15 = arith.constant 0 : index
      %c0_16 = arith.constant 0 : index
      %19 = vector.load %arg7[%c0_15, %c0_16] : memref<512x128xf32, #tpu.memory_space<vmem>>, vector<512x128xf32>
      %20 = arith.truncf %19 : vector<512x128xf32> to vector<512x128xbf16>
      %c0_17 = arith.constant 0 : index
      %c0_18 = arith.constant 0 : index
      %c0_19 = arith.constant 0 : index
      %21 = vector.load %arg5[%c0_17, %c0_18, %c0_19] : memref<1x512x128xbf16, #tpu.memory_space<vmem>>, vector<1x512x128xbf16>
      %22 = vector.shape_cast %21 : vector<1x512x128xbf16> to vector<512x128xbf16>
      %23 = vector.shape_cast %20 : vector<512x128xbf16> to vector<1x512x128xbf16>
      tpu.vector_store %arg5[%c0_17, %c0_18, %c0_19], %23 {strides = array<i32>} : memref<1x512x128xbf16, #tpu.memory_space<vmem>>, vector<1x512x128xbf16>,
      %c0_20 = arith.constant 0 : index
      %c0_21 = arith.constant 0 : index
      %c0_22 = arith.constant 0 : index
      %24 = vector.load %arg6[%c0_20, %c0_21, %c0_22] : memref<1x2x128xf32, #tpu.memory_space<vmem>>, vector<1x2x128xf32>
      %25 = vector.shape_cast %24 : vector<1x2x128xf32> to vector<2x128xf32>
      %cst_23 = arith.constant dense<0.000000e+00> : vector<128xf32>
      %26 = vector.multi_reduction <add>, %19, %cst_23 [0] : vector<512x128xf32> to vector<128xf32>
      %27 = vector.shape_cast %26 : vector<128xf32> to vector<1x128xf32>
      %28 = arith.mulf %19, %19 : vector<512x128xf32>
      %cst_24 = arith.constant dense<0.000000e+00> : vector<128xf32>
      %29 = vector.multi_reduction <add>, %28, %cst_24 [0] : vector<512x128xf32> to vector<128xf32>
      %30 = vector.shape_cast %29 : vector<128xf32> to vector<1x128xf32>
      %31 = tpu.concatenate %27, %30 in 0 : vector<1x128xf32>, vector<1x128xf32> -> vector<2x128xf32>
      %32 = arith.addf %25, %31 : vector<2x128xf32>
      %c0_25 = arith.constant 0 : index
      %c0_26 = arith.constant 0 : index
      %c0_27 = arith.constant 0 : index
      %33 = vector.load %arg6[%c0_25, %c0_26, %c0_27] : memref<1x2x128xf32, #tpu.memory_space<vmem>>, vector<1x2x128xf32>
      %34 = vector.shape_cast %33 : vector<1x2x128xf32> to vector<2x128xf32>
      %35 = vector.shape_cast %32 : vector<2x128xf32> to vector<1x2x128xf32>
      tpu.vector_store %arg6[%c0_25, %c0_26, %c0_27], %35 {strides = array<i32>} : memref<1x2x128xf32, #tpu.memory_space<vmem>>, vector<1x2x128xf32>,
    } else {
    }
    return
  }
  func.func @transform_0(%arg0: i32, %arg1: i32, %arg2: i32) -> (i32, i32, i32) {
    %c0_i32 = arith.constant 0 : i32
    return %arg0, %arg1, %arg2 : i32, i32, i32
  }
  func.func @transform_1(%arg0: i32, %arg1: i32, %arg2: i32) -> (i32, i32, i32) {
    %c0_i32 = arith.constant 0 : i32
    %c0_i32_0 = arith.constant 0 : i32
    return %arg0, %arg2, %c0_i32 : i32, i32, i32
  }
  func.func @transform_2(%arg0: i32, %arg1: i32, %arg2: i32) -> (i32, i32, i32) {
    %c0_i32 = arith.constant 0 : i32
    %c0_i32_0 = arith.constant 0 : i32
    return %arg0, %arg1, %c0_i32 : i32, i32, i32
  }
  func.func @transform_3(%arg0: i32, %arg1: i32, %arg2: i32) -> (i32, i32, i32) {
    %c0_i32 = arith.constant 0 : i32
    %c0_i32_0 = arith.constant 0 : i32
    %c0_i32_1 = arith.constant 0 : i32
    return %arg0, %c0_i32, %c0_i32_0 : i32, i32, i32
  }
}

module attributes {stable_mosaic.version = 11 : i64} {
  func.func @scale_shift_relu_kernel(%arg0: i32, %arg1: i32, %arg2: memref<1x512x128xbf16, #tpu.memory_space<vmem>>, %arg3: memref<1x128xf32, #tpu.memory_space<vmem>>, %arg4: memref<1x128xf32, #tpu.memory_space<vmem>>, %arg5: memref<1x512x128xbf16, #tpu.memory_space<vmem>>) attributes {dimension_semantics = [#tpu.dimension_semantics<parallel>, #tpu.dimension_semantics<parallel>], iteration_bounds = array<i64: 4, 1>, scalar_prefetch = 0 : i64, scratch_operands = 0 : i64, tpu.core_type = #tpu.core_type<tc>, window_params = [{transform_indices = @transform_0, window_bounds = array<i64: 1, 512, 128>}, {pipeline_mode = #tpu.pipeline_mode<synchronous>, transform_indices = @transform_1, window_bounds = array<i64: 1, 128>}, {pipeline_mode = #tpu.pipeline_mode<synchronous>, transform_indices = @transform_2, window_bounds = array<i64: 1, 128>}, {transform_indices = @transform_3, window_bounds = array<i64: 1, 512, 128>}]} {
    %c0 = arith.constant 0 : index
    %c0_0 = arith.constant 0 : index
    %c0_1 = arith.constant 0 : index
    %0 = vector.load %arg2[%c0, %c0_0, %c0_1] : memref<1x512x128xbf16, #tpu.memory_space<vmem>>, vector<1x512x128xbf16>
    %1 = vector.shape_cast %0 : vector<1x512x128xbf16> to vector<512x128xbf16>
    %2 = arith.extf %1 : vector<512x128xbf16> to vector<512x128xf32>
    %c0_2 = arith.constant 0 : index
    %c0_3 = arith.constant 0 : index
    %3 = vector.load %arg3[%c0_2, %c0_3] : memref<1x128xf32, #tpu.memory_space<vmem>>, vector<1x128xf32>
    %4 = vector.broadcast %3 : vector<1x128xf32> to vector<512x128xf32>
    %5 = arith.mulf %2, %4 : vector<512x128xf32>
    %c0_4 = arith.constant 0 : index
    %c0_5 = arith.constant 0 : index
    %6 = vector.load %arg4[%c0_4, %c0_5] : memref<1x128xf32, #tpu.memory_space<vmem>>, vector<1x128xf32>
    %7 = vector.broadcast %6 : vector<1x128xf32> to vector<512x128xf32>
    %8 = arith.addf %5, %7 : vector<512x128xf32>
    %cst = arith.constant 0.000000e+00 : f32
    %9 = vector.broadcast %cst : f32 to vector<512x128xf32>
    %10 = arith.maximumf %8, %9 : vector<512x128xf32>
    %11 = arith.truncf %10 : vector<512x128xf32> to vector<512x128xbf16>
    %c0_6 = arith.constant 0 : index
    %c0_7 = arith.constant 0 : index
    %c0_8 = arith.constant 0 : index
    %12 = vector.load %arg5[%c0_6, %c0_7, %c0_8] : memref<1x512x128xbf16, #tpu.memory_space<vmem>>, vector<1x512x128xbf16>
    %13 = vector.shape_cast %12 : vector<1x512x128xbf16> to vector<512x128xbf16>
    %14 = vector.shape_cast %11 : vector<512x128xbf16> to vector<1x512x128xbf16>
    tpu.vector_store %arg5[%c0_6, %c0_7, %c0_8], %14 {strides = array<i32>} : memref<1x512x128xbf16, #tpu.memory_space<vmem>>, vector<1x512x128xbf16>,
    return
  }
  func.func @transform_0(%arg0: i32, %arg1: i32) -> (i32, i32, i32) {
    %c0_i32 = arith.constant 0 : i32
    %c0_i32_0 = arith.constant 0 : i32
    return %arg0, %arg1, %c0_i32 : i32, i32, i32
  }
  func.func @transform_1(%arg0: i32, %arg1: i32) -> (i32, i32) {
    %c0_i32 = arith.constant 0 : i32
    %c0_i32_0 = arith.constant 0 : i32
    %c0_i32_1 = arith.constant 0 : i32
    return %c0_i32, %c0_i32_0 : i32, i32
  }
  func.func @transform_2(%arg0: i32, %arg1: i32) -> (i32, i32) {
    %c0_i32 = arith.constant 0 : i32
    %c0_i32_0 = arith.constant 0 : i32
    %c0_i32_1 = arith.constant 0 : i32
    return %c0_i32, %c0_i32_0 : i32, i32
  }
  func.func @transform_3(%arg0: i32, %arg1: i32) -> (i32, i32, i32) {
    %c0_i32 = arith.constant 0 : i32
    %c0_i32_0 = arith.constant 0 : i32
    return %arg0, %arg1, %c0_i32 : i32, i32, i32
  }
}

module attributes {stable_mosaic.version = 11 : i64} {
  func.func @gemm_kernel(%arg0: i32, %arg1: i32, %arg2: i32, %arg3: memref<1x1024x128xbf16, #tpu.memory_space<vmem>>, %arg4: memref<1x128x128xbf16, #tpu.memory_space<vmem>>, %arg5: memref<1x1024x128xbf16, #tpu.memory_space<vmem>>, %arg6: memref<1024x128xf32, #tpu.memory_space<vmem>>) attributes {dimension_semantics = [#tpu.dimension_semantics<parallel>, #tpu.dimension_semantics<parallel>, #tpu.dimension_semantics<arbitrary>], iteration_bounds = array<i64: 4, 2, 1>, scalar_prefetch = 0 : i64, scratch_operands = 1 : i64, tpu.core_type = #tpu.core_type<tc>, window_params = [{transform_indices = @transform_0, window_bounds = array<i64: 1, 1024, 128>}, {transform_indices = @transform_1, window_bounds = array<i64: 1, 128, 128>}, {transform_indices = @transform_2, window_bounds = array<i64: 1, 1024, 128>}]} {
    %c0_i32 = arith.constant 0 : i32
    %0 = arith.cmpi eq, %arg2, %c0_i32 : i32
    %1 = arith.extui %0 : i1 to i32
    %c0_i32_0 = arith.constant 0 : i32
    %2 = arith.cmpi ne, %1, %c0_i32_0 : i32
    scf.if %2 {
      %cst_12 = arith.constant 0.000000e+00 : f32
      %14 = vector.broadcast %cst_12 : f32 to vector<1024x128xf32>
      %c0_13 = arith.constant 0 : index
      %c0_14 = arith.constant 0 : index
      %15 = vector.load %arg6[%c0_13, %c0_14] : memref<1024x128xf32, #tpu.memory_space<vmem>>, vector<1024x128xf32>
      tpu.vector_store %arg6[%c0_13, %c0_14], %14 {strides = array<i32>} : memref<1024x128xf32, #tpu.memory_space<vmem>>, vector<1024x128xf32>,
    } else {
    }
    %c0 = arith.constant 0 : index
    %c0_1 = arith.constant 0 : index
    %3 = vector.load %arg6[%c0, %c0_1] : memref<1024x128xf32, #tpu.memory_space<vmem>>, vector<1024x128xf32>
    %c0_2 = arith.constant 0 : index
    %c0_3 = arith.constant 0 : index
    %c0_4 = arith.constant 0 : index
    %4 = vector.load %arg3[%c0_2, %c0_3, %c0_4] : memref<1x1024x128xbf16, #tpu.memory_space<vmem>>, vector<1x1024x128xbf16>
    %5 = vector.shape_cast %4 : vector<1x1024x128xbf16> to vector<1024x128xbf16>
    %c0_5 = arith.constant 0 : index
    %c0_6 = arith.constant 0 : index
    %c0_7 = arith.constant 0 : index
    %6 = vector.load %arg4[%c0_5, %c0_6, %c0_7] : memref<1x128x128xbf16, #tpu.memory_space<vmem>>, vector<1x128x128xbf16>
    %7 = vector.shape_cast %6 : vector<1x128x128xbf16> to vector<128x128xbf16>
    %cst = arith.constant dense<0.000000e+00> : vector<1024x128xf32>
    %8 = tpu.matmul %5, %7, %cst {dimension_numbers = #tpu.dot_dimension_numbers<[1], [0], [0], [1], [0, 0, 1, 1], [], []>} : vector<1024x128xbf16>, vector<128x128xbf16>, vector<1024x128xf32> -> vector<1024x128xf32>
    %9 = arith.addf %3, %8 : vector<1024x128xf32>
    %c0_8 = arith.constant 0 : index
    %c0_9 = arith.constant 0 : index
    %10 = vector.load %arg6[%c0_8, %c0_9] : memref<1024x128xf32, #tpu.memory_space<vmem>>, vector<1024x128xf32>
    tpu.vector_store %arg6[%c0_8, %c0_9], %9 {strides = array<i32>} : memref<1024x128xf32, #tpu.memory_space<vmem>>, vector<1024x128xf32>,
    %c0_i32_10 = arith.constant 0 : i32
    %11 = arith.cmpi eq, %arg2, %c0_i32_10 : i32
    %12 = arith.extui %11 : i1 to i32
    %c0_i32_11 = arith.constant 0 : i32
    %13 = arith.cmpi ne, %12, %c0_i32_11 : i32
    scf.if %13 {
      %c0_12 = arith.constant 0 : index
      %c0_13 = arith.constant 0 : index
      %14 = vector.load %arg6[%c0_12, %c0_13] : memref<1024x128xf32, #tpu.memory_space<vmem>>, vector<1024x128xf32>
      %15 = arith.truncf %14 : vector<1024x128xf32> to vector<1024x128xbf16>
      %c0_14 = arith.constant 0 : index
      %c0_15 = arith.constant 0 : index
      %c0_16 = arith.constant 0 : index
      %16 = vector.load %arg5[%c0_14, %c0_15, %c0_16] : memref<1x1024x128xbf16, #tpu.memory_space<vmem>>, vector<1x1024x128xbf16>
      %17 = vector.shape_cast %16 : vector<1x1024x128xbf16> to vector<1024x128xbf16>
      %18 = vector.shape_cast %15 : vector<1024x128xbf16> to vector<1x1024x128xbf16>
      tpu.vector_store %arg5[%c0_14, %c0_15, %c0_16], %18 {strides = array<i32>} : memref<1x1024x128xbf16, #tpu.memory_space<vmem>>, vector<1x1024x128xbf16>,
    } else {
    }
    return
  }
  func.func @transform_0(%arg0: i32, %arg1: i32, %arg2: i32) -> (i32, i32, i32) {
    %c0_i32 = arith.constant 0 : i32
    return %arg0, %arg1, %arg2 : i32, i32, i32
  }
  func.func @transform_1(%arg0: i32, %arg1: i32, %arg2: i32) -> (i32, i32, i32) {
    %c0_i32 = arith.constant 0 : i32
    %c0_i32_0 = arith.constant 0 : i32
    return %arg0, %arg2, %c0_i32 : i32, i32, i32
  }
  func.func @transform_2(%arg0: i32, %arg1: i32, %arg2: i32) -> (i32, i32, i32) {
    %c0_i32 = arith.constant 0 : i32
    %c0_i32_0 = arith.constant 0 : i32
    return %arg0, %arg1, %c0_i32 : i32, i32, i32
  }
}

</mosaic_0001>

<bundles_post_ra>
// kernel: generator_forward.10
= control target key start
LH: loop header
LB: loop body
LE: loop exit
PB: predicated region body
PF: predicated region fallthrough
CT: control target
= control target key end

     0   :  { %s140_s0 = inlined_call_operand.vmem [shape: bf16[1,32,128], index: 0, kind: input, shape index: {}]   ;;  %s141_s1 = inlined_call_operand.vmem [shape: f32[1,128], index: 1, kind: input, shape index: {}]   ;;  %s142_s2 = inlined_call_operand.vmem [shape: f32[1,128], index: 2, kind: input, shape index: {}]   ;;  %s143_s3 = inlined_call_operand.vmem [shape: bf16[1,32,128], index: 3, kind: output, shape index: {}]  }
   0x1   :  { %v83_v0 = vld [vmem:[%s140_s0] sm:$0xff]   ;;  %v100_v4 = vld [vmem:[%s140_s0 + $0x8] sm:$0xff]  }
   0x2   :  { %v72_v1 = vld [vmem:[%s141_s1] ss:$0 sm:$0xff]  ;;  %v84_v2 = vunpack.c.l.bf16 %v83_v0  ;;  %v85_v3 = vunpack.c.h.bf16 %v83_v0  ;;  %v88_v6 = vunpack.c.l.bf16 %v100_v4  ;;  %v89_v7 = vunpack.c.h.bf16 %v100_v4 }
   0x3   :  { %v73_v5 = vld [vmem:[%s142_s2] ss:$0 sm:$0xff] }
   0x4   :  { %v29_v8 = vmul.f32 %v84_v2, %v72_v1  ;;  %v30_v9 = vmul.f32 %v85_v3, %v72_v1  ;;  %v31_v10 = vmul.f32 %v88_v6, %v72_v1  ;;  %v32_v11 = vmul.f32 %v89_v7, %v72_v1 }
   0x6   :  { %v40_v12 = vadd.f32 %v73_v5, %v29_v8  ;;  %v41_v13 = vadd.f32 %v73_v5, %v30_v9  ;;  %v42_v14 = vadd.f32 %v73_v5, %v31_v10  ;;  %v43_v15 = vadd.f32 %v73_v5, %v32_v11 }
   0x8   :  { %v44_v16 = vmax.f32 %v40_v12, 0.0  ;;  %v45_v17 = vmax.f32 %v41_v13, 0.0  ;;  %v46_v18 = vmax.f32 %v42_v14, 0.0  ;;  %v47_v19 = vmax.f32 %v43_v15, 0.0 }
   0xa   :  { %v93_v20 = vpack.c.bf16 %v45_v17, %v44_v16  ;;  %v98_v21 = vpack.c.bf16 %v47_v19, %v46_v18 }
   0xc   :  { %94 = vst [vmem:[%s143_s3] sm:$0xff] %v93_v20   ;;  %101 = vst [vmem:[%s143_s3 + $0x8] sm:$0xff] %v98_v21  }

// kernel: generator_forward.9
= control target key start
LH: loop header
LB: loop body
LE: loop exit
PB: predicated region body
PF: predicated region fallthrough
CT: control target
= control target key end

     0   :  { %v409_v20 = vmov 0.0   ;;  %vm291_vm0 = vcmask 1040384   ;;  %s505_s1 = inlined_call_operand.vmem [shape: bf16[1,256,128], index: 1, kind: input, shape index: {}]   ;;  %s506_s0 = inlined_call_operand.vmem [shape: bf16[1,32,256], index: 0, kind: input, shape index: {}]   ;;  %s507_s3 = inlined_call_operand.vmem [shape: f32[1,2,128], index: 3, kind: output, shape index: {1}]   ;;  %s508_s2 = inlined_call_operand.vmem [shape: bf16[1,32,128], index: 2, kind: output, shape index: {0}]  }
   0x1   :  { %v387_v0 = vld [vmem:[%s505_s1 + $0x78] sm:$0xff]   ;;  %v389_v2 = vld [vmem:[%s505_s1 + $0x70] sm:$0xff]   ;;  %v391_v4 = vld [vmem:[%s505_s1 + $0x68] sm:$0xff]   ;;  %27 = vst [vmem:[%s507_s3] sm:$0x3] %v409_v20 }
   0x2   :  { %v388_v1 = vld [vmem:[%s505_s1 + $0x38] sm:$0xff]   ;;  %342 = vmatprep.subr.bf16.mxu0 %v387_v0  ;;  %370 = vmatprep.subr.bf16.mxu1 %v387_v0  ;;  %v390_v3 = vld [vmem:[%s505_s1 + $0x30] sm:$0xff]   ;;  %v392_v5 = vld [vmem:[%s505_s1 + $0x28] sm:$0xff]  }
   0x3   :  { %343 = vmatpush3.bf16.msra.mxu0 %v388_v1  ;;  %378 = vmatpush3.bf16.msra.mxu1 %v388_v1  ;;  %v393_v6 = vld [vmem:[%s505_s1 + $0x60] sm:$0xff]   ;;  %v395_v8 = vld [vmem:[%s505_s1 + $0x58] sm:$0xff]   ;;  %v397_v10 = vld [vmem:[%s505_s1 + $0x50] sm:$0xff]  }
   0x4   :  { %344 = vmatprep.subr.bf16.mxu0 %v389_v2  ;;  %371 = vmatprep.subr.bf16.mxu1 %v389_v2  ;;  %v394_v7 = vld [vmem:[%s505_s1 + $0x20] sm:$0xff]   ;;  %v396_v9 = vld [vmem:[%s505_s1 + $0x18] sm:$0xff]   ;;  %v398_v13 = vld [vmem:[%s505_s1 + $0x10] sm:$0xff]  }
   0x5   :  { %v405_v11 = vld [vmem:[%s506_s0 + $0x4] ss:$8 sps:$4 sm:$0xff]   ;;  %v408_v12 = vld [vmem:[%s506_s0 + $0x14] ss:$8 sps:$4 sm:$0xff]   ;;  %v403_v18 = vld [vmem:[%s506_s0] ss:$8 sps:$4 sm:$0xff]  }
   0x6   :  { %v399_v14 = vld [vmem:[%s505_s1 + $0x48] sm:$0xff]   ;;  %216 = vmatprep.mubr.bf16.mxu0 %v405_v11  ;;  %224 = vmatprep.mubr.bf16.mxu1 %v408_v12  ;;  %v401_v16 = vld [vmem:[%s505_s1 + $0x40] sm:$0xff]   ;;  %v406_v19 = vld [vmem:[%s506_s0 + $0x10] ss:$8 sps:$4 sm:$0xff]  }
   0x7   :  { %345 = vmatpush3.bf16.msra.mxu0 %v390_v3  ;;  %379 = vmatpush3.bf16.msra.mxu1 %v390_v3  ;;  %v400_v15 = vld [vmem:[%s505_s1 + $0x8] sm:$0xff]   ;;  %v402_v17 = vld [vmem:[%s505_s1] sm:$0xff]  }
   0x8   :  { %346 = vmatprep.subr.bf16.mxu0 %v391_v4  ;;  %372 = vmatprep.subr.bf16.mxu1 %v391_v4  ;;  %v268_v55 = vld [vmem:[%s507_s3] sm:$0x3] }
   0xb   :  { %347 = vmatpush3.bf16.msra.mxu0 %v392_v5  ;;  %380 = vmatpush3.bf16.msra.mxu1 %v392_v5 }
   0xc   :  { %348 = vmatprep.subr.bf16.mxu0 %v393_v6  ;;  %373 = vmatprep.subr.bf16.mxu1 %v393_v6 }
   0xf   :  { %349 = vmatpush3.bf16.msra.mxu0 %v394_v7  ;;  %381 = vmatpush3.bf16.msra.mxu1 %v394_v7 }
  0x10   :  { %350 = vmatprep.subr.bf16.mxu0 %v395_v8  ;;  %374 = vmatprep.subr.bf16.mxu1 %v395_v8 }
  0x13   :  { %351 = vmatpush3.bf16.msra.mxu0 %v396_v9  ;;  %382 = vmatpush3.bf16.msra.mxu1 %v396_v9 }
  0x14   :  { %352 = vmatprep.subr.bf16.mxu0 %v397_v10  ;;  %375 = vmatprep.subr.bf16.mxu1 %v397_v10 }
  0x17   :  { %353 = vmatpush3.bf16.msra.mxu0 %v398_v13  ;;  %383 = vmatpush3.bf16.msra.mxu1 %v398_v13 }
  0x18   :  { %354 = vmatprep.subr.bf16.mxu0 %v399_v14  ;;  %376 = vmatprep.subr.bf16.mxu1 %v399_v14 }
  0x1b   :  { %355 = vmatpush3.bf16.msra.mxu0 %v400_v15  ;;  %384 = vmatpush3.bf16.msra.mxu1 %v400_v15 }
  0x1c   :  { %356 = vmatprep.subr.bf16.mxu0 %v401_v16  ;;  %377 = vmatprep.subr.bf16.mxu1 %v401_v16 }
  0x1f   :  { %357 = vmatpush3.bf16.msra.mxu0 %v402_v17  ;;  %385 = vmatpush3.bf16.msra.mxu1 %v402_v17 }
  0x22   :  { %217 = vmatmul.mubr.bf16.vlgmr.msra.gmra.mxu0 %v403_v18  ;;  %225 = vmatmul.mubr.bf16.vlgmr.msra.gmra.mxu1 %v406_v19 }
  0xe2   :  { %v358_v21 = vpop.f32.mrf.mxu0  ;;  %v364_v22 = vpop.f32.mrf.mxu1 }
  0xe4   :  { %v359_v23 = vpop.f32.mrf.mxu0  ;;  %v365_v24 = vpop.f32.mrf.mxu1 }
  0xe5   :  { %v360_v25 = vadd.f32 %v359_v23, %v358_v21  ;;  %v366_v30 = vadd.f32 %v365_v24, %v364_v22 }
  0xe6   :  { %v361_v26 = vpop.f32.mrf.mxu0  ;;  %v367_v27 = vpop.f32.mrf.mxu1 }
  0xe7   :  { %v278_v33 = vmul.f32 %v360_v25, %v360_v25  ;;  %v280_v38 = vmul.f32 %v366_v30, %v366_v30 }
  0xe8   :  { %v362_v28 = vpop.f32.mrf.mxu0  ;;  %v368_v29 = vpop.f32.mrf.mxu1 }
  0xe9   :  { %v363_v31 = vadd.f32 %v362_v28, %v361_v26  ;;  %v369_v32 = vadd.f32 %v368_v29, %v367_v27 }
  0xeb   :  { %v334_v34 = vpack.c.bf16 %v363_v31, %v360_v25  ;;  %v269_v35 = vadd.f32 %v363_v31, %v360_v25  ;;  %v279_v36 = vmul.f32 %v363_v31, %v363_v31  ;;  %v339_v37 = vpack.c.bf16 %v369_v32, %v366_v30 }
  0xec   :  { %v281_v42 = vmul.f32 %v369_v32, %v369_v32 }
  0xed   :  { %335 = vst [vmem:[%s508_s2] sm:$0xff] %v334_v34   ;;  %v282_v39 = vadd.f32 %v279_v36, %v278_v33  ;;  %341 = vst [vmem:[%s508_s2 + $0x8] sm:$0xff] %v339_v37   ;;  %v270_v40 = vadd.f32 %v366_v30, %v269_v35 }
  0xef   :  { %v271_v41 = vadd.f32 %v369_v32, %v270_v40  ;;  %v283_v43 = vadd.f32 %v282_v39, %v280_v38 }
  0xf1   :  { %v272_v44 = vrot.slane %v271_v41, 4  ;;  %v284_v45 = vadd.f32 %v283_v43, %v281_v42 }
  0xf3   :  { %v273_v46 = vadd.f32 %v272_v44, %v271_v41  ;;  %v285_v47 = vrot.slane %v284_v45, 4 }
  0xf5   :  { %v274_v48 = vrot.slane %v273_v46, 2  ;;  %v286_v49 = vadd.f32 %v285_v47, %v284_v45 }
  0xf7   :  { %v275_v50 = vadd.f32 %v274_v48, %v273_v46  ;;  %v287_v51 = vrot.slane %v286_v49, 2 }
  0xf9   :  { %v276_v52 = vrot.slane %v275_v50, 1  ;;  %v288_v53 = vadd.f32 %v287_v51, %v286_v49 }
  0xfb   :  { %v289_v54 = vrot.slane %v288_v53, 1  ;;  %v277_v56 = vadd.f32 %v276_v52, %v275_v50 }
  0xfd   :  { %v290_v57 = vadd.f32 %v289_v54, %v288_v53 }
  0xff   :  { %v292_v58 = vsel %vm291_vm0, %v277_v56, %v290_v57 }
 0x100   :  { %v293_v59 = vadd.f32 %v292_v58, %v268_v55 }
 0x102   :  { %294 = vst [vmem:[%s507_s3] sm:$0x3] %v293_v59 }

// kernel: generator_forward.12
= control target key start
LH: loop header
LB: loop body
LE: loop exit
PB: predicated region body
PF: predicated region fallthrough
CT: control target
= control target key end

     0   :  { %s462_s12 = smov 0   ;;  %s464_s13 = smov 0   ;;  %s501_s0 = inlined_call_operand.vmem [shape: bf16[4,32,128], index: 0, kind: input, shape index: {}]   ;;  %s502_s1 = inlined_call_operand.vmem [shape: f32[1,128], index: 1, kind: input, shape index: {}]   ;;  %s503_s2 = inlined_call_operand.vmem [shape: f32[1,128], index: 2, kind: input, shape index: {}]   ;;  %s504_s3 = inlined_call_operand.vmem [shape: bf16[4,32,128], index: 3, kind: output, shape index: {}]  }
   0x1   :  { %s466_s14 = smov 0  }
   0x2 LB: > { %s25_s15 = sadd.s32 1, %s436_s13  ;;  %p355_p0 = scmp.ge.s32.totalorder %s440_s14, 1  ;;  %s440_s14 = sphi %s466_s14, %s13_s14   ;;  %s436_s13 = sphi %s464_s13, %s506_s13   ;;  %s432_s12 = sphi %s462_s12, %s505_s12  }
   0x3   : > { %p27_p1 = scmp.ge.s32.totalorder %s25_s15, 4  ;;  %p158_p2 = scmp.lt.s32.totalorder %s440_s14, 5 }
   0x5   : > { %s508_s15 = smov (%p27_p1, %s25_s15), 0  ;;  %p159_p3 = pnand %p355_p0, %p158_p2 }
   0x6   : > { %p191_p4 = scmp.lt.s32.totalorder (!%p159_p3), %s432_s12, 3 }
   0x7   : > { %162 = sbr.rel (%p159_p3) target bundleno = 27 (0x1b), region = 32 }
   0xc   : > { %s510_s12 = smov (!%p191_p4, %s432_s12), 3  ;;  %v360_v2 = vld [vmem:[%s502_s1] ss:$0 sm:$0xff] }
   0xd   : > { %s368_s16 = sshll.u32 %s510_s12, 4  ;;  %v361_v7 = vld [vmem:[%s503_s2] ss:$0 sm:$0xff] }
   0xe   : > { %s198_s19 = scalar_lea.vmem %s501_s0, %s368_s16  ;;  %s208_s26 = scalar_lea.vmem %s504_s3, %s368_s16 }
   0xf   : > { %v375_v0 = vld [vmem:[%s198_s19] sm:$0xff]   ;;  %v392_v1 = vld [vmem:[%s198_s19 + $0x8] sm:$0xff]  }
  0x10   : > { %v376_v3 = vunpack.c.l.bf16 %v375_v0  ;;  %v377_v4 = vunpack.c.h.bf16 %v375_v0  ;;  %v380_v5 = vunpack.c.l.bf16 %v392_v1  ;;  %v381_v6 = vunpack.c.h.bf16 %v392_v1 }
  0x12   : > { %v225_v8 = vmul.f32 %v376_v3, %v360_v2  ;;  %v226_v9 = vmul.f32 %v377_v4, %v360_v2  ;;  %v227_v10 = vmul.f32 %v380_v5, %v360_v2  ;;  %v228_v11 = vmul.f32 %v381_v6, %v360_v2 }
  0x14   : > { %v236_v12 = vadd.f32 %v361_v7, %v225_v8  ;;  %v237_v13 = vadd.f32 %v361_v7, %v226_v9  ;;  %v238_v14 = vadd.f32 %v361_v7, %v227_v10  ;;  %v239_v15 = vadd.f32 %v361_v7, %v228_v11 }
  0x16   : > { %v240_v16 = vmax.f32 %v236_v12, 0.0  ;;  %v241_v17 = vmax.f32 %v237_v13, 0.0  ;;  %v242_v18 = vmax.f32 %v238_v14, 0.0  ;;  %v243_v19 = vmax.f32 %v239_v15, 0.0 }
  0x18   : > { %v385_v20 = vpack.c.bf16 %v241_v17, %v240_v16  ;;  %v390_v21 = vpack.c.bf16 %v243_v19, %v242_v18 }
  0x1a   : > { %386 = vst [vmem:[%s208_s26] sm:$0xff] %v385_v20   ;;  %393 = vst [vmem:[%s208_s26 + $0x8] sm:$0xff] %v390_v21  }
  0x1b PF: > { %s13_s14 = sadd.s32 1, %s440_s14   ;;  %s505_s12 = smov %s436_s13 }
  0x1c   : > { %p10_p5 = scmp.ge.s32.totalorder %s13_s14, 6   ;;  %s506_s13 = smov %s508_s15 }
  0x1e   :  { %12 = sbr.rel (!%p10_p5) target bundleno = 2 (0x2), region = 62 }

// kernel: generator_forward.11
= control target key start
LH: loop header
LB: loop body
LE: loop exit
PB: predicated region body
PF: predicated region fallthrough
CT: control target
= control target key end

     0   :  { %s902_s12 = smov 0   ;;  %s904_s13 = smov 0   ;;  %s970_s0 = inlined_call_operand.vmem [shape: bf16[4,32,256], index: 0, kind: input, shape index: {}]   ;;  %s971_s1 = inlined_call_operand.vmem [shape: bf16[4,256,128], index: 1, kind: input, shape index: {}]   ;;  %s972_s2 = inlined_call_operand.vmem [shape: bf16[4,32,128], index: 2, kind: output, shape index: {0}]   ;;  %s973_s3 = inlined_call_operand.vmem [shape: f32[4,2,128], index: 3, kind: output, shape index: {1}]  }
   0x1   :  { %s906_s14 = smov 0  }
   0x2 LB: > { %s33_s15 = sadd.s32 1, %s875_s13  ;;  %p714_p0 = scmp.ge.s32.totalorder %s879_s14, 1  ;;  %s879_s14 = sphi %s906_s14, %s14_s14   ;;  %s875_s13 = sphi %s904_s13, %s975_s13   ;;  %s871_s12 = sphi %s902_s12, %s974_s12  }
   0x3   : > { %p35_p1 = scmp.ge.s32.totalorder %s33_s15, 4  ;;  %p193_p2 = scmp.lt.s32.totalorder %s879_s14, 5 }
   0x5   : > { %s977_s15 = smov (%p35_p1, %s33_s15), 0  ;;  %p194_p3 = pnand %p714_p0, %p193_p2 }
   0x6   : > { %p245_p4 = scmp.lt.s32.totalorder (!%p194_p3), %s871_s12, 3 }
   0x7   : > { %197 = sbr.rel (%p194_p3) target bundleno = 273 (0x111), region = 28 }
   0xc   : > { %s979_s12 = smov (!%p245_p4, %s871_s12), 3  ;;  %v881_v20 = vmov 0.0   ;;  %vm561_vm0 = vcmask 1040384  }
   0xd   : > { %s749_s16 = sshll.u32 %s979_s12, 7  ;;  %s748_s20 = sshll.u32 %s979_s12, 5 }
   0xe   : > { %s926_s19 = scalar_lea.vmem %s971_s1, %s749_s16  ;;  %s256_s23 = scalar_lea.vmem %s970_s0, %s748_s20 }
   0xf   : > { %v835_v0 = vld [vmem:[%s926_s19 + $0x78] sm:$0xff]   ;;  %v837_v2 = vld [vmem:[%s926_s19 + $0x70] sm:$0xff]   ;;  %v839_v4 = vld [vmem:[%s926_s19 + $0x68] sm:$0xff]   ;;  %s721_s24 = sshll.u32 %s979_s12, 1  ;;  %s750_s28 = sshll.u32 %s979_s12, 4 }
  0x10   : > { %v836_v1 = vld [vmem:[%s926_s19 + $0x38] sm:$0xff]   ;;  %766 = vmatprep.subr.bf16.mxu0 %v835_v0  ;;  %794 = vmatprep.subr.bf16.mxu1 %v835_v0  ;;  %v838_v3 = vld [vmem:[%s926_s19 + $0x30] sm:$0xff]   ;;  %v840_v5 = vld [vmem:[%s926_s19 + $0x28] sm:$0xff]   ;;  %s952_s27 = scalar_lea.vmem %s973_s3, %s721_s24  ;;  %s277_s4 = scalar_lea.vmem %s972_s2, %s750_s28 }
  0x11   : > { %767 = vmatpush3.bf16.msra.mxu0 %v836_v1  ;;  %802 = vmatpush3.bf16.msra.mxu1 %v836_v1  ;;  %v841_v6 = vld [vmem:[%s926_s19 + $0x60] sm:$0xff]   ;;  %v843_v8 = vld [vmem:[%s926_s19 + $0x58] sm:$0xff]   ;;  %v845_v10 = vld [vmem:[%s926_s19 + $0x50] sm:$0xff]   ;;  %297 = vst [vmem:[%s952_s27] sm:$0x3] %v881_v20 }
  0x12   : > { %768 = vmatprep.subr.bf16.mxu0 %v837_v2  ;;  %795 = vmatprep.subr.bf16.mxu1 %v837_v2  ;;  %v842_v7 = vld [vmem:[%s926_s19 + $0x20] sm:$0xff]   ;;  %v844_v9 = vld [vmem:[%s926_s19 + $0x18] sm:$0xff]   ;;  %v846_v13 = vld [vmem:[%s926_s19 + $0x10] sm:$0xff]  }
  0x13   : > { %v853_v11 = vld [vmem:[%s256_s23 + $0x4] ss:$8 sps:$4 sm:$0xff]   ;;  %v856_v12 = vld [vmem:[%s256_s23 + $0x14] ss:$8 sps:$4 sm:$0xff]   ;;  %v851_v18 = vld [vmem:[%s256_s23] ss:$8 sps:$4 sm:$0xff]  }
  0x14   : > { %v847_v14 = vld [vmem:[%s926_s19 + $0x48] sm:$0xff]   ;;  %486 = vmatprep.mubr.bf16.mxu0 %v853_v11  ;;  %494 = vmatprep.mubr.bf16.mxu1 %v856_v12  ;;  %v849_v16 = vld [vmem:[%s926_s19 + $0x40] sm:$0xff]   ;;  %v854_v19 = vld [vmem:[%s256_s23 + $0x10] ss:$8 sps:$4 sm:$0xff]  }
  0x15   : > { %769 = vmatpush3.bf16.msra.mxu0 %v838_v3  ;;  %803 = vmatpush3.bf16.msra.mxu1 %v838_v3  ;;  %v848_v15 = vld [vmem:[%s926_s19 + $0x8] sm:$0xff]   ;;  %v850_v17 = vld [vmem:[%s926_s19] sm:$0xff]  }
  0x16   : > { %770 = vmatprep.subr.bf16.mxu0 %v839_v4  ;;  %796 = vmatprep.subr.bf16.mxu1 %v839_v4 }
  0x18   : > { %v538_v55 = vld [vmem:[%s952_s27] sm:$0x3] }
  0x19   : > { %771 = vmatpush3.bf16.msra.mxu0 %v840_v5  ;;  %804 = vmatpush3.bf16.msra.mxu1 %v840_v5 }
  0x1a   : > { %772 = vmatprep.subr.bf16.mxu0 %v841_v6  ;;  %797 = vmatprep.subr.bf16.mxu1 %v841_v6 }
  0x1d   : > { %773 = vmatpush3.bf16.msra.mxu0 %v842_v7  ;;  %805 = vmatpush3.bf16.msra.mxu1 %v842_v7 }
  0x1e   : > { %774 = vmatprep.subr.bf16.mxu0 %v843_v8  ;;  %798 = vmatprep.subr.bf16.mxu1 %v843_v8 }
  0x21   : > { %775 = vmatpush3.bf16.msra.mxu0 %v844_v9  ;;  %806 = vmatpush3.bf16.msra.mxu1 %v844_v9 }
  0x22   : > { %776 = vmatprep.subr.bf16.mxu0 %v845_v10  ;;  %799 = vmatprep.subr.bf16.mxu1 %v845_v10 }
  0x25   : > { %777 = vmatpush3.bf16.msra.mxu0 %v846_v13  ;;  %807 = vmatpush3.bf16.msra.mxu1 %v846_v13 }
  0x26   : > { %778 = vmatprep.subr.bf16.mxu0 %v847_v14  ;;  %800 = vmatprep.subr.bf16.mxu1 %v847_v14 }
  0x29   : > { %779 = vmatpush3.bf16.msra.mxu0 %v848_v15  ;;  %808 = vmatpush3.bf16.msra.mxu1 %v848_v15 }
  0x2a   : > { %780 = vmatprep.subr.bf16.mxu0 %v849_v16  ;;  %801 = vmatprep.subr.bf16.mxu1 %v849_v16 }
  0x2d   : > { %781 = vmatpush3.bf16.msra.mxu0 %v850_v17  ;;  %809 = vmatpush3.bf16.msra.mxu1 %v850_v17 }
  0x30   : > { %487 = vmatmul.mubr.bf16.vlgmr.msra.gmra.mxu0 %v851_v18  ;;  %495 = vmatmul.mubr.bf16.vlgmr.msra.gmra.mxu1 %v854_v19 }
  0xf0   : > { %v782_v21 = vpop.f32.mrf.mxu0  ;;  %v788_v22 = vpop.f32.mrf.mxu1 }
  0xf2   : > { %v783_v23 = vpop.f32.mrf.mxu0  ;;  %v789_v24 = vpop.f32.mrf.mxu1 }
  0xf3   : > { %v784_v25 = vadd.f32 %v783_v23, %v782_v21  ;;  %v790_v30 = vadd.f32 %v789_v24, %v788_v22 }
  0xf4   : > { %v785_v26 = vpop.f32.mrf.mxu0  ;;  %v791_v27 = vpop.f32.mrf.mxu1 }
  0xf5   : > { %v548_v33 = vmul.f32 %v784_v25, %v784_v25  ;;  %v550_v38 = vmul.f32 %v790_v30, %v790_v30 }
  0xf6   : > { %v786_v28 = vpop.f32.mrf.mxu0  ;;  %v792_v29 = vpop.f32.mrf.mxu1 }
  0xf7   : > { %v787_v31 = vadd.f32 %v786_v28, %v785_v26  ;;  %v793_v32 = vadd.f32 %v792_v29, %v791_v27 }
  0xf9   : > { %v758_v34 = vpack.c.bf16 %v787_v31, %v784_v25  ;;  %v539_v35 = vadd.f32 %v787_v31, %v784_v25  ;;  %v549_v36 = vmul.f32 %v787_v31, %v787_v31  ;;  %v763_v37 = vpack.c.bf16 %v793_v32, %v790_v30 }
  0xfa   : > { %v551_v42 = vmul.f32 %v793_v32, %v793_v32 }
  0xfb   : > { %759 = vst [vmem:[%s277_s4] sm:$0xff] %v758_v34   ;;  %v552_v39 = vadd.f32 %v549_v36, %v548_v33  ;;  %765 = vst [vmem:[%s277_s4 + $0x8] sm:$0xff] %v763_v37   ;;  %v540_v40 = vadd.f32 %v790_v30, %v539_v35 }
  0xfd   : > { %v541_v41 = vadd.f32 %v793_v32, %v540_v40  ;;  %v553_v43 = vadd.f32 %v552_v39, %v550_v38 }
  0xff   : > { %v542_v44 = vrot.slane %v541_v41, 4  ;;  %v554_v45 = vadd.f32 %v553_v43, %v551_v42 }
 0x101   : > { %v543_v46 = vadd.f32 %v542_v44, %v541_v41  ;;  %v555_v47 = vrot.slane %v554_v45, 4 }
 0x103   : > { %v544_v48 = vrot.slane %v543_v46, 2  ;;  %v556_v49 = vadd.f32 %v555_v47, %v554_v45 }
 0x105   : > { %v545_v50 = vadd.f32 %v544_v48, %v543_v46  ;;  %v557_v51 = vrot.slane %v556_v49, 2 }
 0x107   : > { %v546_v52 = vrot.slane %v545_v50, 1  ;;  %v558_v53 = vadd.f32 %v557_v51, %v556_v49 }
 0x109   : > { %v559_v54 = vrot.slane %v558_v53, 1  ;;  %v547_v56 = vadd.f32 %v546_v52, %v545_v50 }
 0x10b   : > { %v560_v57 = vadd.f32 %v559_v54, %v558_v53 }
 0x10d   : > { %v562_v58 = vsel %vm561_vm0, %v547_v56, %v560_v57 }
 0x10e   : > { %v563_v59 = vadd.f32 %v562_v58, %v538_v55 }
 0x110   : > { %564 = vst [vmem:[%s952_s27] sm:$0x3] %v563_v59 }
 0x111 PF: > { %s14_s14 = sadd.s32 1, %s879_s14   ;;  %s974_s12 = smov %s875_s13 }
 0x112   : > { %p11_p5 = scmp.ge.s32.totalorder %s14_s14, 6   ;;  %s975_s13 = smov %s977_s15 }
 0x114   :  { %13 = sbr.rel (!%p11_p5) target bundleno = 2 (0x2), region = 85 }

// kernel: generator_forward.14
= control target key start
LH: loop header
LB: loop body
LE: loop exit
PB: predicated region body
PF: predicated region fallthrough
CT: control target
= control target key end

     0   :  { %s672_s12 = smov 0   ;;  %s674_s13 = smov 0   ;;  %s774_s0 = inlined_call_operand.vmem [shape: bf16[4,128,128], index: 0, kind: input, shape index: {}]   ;;  %s775_s1 = inlined_call_operand.vmem [shape: f32[1,128], index: 1, kind: input, shape index: {}]   ;;  %s776_s2 = inlined_call_operand.vmem [shape: f32[1,128], index: 2, kind: input, shape index: {}]   ;;  %s777_s3 = inlined_call_operand.vmem [shape: bf16[4,128,128], index: 3, kind: output, shape index: {}]  }
   0x1   :  { %s676_s14 = smov 0  }
   0x2 LB: > { %s25_s15 = sadd.s32 1, %s646_s13  ;;  %p475_p0 = scmp.ge.s32.totalorder %s650_s14, 1  ;;  %s650_s14 = sphi %s676_s14, %s13_s14   ;;  %s646_s13 = sphi %s674_s13, %s779_s13   ;;  %s642_s12 = sphi %s672_s12, %s778_s12  }
   0x3   : > { %p27_p1 = scmp.ge.s32.totalorder %s25_s15, 4  ;;  %p158_p2 = scmp.lt.s32.totalorder %s650_s14, 5 }
   0x5   : > { %s781_s15 = smov (%p27_p1, %s25_s15), 0  ;;  %p159_p3 = pnand %p475_p0, %p158_p2 }
   0x6   : > { %p191_p4 = scmp.lt.s32.totalorder (!%p159_p3), %s642_s12, 3 }
   0x7   : > { %162 = sbr.rel (%p159_p3) target bundleno = 38 (0x26), region = 32 }
   0xc   : > { %s783_s12 = smov (!%p191_p4, %s642_s12), 3  ;;  %v703_v0 = vld [vmem:[%s775_s1] ss:$0 sm:$0xff] }
   0xd   : > { %s500_s16 = sshll.u32 %s783_s12, 6  ;;  %v712_v9 = vld [vmem:[%s776_s2] ss:$0 sm:$0xff] }
   0xe   : > { %s698_s19 = scalar_lea.vmem %s774_s0, %s500_s16  ;;  %s737_s26 = scalar_lea.vmem %s777_s3, %s500_s16 }
   0xf   : > { %v519_v1 = vld [vmem:[%s698_s19] sm:$0xff]   ;;  %v590_v2 = vld [vmem:[%s698_s19 + $0x8] sm:$0xff]   ;;  %v591_v3 = vld [vmem:[%s698_s19 + $0x10] sm:$0xff]  }
  0x10   : > { %v520_v4 = vunpack.c.l.bf16 %v519_v1  ;;  %v521_v5 = vunpack.c.h.bf16 %v519_v1  ;;  %v524_v6 = vunpack.c.l.bf16 %v590_v2  ;;  %v525_v7 = vunpack.c.h.bf16 %v590_v2  ;;  %v592_v8 = vld [vmem:[%s698_s19 + $0x18] sm:$0xff]   ;;  %v593_v30 = vld [vmem:[%s698_s19 + $0x20] sm:$0xff]   ;;  %v594_v35 = vld [vmem:[%s698_s19 + $0x28] sm:$0xff]  }
  0x11   : > { %v528_v10 = vunpack.c.l.bf16 %v591_v3  ;;  %v529_v11 = vunpack.c.h.bf16 %v591_v3  ;;  %v532_v12 = vunpack.c.l.bf16 %v592_v8  ;;  %v533_v13 = vunpack.c.h.bf16 %v592_v8  ;;  %v595_v40 = vld [vmem:[%s698_s19 + $0x30] sm:$0xff]   ;;  %v596_v45 = vld [vmem:[%s698_s19 + $0x38] sm:$0xff]  }
  0x12   : > { %v249_v14 = vmul.f32 %v520_v4, %v703_v0  ;;  %v250_v15 = vmul.f32 %v521_v5, %v703_v0  ;;  %v251_v16 = vmul.f32 %v524_v6, %v703_v0  ;;  %v252_v17 = vmul.f32 %v525_v7, %v703_v0 }
  0x13   : > { %v253_v18 = vmul.f32 %v528_v10, %v703_v0  ;;  %v254_v19 = vmul.f32 %v529_v11, %v703_v0  ;;  %v255_v20 = vmul.f32 %v532_v12, %v703_v0  ;;  %v256_v21 = vmul.f32 %v533_v13, %v703_v0 }
  0x14   : > { %v272_v22 = vadd.f32 %v712_v9, %v249_v14  ;;  %v273_v23 = vadd.f32 %v712_v9, %v250_v15  ;;  %v274_v24 = vadd.f32 %v712_v9, %v251_v16  ;;  %v275_v25 = vadd.f32 %v712_v9, %v252_v17 }
  0x15   : > { %v276_v26 = vadd.f32 %v712_v9, %v253_v18  ;;  %v277_v27 = vadd.f32 %v712_v9, %v254_v19  ;;  %v278_v28 = vadd.f32 %v712_v9, %v255_v20  ;;  %v279_v29 = vadd.f32 %v712_v9, %v256_v21 }
  0x16   : > { %v288_v31 = vmax.f32 %v272_v22, 0.0  ;;  %v289_v32 = vmax.f32 %v273_v23, 0.0  ;;  %v290_v33 = vmax.f32 %v274_v24, 0.0  ;;  %v291_v34 = vmax.f32 %v275_v25, 0.0 }
  0x17   : > { %v292_v36 = vmax.f32 %v276_v26, 0.0  ;;  %v293_v37 = vmax.f32 %v277_v27, 0.0  ;;  %v294_v38 = vmax.f32 %v278_v28, 0.0  ;;  %v295_v39 = vmax.f32 %v279_v29, 0.0 }
  0x18   : > { %v553_v41 = vpack.c.bf16 %v289_v32, %v288_v31  ;;  %v558_v42 = vpack.c.bf16 %v291_v34, %v290_v33  ;;  %v536_v43 = vunpack.c.l.bf16 %v593_v30  ;;  %v537_v44 = vunpack.c.h.bf16 %v593_v30 }
  0x19   : > { %v563_v46 = vpack.c.bf16 %v293_v37, %v292_v36  ;;  %v568_v47 = vpack.c.bf16 %v295_v39, %v294_v38  ;;  %v540_v48 = vunpack.c.l.bf16 %v594_v35  ;;  %v541_v49 = vunpack.c.h.bf16 %v594_v35 }
  0x1a   : > { %554 = vst [vmem:[%s737_s26] sm:$0xff] %v553_v41   ;;  %597 = vst [vmem:[%s737_s26 + $0x8] sm:$0xff] %v558_v42   ;;  %v257_v50 = vmul.f32 %v536_v43, %v703_v0  ;;  %v258_v51 = vmul.f32 %v537_v44, %v703_v0  ;;  %v544_v52 = vunpack.c.l.bf16 %v595_v40  ;;  %v545_v53 = vunpack.c.h.bf16 %v595_v40 }
  0x1b   : > { %598 = vst [vmem:[%s737_s26 + $0x10] sm:$0xff] %v563_v46   ;;  %599 = vst [vmem:[%s737_s26 + $0x18] sm:$0xff] %v568_v47   ;;  %v259_v54 = vmul.f32 %v540_v48, %v703_v0  ;;  %v260_v55 = vmul.f32 %v541_v49, %v703_v0  ;;  %v548_v56 = vunpack.c.l.bf16 %v596_v45  ;;  %v549_v57 = vunpack.c.h.bf16 %v596_v45 }
  0x1c   : > { %v280_v58 = vadd.f32 %v712_v9, %v257_v50  ;;  %v281_v59 = vadd.f32 %v712_v9, %v258_v51  ;;  %v261_v60 = vmul.f32 %v544_v52, %v703_v0  ;;  %v262_v61 = vmul.f32 %v545_v53, %v703_v0 }
  0x1d   : > { %v282_v62 = vadd.f32 %v712_v9, %v259_v54  ;;  %v283_v63 = vadd.f32 %v712_v9, %v260_v55  ;;  %v263_v1 = vmul.f32 %v548_v56, %v703_v0  ;;  %v264_v2 = vmul.f32 %v549_v57, %v703_v0 }
  0x1e   : > { %v296_v3 = vmax.f32 %v280_v58, 0.0  ;;  %v297_v4 = vmax.f32 %v281_v59, 0.0  ;;  %v284_v5 = vadd.f32 %v712_v9, %v261_v60  ;;  %v285_v6 = vadd.f32 %v712_v9, %v262_v61 }
  0x1f   : > { %v298_v7 = vmax.f32 %v282_v62, 0.0  ;;  %v299_v8 = vmax.f32 %v283_v63, 0.0  ;;  %v286_v10 = vadd.f32 %v712_v9, %v263_v1  ;;  %v287_v11 = vadd.f32 %v712_v9, %v264_v2 }
  0x20   : > { %v573_v12 = vpack.c.bf16 %v297_v4, %v296_v3  ;;  %v300_v13 = vmax.f32 %v284_v5, 0.0  ;;  %v301_v14 = vmax.f32 %v285_v6, 0.0 }
  0x21   : > { %v578_v15 = vpack.c.bf16 %v299_v8, %v298_v7  ;;  %v302_v0 = vmax.f32 %v286_v10, 0.0  ;;  %v303_v16 = vmax.f32 %v287_v11, 0.0 }
  0x22   : > { %600 = vst [vmem:[%s737_s26 + $0x20] sm:$0xff] %v573_v12   ;;  %v583_v17 = vpack.c.bf16 %v301_v14, %v300_v13 }
  0x23   : > { %601 = vst [vmem:[%s737_s26 + $0x28] sm:$0xff] %v578_v15   ;;  %v588_v18 = vpack.c.bf16 %v303_v16, %v302_v0 }
  0x24   : > { %602 = vst [vmem:[%s737_s26 + $0x30] sm:$0xff] %v583_v17  }
  0x25   : > { %603 = vst [vmem:[%s737_s26 + $0x38] sm:$0xff] %v588_v18  }
  0x26 PF: > { %s13_s14 = sadd.s32 1, %s650_s14   ;;  %s778_s12 = smov %s646_s13 }
  0x27   : > { %p10_p5 = scmp.ge.s32.totalorder %s13_s14, 6   ;;  %s779_s13 = smov %s781_s15 }
  0x29   :  { %12 = sbr.rel (!%p10_p5) target bundleno = 2 (0x2), region = 62 }

// kernel: generator_forward.13
= control target key start
LH: loop header
LB: loop body
LE: loop exit
PB: predicated region body
PF: predicated region fallthrough
CT: control target
= control target key end

     0   :  { %s1141_s12 = smov 0   ;;  %s1143_s13 = smov 0   ;;  %s1224_s0 = inlined_call_operand.vmem [shape: bf16[4,128,128], index: 0, kind: input, shape index: {}]   ;;  %s1225_s1 = inlined_call_operand.vmem [shape: bf16[4,128,128], index: 1, kind: input, shape index: {}]   ;;  %s1226_s2 = inlined_call_operand.vmem [shape: bf16[4,128,128], index: 2, kind: output, shape index: {0}]   ;;  %s1227_s3 = inlined_call_operand.vmem [shape: f32[4,2,128], index: 3, kind: output, shape index: {1}]  }
   0x1   :  { %s1145_s14 = smov 0  }
   0x2 LB: > { %s33_s15 = sadd.s32 1, %s1114_s13  ;;  %p883_p0 = scmp.ge.s32.totalorder %s1118_s14, 1  ;;  %s1118_s14 = sphi %s1145_s14, %s14_s14   ;;  %s1114_s13 = sphi %s1143_s13, %s1229_s13   ;;  %s1110_s12 = sphi %s1141_s12, %s1228_s12  }
   0x3   : > { %p35_p1 = scmp.ge.s32.totalorder %s33_s15, 4  ;;  %p190_p2 = scmp.lt.s32.totalorder %s1118_s14, 5 }
   0x5   : > { %s1231_s15 = smov (%p35_p1, %s33_s15), 0  ;;  %p191_p3 = pnand %p883_p0, %p190_p2 }
   0x6   : > { %p239_p4 = scmp.lt.s32.totalorder (!%p191_p3), %s1110_s12, 3 }
   0x7   : > { %194 = sbr.rel (%p191_p3) target bundleno = 295 (0x127), region = 28 }
   0xc   : > { %s1233_s12 = smov (!%p239_p4, %s1110_s12), 3  ;;  %v1120_v16 = vmov 0.0   ;;  %vm733_vm0 = vcmask 1040384  }
   0xd   : > { %s1162_s16 = sshll.u32 %s1233_s12, 6  ;;  %s890_s23 = sshll.u32 %s1233_s12, 1 }
   0xe   : > { %s1168_s19 = scalar_lea.vmem %s1225_s1, %s1162_s16  ;;  %s1177_s22 = scalar_lea.vmem %s1224_s0, %s1162_s16 }
   0xf   : > { %v1080_v0 = vld [vmem:[%s1168_s19 + $0x38] sm:$0xff]   ;;  %v1081_v1 = vld [vmem:[%s1168_s19 + $0x30] sm:$0xff]   ;;  %v1082_v2 = vld [vmem:[%s1168_s19 + $0x28] sm:$0xff]   ;;  %s1196_s26 = scalar_lea.vmem %s1227_s3, %s890_s23  ;;  %s1203_s29 = scalar_lea.vmem %s1226_s2, %s1162_s16 }
  0x10   : > { %1007 = vmatprep.subr.bf16.mxu0 %v1080_v0  ;;  %1039 = vmatprep.subr.bf16.mxu1 %v1080_v0  ;;  %v1083_v3 = vld [vmem:[%s1168_s19 + $0x20] sm:$0xff]   ;;  %v1084_v5 = vld [vmem:[%s1168_s19 + $0x18] sm:$0xff]   ;;  %v1085_v7 = vld [vmem:[%s1168_s19 + $0x10] sm:$0xff]   ;;  %301 = vst [vmem:[%s1196_s26] sm:$0x3] %v1120_v16 }
  0x11   : > { %1008 = vmatpush3.bf16.msra.mxu0 %v1080_v0  ;;  %1047 = vmatpush3.bf16.msra.mxu1 %v1080_v0  ;;  %v1088_v4 = vld [vmem:[%s1177_s22] sm:$0xff]   ;;  %v1086_v8 = vld [vmem:[%s1168_s19 + $0x8] sm:$0xff]   ;;  %v1090_v12 = vld [vmem:[%s1177_s22 + $0x10] sm:$0xff]  }
  0x12   : > { %1009 = vmatprep.subr.bf16.mxu0 %v1081_v1  ;;  %1040 = vmatprep.subr.bf16.mxu1 %v1081_v1  ;;  %v1092_v6 = vld [vmem:[%s1177_s22 + $0x20] sm:$0xff]   ;;  %v1089_v10 = vld [vmem:[%s1177_s22 + $0x8] sm:$0xff]   ;;  %v1094_v13 = vld [vmem:[%s1177_s22 + $0x30] sm:$0xff]  }
  0x13   : > { %1023 = vmatprep.mubr.bf16.mxu0 %v1088_v4  ;;  %1031 = vmatprep.mubr.bf16.mxu1 %v1092_v6  ;;  %v1087_v9 = vld [vmem:[%s1168_s19] sm:$0xff]   ;;  %v1093_v11 = vld [vmem:[%s1177_s22 + $0x28] sm:$0xff]   ;;  %v1091_v14 = vld [vmem:[%s1177_s22 + $0x18] sm:$0xff]  }
  0x14   : > { %v1095_v15 = vld [vmem:[%s1177_s22 + $0x38] sm:$0xff]  }
  0x15   : > { %1010 = vmatpush3.bf16.msra.mxu0 %v1081_v1  ;;  %1048 = vmatpush3.bf16.msra.mxu1 %v1081_v1 }
  0x16   : > { %1011 = vmatprep.subr.bf16.mxu0 %v1082_v2  ;;  %1041 = vmatprep.subr.bf16.mxu1 %v1082_v2 }
  0x19   : > { %1012 = vmatpush3.bf16.msra.mxu0 %v1082_v2  ;;  %1049 = vmatpush3.bf16.msra.mxu1 %v1082_v2 }
  0x1a   : > { %1013 = vmatprep.subr.bf16.mxu0 %v1083_v3  ;;  %1042 = vmatprep.subr.bf16.mxu1 %v1083_v3 }
  0x1d   : > { %1014 = vmatpush3.bf16.msra.mxu0 %v1083_v3  ;;  %1050 = vmatpush3.bf16.msra.mxu1 %v1083_v3 }
  0x1e   : > { %1015 = vmatprep.subr.bf16.mxu0 %v1084_v5  ;;  %1043 = vmatprep.subr.bf16.mxu1 %v1084_v5 }
  0x21   : > { %1016 = vmatpush3.bf16.msra.mxu0 %v1084_v5  ;;  %1051 = vmatpush3.bf16.msra.mxu1 %v1084_v5 }
  0x22   : > { %1017 = vmatprep.subr.bf16.mxu0 %v1085_v7  ;;  %1044 = vmatprep.subr.bf16.mxu1 %v1085_v7 }
  0x25   : > { %1018 = vmatpush3.bf16.msra.mxu0 %v1085_v7  ;;  %1052 = vmatpush3.bf16.msra.mxu1 %v1085_v7 }
  0x26   : > { %1019 = vmatprep.subr.bf16.mxu0 %v1086_v8  ;;  %1045 = vmatprep.subr.bf16.mxu1 %v1086_v8 }
  0x29   : > { %1020 = vmatpush3.bf16.msra.mxu0 %v1086_v8  ;;  %1053 = vmatpush3.bf16.msra.mxu1 %v1086_v8 }
  0x2a   : > { %1021 = vmatprep.subr.bf16.mxu0 %v1087_v9  ;;  %1046 = vmatprep.subr.bf16.mxu1 %v1087_v9 }
  0x2d   : > { %1022 = vmatpush3.bf16.msra.mxu0 %v1087_v9  ;;  %1054 = vmatpush3.bf16.msra.mxu1 %v1087_v9 }
  0x30   : > { %1024 = vmatmul.mubr.bf16.vlgmr.msra.gmra.mxu0 %v1089_v10  ;;  %1032 = vmatmul.mubr.bf16.vlgmr.msra.gmra.mxu1 %v1093_v11 }
  0x31   : > { %1027 = vmatprep.mubr.bf16.mxu0 %v1090_v12  ;;  %1035 = vmatprep.mubr.bf16.mxu1 %v1094_v13 }
  0x38   : > { %1028 = vmatmul.mubr.bf16.gmra.mxu0 %v1091_v14  ;;  %1036 = vmatmul.mubr.bf16.gmra.mxu1 %v1095_v15 }
  0xf0   : > { %v1025_v17 = vpop.f32.mrf.mxu0  ;;  %v1033_v18 = vpop.f32.mrf.mxu1 }
  0xf1   : > { %v698_v34 = vmul.f32 %v1025_v17, %v1025_v17  ;;  %v706_v4 = vmul.f32 %v1033_v18, %v1033_v18 }
  0xf2   : > { %v480_v19 = vpop.f32.mrf.mxu0  ;;  %v512_v20 = vpop.f32.mrf.mxu1 }
  0xf3   : > { %v696_v25 = vmul.f32 %v480_v19, %v480_v19  ;;  %v704_v62 = vmul.f32 %v512_v20, %v512_v20 }
  0xf4   : > { %v1026_v21 = vpop.f32.mrf.mxu0  ;;  %v1034_v22 = vpop.f32.mrf.mxu1 }
  0xf5   : > { %v952_v23 = vpack.c.bf16 %v1026_v21, %v1025_v17  ;;  %v972_v24 = vpack.c.bf16 %v1034_v22, %v1033_v18  ;;  %v699_v39 = vmul.f32 %v1026_v21, %v1026_v21  ;;  %v707_v7 = vmul.f32 %v1034_v22, %v1034_v22 }
  0xf6   : > { %v483_v26 = vpop.f32.mrf.mxu0  ;;  %v515_v27 = vpop.f32.mrf.mxu1 }
  0xf7   : > { %984 = vst [vmem:[%s1203_s29 + $0x8] sm:$0xff] %v952_v23   ;;  %v947_v28 = vpack.c.bf16 %v483_v26, %v480_v19  ;;  %v675_v29 = vadd.f32 %v483_v26, %v480_v19  ;;  %v697_v30 = vmul.f32 %v483_v26, %v483_v26  ;;  %988 = vst [vmem:[%s1203_s29 + $0x28] sm:$0xff] %v972_v24  }
  0xf8   : > { %v967_v31 = vpack.c.bf16 %v515_v27, %v512_v20  ;;  %v1029_v32 = vpop.f32.mrf.mxu0  ;;  %v1037_v33 = vpop.f32.mrf.mxu1  ;;  %v705_v2 = vmul.f32 %v515_v27, %v515_v27 }
  0xf9   : > { %948 = vst [vmem:[%s1203_s29] sm:$0xff] %v947_v28   ;;  %v676_v35 = vadd.f32 %v1025_v17, %v675_v29  ;;  %v712_v36 = vadd.f32 %v697_v30, %v696_v25  ;;  %v702_v56 = vmul.f32 %v1029_v32, %v1029_v32  ;;  %v710_v16 = vmul.f32 %v1037_v33, %v1037_v33 }
  0xfa   : > { %987 = vst [vmem:[%s1203_s29 + $0x20] sm:$0xff] %v967_v31   ;;  %v496_v37 = vpop.f32.mrf.mxu0  ;;  %v528_v38 = vpop.f32.mrf.mxu1 }
  0xfb   : > { %v713_v40 = vadd.f32 %v712_v36, %v698_v34  ;;  %v677_v41 = vadd.f32 %v1026_v21, %v676_v35  ;;  %v700_v45 = vmul.f32 %v496_v37, %v496_v37  ;;  %v708_v11 = vmul.f32 %v528_v38, %v528_v38  ;;  %v674_v34 = vld [vmem:[%s1196_s26] sm:$0x3] }
  0xfc   : > { %v1030_v42 = vpop.f32.mrf.mxu0  ;;  %v1038_v43 = vpop.f32.mrf.mxu1 }
  0xfd   : > { %v678_v44 = vadd.f32 %v677_v41, %v496_v37  ;;  %v714_v46 = vadd.f32 %v713_v40, %v699_v39  ;;  %v962_v47 = vpack.c.bf16 %v1030_v42, %v1029_v32  ;;  %v982_v49 = vpack.c.bf16 %v1038_v43, %v1037_v33 }
  0xfe   : > { %v499_v48 = vpop.f32.mrf.mxu0  ;;  %v531_v50 = vpop.f32.mrf.mxu1  ;;  %v703_v59 = vmul.f32 %v1030_v42, %v1030_v42 }
  0xff   : > { %v715_v51 = vadd.f32 %v714_v46, %v700_v45  ;;  %986 = vst [vmem:[%s1203_s29 + $0x18] sm:$0xff] %v962_v47   ;;  %v957_v52 = vpack.c.bf16 %v499_v48, %v496_v37  ;;  %v679_v53 = vadd.f32 %v678_v44, %v499_v48  ;;  %v701_v54 = vmul.f32 %v499_v48, %v499_v48 }
 0x100   : > { %990 = vst [vmem:[%s1203_s29 + $0x38] sm:$0xff] %v982_v49   ;;  %v977_v55 = vpack.c.bf16 %v531_v50, %v528_v38  ;;  %v709_v15 = vmul.f32 %v531_v50, %v531_v50 }
 0x101   : > { %985 = vst [vmem:[%s1203_s29 + $0x10] sm:$0xff] %v957_v52   ;;  %v680_v57 = vadd.f32 %v1029_v32, %v679_v53  ;;  %v716_v58 = vadd.f32 %v715_v51, %v701_v54 }
 0x102   : > { %989 = vst [vmem:[%s1203_s29 + $0x30] sm:$0xff] %v977_v55  }
 0x103   : > { %v681_v60 = vadd.f32 %v1030_v42, %v680_v57  ;;  %v717_v61 = vadd.f32 %v716_v58, %v702_v56 }
 0x105   : > { %v718_v63 = vadd.f32 %v717_v61, %v703_v59  ;;  %v682_v0 = vadd.f32 %v681_v60, %v512_v20  ;;  %v711_v20 = vmul.f32 %v1038_v43, %v1038_v43 }
 0x107   : > { %v683_v1 = vadd.f32 %v682_v0, %v515_v27  ;;  %v719_v3 = vadd.f32 %v718_v63, %v704_v62 }
 0x109   : > { %v684_v5 = vadd.f32 %v1033_v18, %v683_v1  ;;  %v720_v6 = vadd.f32 %v719_v3, %v705_v2 }
 0x10b   : > { %v721_v8 = vadd.f32 %v720_v6, %v706_v4  ;;  %v685_v9 = vadd.f32 %v1034_v22, %v684_v5 }
 0x10d   : > { %v686_v10 = vadd.f32 %v685_v9, %v528_v38  ;;  %v722_v12 = vadd.f32 %v721_v8, %v707_v7 }
 0x10f   : > { %v723_v13 = vadd.f32 %v722_v12, %v708_v11  ;;  %v687_v14 = vadd.f32 %v686_v10, %v531_v50 }
 0x111   : > { %v688_v17 = vadd.f32 %v1037_v33, %v687_v14  ;;  %v724_v19 = vadd.f32 %v723_v13, %v709_v15 }
 0x113   : > { %v689_v21 = vadd.f32 %v1038_v43, %v688_v17  ;;  %v725_v23 = vadd.f32 %v724_v19, %v710_v16 }
 0x115   : > { %v690_v24 = vrot.slane %v689_v21, 4  ;;  %v726_v25 = vadd.f32 %v725_v23, %v711_v20 }
 0x117   : > { %v691_v18 = vadd.f32 %v690_v24, %v689_v21  ;;  %v727_v26 = vrot.slane %v726_v25, 4 }
 0x119   : > { %v692_v27 = vrot.slane %v691_v18, 2  ;;  %v728_v22 = vadd.f32 %v727_v26, %v726_v25 }
 0x11b   : > { %v693_v28 = vadd.f32 %v692_v27, %v691_v18  ;;  %v729_v29 = vrot.slane %v728_v22, 2 }
 0x11d   : > { %v694_v30 = vrot.slane %v693_v28, 1  ;;  %v730_v31 = vadd.f32 %v729_v29, %v728_v22 }
 0x11f   : > { %v731_v32 = vrot.slane %v730_v31, 1  ;;  %v695_v33 = vadd.f32 %v694_v30, %v693_v28 }
 0x121   : > { %v732_v35 = vadd.f32 %v731_v32, %v730_v31 }
 0x123   : > { %v734_v36 = vsel %vm733_vm0, %v695_v33, %v732_v35 }
 0x124   : > { %v735_v37 = vadd.f32 %v734_v36, %v674_v34 }
 0x126   : > { %736 = vst [vmem:[%s1196_s26] sm:$0x3] %v735_v37 }
 0x127 PF: > { %s14_s14 = sadd.s32 1, %s1118_s14   ;;  %s1228_s12 = smov %s1114_s13 }
 0x128   : > { %p11_p5 = scmp.ge.s32.totalorder %s14_s14, 6   ;;  %s1229_s13 = smov %s1231_s15 }
 0x12a   :  { %13 = sbr.rel (!%p11_p5) target bundleno = 2 (0x2), region = 85 }

// kernel: generator_forward.16
= control target key start
LH: loop header
LB: loop body
LE: loop exit
PB: predicated region body
PF: predicated region fallthrough
CT: control target
= control target key end

     0   :  { %s1512_s12 = smov 0   ;;  %s1514_s13 = smov 0   ;;  %s1758_s0 = inlined_call_operand.vmem [shape: bf16[4,512,128], index: 0, kind: input, shape index: {}]   ;;  %s1759_s1 = inlined_call_operand.vmem [shape: f32[1,128], index: 1, kind: input, shape index: {}]   ;;  %s1760_s2 = inlined_call_operand.vmem [shape: f32[1,128], index: 2, kind: input, shape index: {}]   ;;  %s1761_s3 = inlined_call_operand.vmem [shape: bf16[4,512,128], index: 3, kind: output, shape index: {}]  }
   0x1   :  { %s1516_s14 = smov 0  }
   0x2 LB: > { %s25_s15 = sadd.s32 1, %s1486_s13  ;;  %p955_p0 = scmp.ge.s32.totalorder %s1490_s14, 1  ;;  %s1490_s14 = sphi %s1516_s14, %s13_s14   ;;  %s1486_s13 = sphi %s1514_s13, %s1763_s13   ;;  %s1482_s12 = sphi %s1512_s12, %s1762_s12  }
   0x3   : > { %p27_p1 = scmp.ge.s32.totalorder %s25_s15, 4  ;;  %p158_p2 = scmp.lt.s32.totalorder %s1490_s14, 5 }
   0x5   : > { %s1765_s15 = smov (%p27_p1, %s25_s15), 0  ;;  %p159_p3 = pnand %p955_p0, %p158_p2 }
   0x6   : > { %p191_p4 = scmp.lt.s32.totalorder (!%p159_p3), %s1482_s12, 3 }
   0x7   : > { %162 = sbr.rel (%p159_p3) target bundleno = 94 (0x5e), region = 32 }
   0xc   : > { %s1767_s12 = smov (!%p191_p4, %s1482_s12), 3  ;;  %v1543_v0 = vld [vmem:[%s1759_s1] ss:$0 sm:$0xff] }
   0xd   : > { %s1028_s16 = sshll.u32 %s1767_s12, 8  ;;  %v1552_v9 = vld [vmem:[%s1760_s2] ss:$0 sm:$0xff] }
   0xe   : > { %s1538_s19 = scalar_lea.vmem %s1758_s0, %s1028_s16  ;;  %s1577_s26 = scalar_lea.vmem %s1761_s3, %s1028_s16 }
   0xf   : > { %v1095_v1 = vld [vmem:[%s1538_s19] sm:$0xff]   ;;  %v1382_v2 = vld [vmem:[%s1538_s19 + $0x8] sm:$0xff]   ;;  %v1383_v3 = vld [vmem:[%s1538_s19 + $0x10] sm:$0xff]  }
  0x10   : > { %v1096_v4 = vunpack.c.l.bf16 %v1095_v1  ;;  %v1097_v5 = vunpack.c.h.bf16 %v1095_v1  ;;  %v1100_v6 = vunpack.c.l.bf16 %v1382_v2  ;;  %v1101_v7 = vunpack.c.h.bf16 %v1382_v2  ;;  %v1384_v8 = vld [vmem:[%s1538_s19 + $0x18] sm:$0xff]   ;;  %v1385_v30 = vld [vmem:[%s1538_s19 + $0x20] sm:$0xff]   ;;  %v1386_v35 = vld [vmem:[%s1538_s19 + $0x28] sm:$0xff]  }
  0x11   : > { %v1104_v10 = vunpack.c.l.bf16 %v1383_v3  ;;  %v1105_v11 = vunpack.c.h.bf16 %v1383_v3  ;;  %v1108_v12 = vunpack.c.l.bf16 %v1384_v8  ;;  %v1109_v13 = vunpack.c.h.bf16 %v1384_v8  ;;  %v1387_v40 = vld [vmem:[%s1538_s19 + $0x30] sm:$0xff]   ;;  %v1388_v45 = vld [vmem:[%s1538_s19 + $0x38] sm:$0xff]   ;;  %v1389_v3 = vld [vmem:[%s1538_s19 + $0x40] sm:$0xff]  }
  0x12   : > { %v345_v14 = vmul.f32 %v1096_v4, %v1543_v0  ;;  %v346_v15 = vmul.f32 %v1097_v5, %v1543_v0  ;;  %v347_v16 = vmul.f32 %v1100_v6, %v1543_v0  ;;  %v348_v17 = vmul.f32 %v1101_v7, %v1543_v0 }
  0x13   : > { %v349_v18 = vmul.f32 %v1104_v10, %v1543_v0  ;;  %v350_v19 = vmul.f32 %v1105_v11, %v1543_v0  ;;  %v351_v20 = vmul.f32 %v1108_v12, %v1543_v0  ;;  %v352_v21 = vmul.f32 %v1109_v13, %v1543_v0  ;;  %v1390_v13 = vld [vmem:[%s1538_s19 + $0x48] sm:$0xff]  }
  0x14   : > { %v416_v22 = vadd.f32 %v1552_v9, %v345_v14  ;;  %v417_v23 = vadd.f32 %v1552_v9, %v346_v15  ;;  %v418_v24 = vadd.f32 %v1552_v9, %v347_v16  ;;  %v419_v25 = vadd.f32 %v1552_v9, %v348_v17 }
  0x15   : > { %v420_v26 = vadd.f32 %v1552_v9, %v349_v18  ;;  %v421_v27 = vadd.f32 %v1552_v9, %v350_v19  ;;  %v422_v28 = vadd.f32 %v1552_v9, %v351_v20  ;;  %v423_v29 = vadd.f32 %v1552_v9, %v352_v21  ;;  %v1391_v18 = vld [vmem:[%s1538_s19 + $0x50] sm:$0xff]  }
  0x16   : > { %v480_v31 = vmax.f32 %v416_v22, 0.0  ;;  %v481_v32 = vmax.f32 %v417_v23, 0.0  ;;  %v482_v33 = vmax.f32 %v418_v24, 0.0  ;;  %v483_v34 = vmax.f32 %v419_v25, 0.0  ;;  %v1392_v23 = vld [vmem:[%s1538_s19 + $0x58] sm:$0xff]  }
  0x17   : > { %v484_v36 = vmax.f32 %v420_v26, 0.0  ;;  %v485_v37 = vmax.f32 %v421_v27, 0.0  ;;  %v486_v38 = vmax.f32 %v422_v28, 0.0  ;;  %v487_v39 = vmax.f32 %v423_v29, 0.0 }
  0x18   : > { %v1225_v41 = vpack.c.bf16 %v481_v32, %v480_v31  ;;  %v1230_v42 = vpack.c.bf16 %v483_v34, %v482_v33  ;;  %v1112_v43 = vunpack.c.l.bf16 %v1385_v30  ;;  %v1113_v44 = vunpack.c.h.bf16 %v1385_v30 }
  0x19   : > { %v1235_v46 = vpack.c.bf16 %v485_v37, %v484_v36  ;;  %v1240_v47 = vpack.c.bf16 %v487_v39, %v486_v38  ;;  %v1116_v48 = vunpack.c.l.bf16 %v1386_v35  ;;  %v1117_v49 = vunpack.c.h.bf16 %v1386_v35 }
  0x1a   : > { %1226 = vst [vmem:[%s1577_s26] sm:$0xff] %v1225_v41   ;;  %1413 = vst [vmem:[%s1577_s26 + $0x8] sm:$0xff] %v1230_v42   ;;  %v353_v50 = vmul.f32 %v1112_v43, %v1543_v0  ;;  %v354_v51 = vmul.f32 %v1113_v44, %v1543_v0  ;;  %v1120_v52 = vunpack.c.l.bf16 %v1387_v40  ;;  %v1121_v53 = vunpack.c.h.bf16 %v1387_v40  ;;  %v1393_v40 = vld [vmem:[%s1538_s19 + $0x60] sm:$0xff]  }
  0x1b   : > { %1414 = vst [vmem:[%s1577_s26 + $0x10] sm:$0xff] %v1235_v46   ;;  %1415 = vst [vmem:[%s1577_s26 + $0x18] sm:$0xff] %v1240_v47   ;;  %v355_v54 = vmul.f32 %v1116_v48, %v1543_v0  ;;  %v356_v55 = vmul.f32 %v1117_v49, %v1543_v0  ;;  %v1124_v56 = vunpack.c.l.bf16 %v1388_v45  ;;  %v1125_v57 = vunpack.c.h.bf16 %v1388_v45 }
  0x1c   : > { %v424_v58 = vadd.f32 %v1552_v9, %v353_v50  ;;  %v425_v59 = vadd.f32 %v1552_v9, %v354_v51  ;;  %v357_v60 = vmul.f32 %v1120_v52, %v1543_v0  ;;  %v358_v61 = vmul.f32 %v1121_v53, %v1543_v0  ;;  %v1394_v53 = vld [vmem:[%s1538_s19 + $0x68] sm:$0xff]  }
  0x1d   : > { %v426_v62 = vadd.f32 %v1552_v9, %v355_v54  ;;  %v427_v63 = vadd.f32 %v1552_v9, %v356_v55  ;;  %v359_v1 = vmul.f32 %v1124_v56, %v1543_v0  ;;  %v360_v2 = vmul.f32 %v1125_v57, %v1543_v0 }
  0x1e   : > { %v488_v4 = vmax.f32 %v424_v58, 0.0  ;;  %v489_v5 = vmax.f32 %v425_v59, 0.0  ;;  %v428_v6 = vadd.f32 %v1552_v9, %v357_v60  ;;  %v429_v7 = vadd.f32 %v1552_v9, %v358_v61  ;;  %v1395_v58 = vld [vmem:[%s1538_s19 + $0x70] sm:$0xff]  }
  0x1f   : > { %v490_v8 = vmax.f32 %v426_v62, 0.0  ;;  %v491_v10 = vmax.f32 %v427_v63, 0.0  ;;  %v430_v11 = vadd.f32 %v1552_v9, %v359_v1  ;;  %v431_v12 = vadd.f32 %v1552_v9, %v360_v2  ;;  %v1396_v63 = vld [vmem:[%s1538_s19 + $0x78] sm:$0xff]  }
  0x20   : > { %v1245_v14 = vpack.c.bf16 %v489_v5, %v488_v4  ;;  %v492_v15 = vmax.f32 %v428_v6, 0.0  ;;  %v493_v16 = vmax.f32 %v429_v7, 0.0  ;;  %v1128_v17 = vunpack.c.l.bf16 %v1389_v3 }
  0x21   : > { %v1250_v19 = vpack.c.bf16 %v491_v10, %v490_v8  ;;  %v494_v20 = vmax.f32 %v430_v11, 0.0  ;;  %v495_v21 = vmax.f32 %v431_v12, 0.0  ;;  %v1129_v22 = vunpack.c.h.bf16 %v1389_v3 }
  0x22   : > { %1416 = vst [vmem:[%s1577_s26 + $0x20] sm:$0xff] %v1245_v14   ;;  %v1255_v24 = vpack.c.bf16 %v493_v16, %v492_v15  ;;  %v361_v25 = vmul.f32 %v1128_v17, %v1543_v0  ;;  %v1132_v26 = vunpack.c.l.bf16 %v1390_v13  ;;  %v1133_v27 = vunpack.c.h.bf16 %v1390_v13  ;;  %v1397_v14 = vld [vmem:[%s1538_s19 + $0x80] sm:$0xff]  }
  0x23   : > { %1417 = vst [vmem:[%s1577_s26 + $0x28] sm:$0xff] %v1250_v19   ;;  %v1260_v28 = vpack.c.bf16 %v495_v21, %v494_v20  ;;  %v362_v29 = vmul.f32 %v1129_v22, %v1543_v0  ;;  %v1136_v30 = vunpack.c.l.bf16 %v1391_v18  ;;  %v1137_v31 = vunpack.c.h.bf16 %v1391_v18 }
  0x24   : > { %1418 = vst [vmem:[%s1577_s26 + $0x30] sm:$0xff] %v1255_v24   ;;  %v432_v32 = vadd.f32 %v1552_v9, %v361_v25  ;;  %v363_v33 = vmul.f32 %v1132_v26, %v1543_v0  ;;  %v364_v34 = vmul.f32 %v1133_v27, %v1543_v0  ;;  %v1140_v35 = vunpack.c.l.bf16 %v1392_v23 }
  0x25   : > { %1419 = vst [vmem:[%s1577_s26 + $0x38] sm:$0xff] %v1260_v28   ;;  %v433_v36 = vadd.f32 %v1552_v9, %v362_v29  ;;  %v365_v37 = vmul.f32 %v1136_v30, %v1543_v0  ;;  %v366_v38 = vmul.f32 %v1137_v31, %v1543_v0  ;;  %v1141_v39 = vunpack.c.h.bf16 %v1392_v23  ;;  %v1398_v31 = vld [vmem:[%s1538_s19 + $0x88] sm:$0xff]  }
  0x26   : > { %v496_v41 = vmax.f32 %v432_v32, 0.0  ;;  %v434_v42 = vadd.f32 %v1552_v9, %v363_v33  ;;  %v435_v43 = vadd.f32 %v1552_v9, %v364_v34  ;;  %v367_v44 = vmul.f32 %v1140_v35, %v1543_v0 }
  0x27   : > { %v497_v45 = vmax.f32 %v433_v36, 0.0  ;;  %v436_v46 = vadd.f32 %v1552_v9, %v365_v37  ;;  %v437_v47 = vadd.f32 %v1552_v9, %v366_v38  ;;  %v368_v48 = vmul.f32 %v1141_v39, %v1543_v0  ;;  %v1399_v36 = vld [vmem:[%s1538_s19 + $0x90] sm:$0xff]  }
  0x28   : > { %v498_v49 = vmax.f32 %v434_v42, 0.0  ;;  %v499_v50 = vmax.f32 %v435_v43, 0.0  ;;  %v438_v51 = vadd.f32 %v1552_v9, %v367_v44  ;;  %v1144_v52 = vunpack.c.l.bf16 %v1393_v40 }
  0x29   : > { %v1265_v54 = vpack.c.bf16 %v497_v45, %v496_v41  ;;  %v500_v55 = vmax.f32 %v436_v46, 0.0  ;;  %v501_v56 = vmax.f32 %v437_v47, 0.0  ;;  %v439_v57 = vadd.f32 %v1552_v9, %v368_v48  ;;  %v1400_v41 = vld [vmem:[%s1538_s19 + $0x98] sm:$0xff]  }
  0x2a   : > { %v1270_v59 = vpack.c.bf16 %v499_v50, %v498_v49  ;;  %v502_v60 = vmax.f32 %v438_v51, 0.0  ;;  %v1145_v61 = vunpack.c.h.bf16 %v1393_v40  ;;  %v369_v62 = vmul.f32 %v1144_v52, %v1543_v0 }
  0x2b   : > { %1420 = vst [vmem:[%s1577_s26 + $0x40] sm:$0xff] %v1265_v54   ;;  %v1275_v1 = vpack.c.bf16 %v501_v56, %v500_v55  ;;  %v503_v2 = vmax.f32 %v439_v57, 0.0  ;;  %v1148_v3 = vunpack.c.l.bf16 %v1394_v53  ;;  %v1149_v4 = vunpack.c.h.bf16 %v1394_v53  ;;  %v1401_v54 = vld [vmem:[%s1538_s19 + $0xa0] sm:$0xff]  }
  0x2c   : > { %1421 = vst [vmem:[%s1577_s26 + $0x48] sm:$0xff] %v1270_v59   ;;  %v370_v5 = vmul.f32 %v1145_v61, %v1543_v0  ;;  %v440_v6 = vadd.f32 %v1552_v9, %v369_v62  ;;  %v1152_v7 = vunpack.c.l.bf16 %v1395_v58  ;;  %v1153_v8 = vunpack.c.h.bf16 %v1395_v58 }
  0x2d   : > { %1422 = vst [vmem:[%s1577_s26 + $0x50] sm:$0xff] %v1275_v1   ;;  %v1280_v10 = vpack.c.bf16 %v503_v2, %v502_v60  ;;  %v371_v11 = vmul.f32 %v1148_v3, %v1543_v0  ;;  %v372_v12 = vmul.f32 %v1149_v4, %v1543_v0  ;;  %v1156_v13 = vunpack.c.l.bf16 %v1396_v63  ;;  %v1402_v4 = vld [vmem:[%s1538_s19 + $0xa8] sm:$0xff]  }
  0x2e   : > { %v441_v15 = vadd.f32 %v1552_v9, %v370_v5  ;;  %v504_v16 = vmax.f32 %v440_v6, 0.0  ;;  %v373_v17 = vmul.f32 %v1152_v7, %v1543_v0  ;;  %v374_v18 = vmul.f32 %v1153_v8, %v1543_v0 }
  0x2f   : > { %1423 = vst [vmem:[%s1577_s26 + $0x58] sm:$0xff] %v1280_v10   ;;  %v442_v19 = vadd.f32 %v1552_v9, %v371_v11  ;;  %v443_v20 = vadd.f32 %v1552_v9, %v372_v12  ;;  %v1157_v21 = vunpack.c.h.bf16 %v1396_v63  ;;  %v375_v22 = vmul.f32 %v1156_v13, %v1543_v0 }
  0x30   : > { %v505_v23 = vmax.f32 %v441_v15, 0.0  ;;  %v444_v24 = vadd.f32 %v1552_v9, %v373_v17  ;;  %v445_v25 = vadd.f32 %v1552_v9, %v374_v18  ;;  %v1160_v26 = vunpack.c.l.bf16 %v1397_v14 }
  0x31   : > { %v506_v27 = vmax.f32 %v442_v19, 0.0  ;;  %v507_v28 = vmax.f32 %v443_v20, 0.0  ;;  %v376_v29 = vmul.f32 %v1157_v21, %v1543_v0  ;;  %v446_v30 = vadd.f32 %v1552_v9, %v375_v22  ;;  %v1404_v19 = vld [vmem:[%s1538_s19 + $0xb8] sm:$0xff]  }
  0x32   : > { %v1285_v32 = vpack.c.bf16 %v505_v23, %v504_v16  ;;  %v508_v33 = vmax.f32 %v444_v24, 0.0  ;;  %v509_v34 = vmax.f32 %v445_v25, 0.0  ;;  %v1161_v35 = vunpack.c.h.bf16 %v1397_v14  ;;  %v1403_v14 = vld [vmem:[%s1538_s19 + $0xb0] sm:$0xff]  }
  0x33   : > { %v1290_v37 = vpack.c.bf16 %v507_v28, %v506_v27  ;;  %v447_v38 = vadd.f32 %v1552_v9, %v376_v29  ;;  %v510_v39 = vmax.f32 %v446_v30, 0.0  ;;  %v377_v40 = vmul.f32 %v1160_v26, %v1543_v0 }
  0x34   : > { %1424 = vst [vmem:[%s1577_s26 + $0x60] sm:$0xff] %v1285_v32   ;;  %v1295_v42 = vpack.c.bf16 %v509_v34, %v508_v33  ;;  %v378_v43 = vmul.f32 %v1161_v35, %v1543_v0  ;;  %v1164_v44 = vunpack.c.l.bf16 %v1398_v31  ;;  %v1165_v45 = vunpack.c.h.bf16 %v1398_v31  ;;  %v1405_v32 = vld [vmem:[%s1538_s19 + $0xc0] sm:$0xff]  }
  0x35   : > { %1425 = vst [vmem:[%s1577_s26 + $0x68] sm:$0xff] %v1290_v37   ;;  %v511_v46 = vmax.f32 %v447_v38, 0.0  ;;  %v448_v47 = vadd.f32 %v1552_v9, %v377_v40  ;;  %v1168_v48 = vunpack.c.l.bf16 %v1399_v36  ;;  %v1169_v49 = vunpack.c.h.bf16 %v1399_v36 }
  0x36   : > { %1426 = vst [vmem:[%s1577_s26 + $0x70] sm:$0xff] %v1295_v42   ;;  %v449_v50 = vadd.f32 %v1552_v9, %v378_v43  ;;  %v379_v51 = vmul.f32 %v1164_v44, %v1543_v0  ;;  %v380_v52 = vmul.f32 %v1165_v45, %v1543_v0  ;;  %v1172_v53 = vunpack.c.l.bf16 %v1400_v41  ;;  %v1406_v45 = vld [vmem:[%s1538_s19 + $0xc8] sm:$0xff]  }
  0x37   : > { %v1300_v55 = vpack.c.bf16 %v511_v46, %v510_v39  ;;  %v512_v56 = vmax.f32 %v448_v47, 0.0  ;;  %v381_v57 = vmul.f32 %v1168_v48, %v1543_v0  ;;  %v382_v58 = vmul.f32 %v1169_v49, %v1543_v0 }
  0x38   : > { %v513_v59 = vmax.f32 %v449_v50, 0.0  ;;  %v450_v60 = vadd.f32 %v1552_v9, %v379_v51  ;;  %v451_v61 = vadd.f32 %v1552_v9, %v380_v52  ;;  %v1173_v62 = vunpack.c.h.bf16 %v1400_v41 }
  0x39   : > { %1427 = vst [vmem:[%s1577_s26 + $0x78] sm:$0xff] %v1300_v55   ;;  %v452_v63 = vadd.f32 %v1552_v9, %v381_v57  ;;  %v453_v1 = vadd.f32 %v1552_v9, %v382_v58  ;;  %v383_v2 = vmul.f32 %v1172_v53, %v1543_v0  ;;  %v1176_v3 = vunpack.c.l.bf16 %v1401_v54 }
  0x3a   : > { %v1305_v5 = vpack.c.bf16 %v513_v59, %v512_v56  ;;  %v514_v6 = vmax.f32 %v450_v60, 0.0  ;;  %v515_v7 = vmax.f32 %v451_v61, 0.0  ;;  %v384_v8 = vmul.f32 %v1173_v62, %v1543_v0 }
  0x3b   : > { %v516_v10 = vmax.f32 %v452_v63, 0.0  ;;  %v517_v11 = vmax.f32 %v453_v1, 0.0  ;;  %v454_v12 = vadd.f32 %v1552_v9, %v383_v2  ;;  %v1177_v13 = vunpack.c.h.bf16 %v1401_v54  ;;  %v1407_v54 = vld [vmem:[%s1538_s19 + $0xd0] sm:$0xff]   ;;  %v1408_v63 = vld [vmem:[%s1538_s19 + $0xd8] sm:$0xff]  }
  0x3c   : > { %1428 = vst [vmem:[%s1577_s26 + $0x80] sm:$0xff] %v1305_v5   ;;  %v1310_v15 = vpack.c.bf16 %v515_v7, %v514_v6  ;;  %v455_v16 = vadd.f32 %v1552_v9, %v384_v8  ;;  %v385_v17 = vmul.f32 %v1176_v3, %v1543_v0  ;;  %v1180_v18 = vunpack.c.l.bf16 %v1402_v4 }
  0x3d   : > { %v1315_v20 = vpack.c.bf16 %v517_v11, %v516_v10  ;;  %v518_v21 = vmax.f32 %v454_v12, 0.0  ;;  %v386_v22 = vmul.f32 %v1177_v13, %v1543_v0  ;;  %v1181_v23 = vunpack.c.h.bf16 %v1402_v4  ;;  %v1409_v10 = vld [vmem:[%s1538_s19 + $0xe0] sm:$0xff]  }
  0x3e   : > { %1429 = vst [vmem:[%s1577_s26 + $0x88] sm:$0xff] %v1310_v15   ;;  %v519_v24 = vmax.f32 %v455_v16, 0.0  ;;  %v456_v25 = vadd.f32 %v1552_v9, %v385_v17  ;;  %v387_v26 = vmul.f32 %v1180_v18, %v1543_v0  ;;  %v1184_v27 = vunpack.c.l.bf16 %v1403_v14 }
  0x3f   : > { %1430 = vst [vmem:[%s1577_s26 + $0x90] sm:$0xff] %v1315_v20   ;;  %v457_v28 = vadd.f32 %v1552_v9, %v386_v22  ;;  %v388_v29 = vmul.f32 %v1181_v23, %v1543_v0  ;;  %v1185_v30 = vunpack.c.h.bf16 %v1403_v14  ;;  %v1188_v31 = vunpack.c.l.bf16 %v1404_v19  ;;  %v1410_v23 = vld [vmem:[%s1538_s19 + $0xe8] sm:$0xff]  }
  0x40   : > { %v1320_v33 = vpack.c.bf16 %v519_v24, %v518_v21  ;;  %v520_v34 = vmax.f32 %v456_v25, 0.0  ;;  %v458_v35 = vadd.f32 %v1552_v9, %v387_v26  ;;  %v389_v36 = vmul.f32 %v1184_v27, %v1543_v0 }
  0x41   : > { %v521_v37 = vmax.f32 %v457_v28, 0.0  ;;  %v459_v38 = vadd.f32 %v1552_v9, %v388_v29  ;;  %v390_v39 = vmul.f32 %v1185_v30, %v1543_v0  ;;  %v1189_v40 = vunpack.c.h.bf16 %v1404_v19 }
  0x42   : > { %1431 = vst [vmem:[%s1577_s26 + $0x98] sm:$0xff] %v1320_v33   ;;  %v522_v41 = vmax.f32 %v458_v35, 0.0  ;;  %v460_v42 = vadd.f32 %v1552_v9, %v389_v36  ;;  %v391_v43 = vmul.f32 %v1188_v31, %v1543_v0  ;;  %v1192_v44 = vunpack.c.l.bf16 %v1405_v32 }
  0x43   : > { %v1325_v46 = vpack.c.bf16 %v521_v37, %v520_v34  ;;  %v523_v47 = vmax.f32 %v459_v38, 0.0  ;;  %v461_v48 = vadd.f32 %v1552_v9, %v390_v39  ;;  %v392_v49 = vmul.f32 %v1189_v40, %v1543_v0 }
  0x44   : > { %v524_v50 = vmax.f32 %v460_v42, 0.0  ;;  %v462_v51 = vadd.f32 %v1552_v9, %v391_v43  ;;  %v1193_v52 = vunpack.c.h.bf16 %v1405_v32  ;;  %v393_v53 = vmul.f32 %v1192_v44, %v1543_v0  ;;  %v1411_v32 = vld [vmem:[%s1538_s19 + $0xf0] sm:$0xff]  }
  0x45   : > { %1432 = vst [vmem:[%s1577_s26 + $0xa0] sm:$0xff] %v1325_v46   ;;  %v1330_v55 = vpack.c.bf16 %v523_v47, %v522_v41  ;;  %v525_v56 = vmax.f32 %v461_v48, 0.0  ;;  %v463_v57 = vadd.f32 %v1552_v9, %v392_v49  ;;  %v1196_v58 = vunpack.c.l.bf16 %v1406_v45  ;;  %v1412_v41 = vld [vmem:[%s1538_s19 + $0xf8] sm:$0xff]  }
  0x46   : > { %v526_v59 = vmax.f32 %v462_v51, 0.0  ;;  %v394_v60 = vmul.f32 %v1193_v52, %v1543_v0  ;;  %v464_v61 = vadd.f32 %v1552_v9, %v393_v53  ;;  %v1197_v62 = vunpack.c.h.bf16 %v1406_v45 }
  0x47   : > { %1433 = vst [vmem:[%s1577_s26 + $0xa8] sm:$0xff] %v1330_v55   ;;  %v1335_v1 = vpack.c.bf16 %v525_v56, %v524_v50  ;;  %v527_v2 = vmax.f32 %v463_v57, 0.0  ;;  %v395_v3 = vmul.f32 %v1196_v58, %v1543_v0  ;;  %v1200_v4 = vunpack.c.l.bf16 %v1407_v54 }
  0x48   : > { %v465_v5 = vadd.f32 %v1552_v9, %v394_v60  ;;  %v528_v6 = vmax.f32 %v464_v61, 0.0  ;;  %v396_v7 = vmul.f32 %v1197_v62, %v1543_v0  ;;  %v1201_v8 = vunpack.c.h.bf16 %v1407_v54 }
  0x49   : > { %1434 = vst [vmem:[%s1577_s26 + $0xb0] sm:$0xff] %v1335_v1   ;;  %v1340_v11 = vpack.c.bf16 %v527_v2, %v526_v59  ;;  %v466_v12 = vadd.f32 %v1552_v9, %v395_v3  ;;  %v397_v13 = vmul.f32 %v1200_v4, %v1543_v0  ;;  %v1204_v14 = vunpack.c.l.bf16 %v1408_v63 }
  0x4a   : > { %v529_v15 = vmax.f32 %v465_v5, 0.0  ;;  %v467_v16 = vadd.f32 %v1552_v9, %v396_v7  ;;  %v398_v17 = vmul.f32 %v1201_v8, %v1543_v0  ;;  %v1205_v18 = vunpack.c.h.bf16 %v1408_v63 }
  0x4b   : > { %1435 = vst [vmem:[%s1577_s26 + $0xb8] sm:$0xff] %v1340_v11   ;;  %v530_v19 = vmax.f32 %v466_v12, 0.0  ;;  %v468_v20 = vadd.f32 %v1552_v9, %v397_v13  ;;  %v399_v21 = vmul.f32 %v1204_v14, %v1543_v0  ;;  %v1208_v22 = vunpack.c.l.bf16 %v1409_v10 }
  0x4c   : > { %v1345_v24 = vpack.c.bf16 %v529_v15, %v528_v6  ;;  %v531_v25 = vmax.f32 %v467_v16, 0.0  ;;  %v469_v26 = vadd.f32 %v1552_v9, %v398_v17  ;;  %v400_v27 = vmul.f32 %v1205_v18, %v1543_v0 }
  0x4d   : > { %v532_v28 = vmax.f32 %v468_v20, 0.0  ;;  %v470_v29 = vadd.f32 %v1552_v9, %v399_v21  ;;  %v1209_v30 = vunpack.c.h.bf16 %v1409_v10  ;;  %v401_v31 = vmul.f32 %v1208_v22, %v1543_v0 }
  0x4e   : > { %1436 = vst [vmem:[%s1577_s26 + $0xc0] sm:$0xff] %v1345_v24   ;;  %v1350_v33 = vpack.c.bf16 %v531_v25, %v530_v19  ;;  %v533_v34 = vmax.f32 %v469_v26, 0.0  ;;  %v471_v35 = vadd.f32 %v1552_v9, %v400_v27  ;;  %v1212_v36 = vunpack.c.l.bf16 %v1410_v23 }
  0x4f   : > { %v534_v37 = vmax.f32 %v470_v29, 0.0  ;;  %v402_v38 = vmul.f32 %v1209_v30, %v1543_v0  ;;  %v472_v39 = vadd.f32 %v1552_v9, %v401_v31  ;;  %v1213_v40 = vunpack.c.h.bf16 %v1410_v23 }
  0x50   : > { %1437 = vst [vmem:[%s1577_s26 + $0xc8] sm:$0xff] %v1350_v33   ;;  %v1355_v42 = vpack.c.bf16 %v533_v34, %v532_v28  ;;  %v535_v43 = vmax.f32 %v471_v35, 0.0  ;;  %v403_v44 = vmul.f32 %v1212_v36, %v1543_v0  ;;  %v1216_v45 = vunpack.c.l.bf16 %v1411_v32 }
  0x51   : > { %v473_v46 = vadd.f32 %v1552_v9, %v402_v38  ;;  %v536_v47 = vmax.f32 %v472_v39, 0.0  ;;  %v404_v48 = vmul.f32 %v1213_v40, %v1543_v0  ;;  %v1217_v49 = vunpack.c.h.bf16 %v1411_v32 }
  0x52   : > { %1438 = vst [vmem:[%s1577_s26 + $0xd0] sm:$0xff] %v1355_v42   ;;  %v1360_v50 = vpack.c.bf16 %v535_v43, %v534_v37  ;;  %v474_v51 = vadd.f32 %v1552_v9, %v403_v44  ;;  %v405_v52 = vmul.f32 %v1216_v45, %v1543_v0  ;;  %v1220_v53 = vunpack.c.l.bf16 %v1412_v41 }
  0x53   : > { %v537_v54 = vmax.f32 %v473_v46, 0.0  ;;  %v475_v55 = vadd.f32 %v1552_v9, %v404_v48  ;;  %v406_v56 = vmul.f32 %v1217_v49, %v1543_v0  ;;  %v1221_v57 = vunpack.c.h.bf16 %v1412_v41 }
  0x54   : > { %1439 = vst [vmem:[%s1577_s26 + $0xd8] sm:$0xff] %v1360_v50   ;;  %v538_v58 = vmax.f32 %v474_v51, 0.0  ;;  %v476_v59 = vadd.f32 %v1552_v9, %v405_v52  ;;  %v407_v60 = vmul.f32 %v1220_v53, %v1543_v0 }
  0x55   : > { %v1365_v61 = vpack.c.bf16 %v537_v54, %v536_v47  ;;  %v539_v62 = vmax.f32 %v475_v55, 0.0  ;;  %v477_v63 = vadd.f32 %v1552_v9, %v406_v56  ;;  %v408_v1 = vmul.f32 %v1221_v57, %v1543_v0 }
  0x56   : > { %v540_v2 = vmax.f32 %v476_v59, 0.0  ;;  %v478_v3 = vadd.f32 %v1552_v9, %v407_v60 }
  0x57   : > { %1440 = vst [vmem:[%s1577_s26 + $0xe0] sm:$0xff] %v1365_v61   ;;  %v1370_v4 = vpack.c.bf16 %v539_v62, %v538_v58  ;;  %v541_v5 = vmax.f32 %v477_v63, 0.0  ;;  %v479_v6 = vadd.f32 %v1552_v9, %v408_v1 }
  0x58   : > { %v542_v7 = vmax.f32 %v478_v3, 0.0 }
  0x59   : > { %1441 = vst [vmem:[%s1577_s26 + $0xe8] sm:$0xff] %v1370_v4   ;;  %v1375_v8 = vpack.c.bf16 %v541_v5, %v540_v2  ;;  %v543_v10 = vmax.f32 %v479_v6, 0.0 }
  0x5b   : > { %1442 = vst [vmem:[%s1577_s26 + $0xf0] sm:$0xff] %v1375_v8   ;;  %v1380_v11 = vpack.c.bf16 %v543_v10, %v542_v7 }
  0x5d   : > { %1443 = vst [vmem:[%s1577_s26 + $0xf8] sm:$0xff] %v1380_v11  }
  0x5e PF: > { %s13_s14 = sadd.s32 1, %s1490_s14   ;;  %s1762_s12 = smov %s1486_s13 }
  0x5f   : > { %p10_p5 = scmp.ge.s32.totalorder %s13_s14, 6   ;;  %s1763_s13 = smov %s1765_s15 }
  0x61   :  { %12 = sbr.rel (!%p10_p5) target bundleno = 2 (0x2), region = 62 }

// kernel: generator_forward.15
= control target key start
LH: loop header
LB: loop body
LE: loop exit
PB: predicated region body
PF: predicated region fallthrough
CT: control target
= control target key end

     0   :  { %s2509_s12 = smov 0   ;;  %s2511_s13 = smov 0   ;;  %s2832_s0 = inlined_call_operand.vmem [shape: bf16[4,512,128], index: 0, kind: input, shape index: {}]   ;;  %s2833_s1 = inlined_call_operand.vmem [shape: bf16[4,128,128], index: 1, kind: input, shape index: {}]   ;;  %s2834_s2 = inlined_call_operand.vmem [shape: bf16[4,512,128], index: 2, kind: output, shape index: {0}]   ;;  %s2835_s3 = inlined_call_operand.vmem [shape: f32[4,2,128], index: 3, kind: output, shape index: {1}]  }
   0x1   :  { %s2513_s14 = smov 0  }
   0x2 LB: > { %s33_s15 = sadd.s32 1, %s2482_s13  ;;  %p1891_p0 = scmp.ge.s32.totalorder %s2486_s14, 1  ;;  %s2486_s14 = sphi %s2513_s14, %s14_s14   ;;  %s2482_s13 = sphi %s2511_s13, %s2837_s13   ;;  %s2478_s12 = sphi %s2509_s12, %s2836_s12  }
   0x3   : > { %p35_p1 = scmp.ge.s32.totalorder %s33_s15, 4  ;;  %p190_p2 = scmp.lt.s32.totalorder %s2486_s14, 5 }
   0x5   : > { %s2839_s15 = smov (%p35_p1, %s33_s15), 0  ;;  %p191_p3 = pnand %p1891_p0, %p190_p2 }
   0x6   : > { %p239_p4 = scmp.lt.s32.totalorder (!%p191_p3), %s2478_s12, 3 }
   0x7   : > { %194 = sbr.rel (%p191_p3) target bundleno = 391 (0x187), region = 28 }
   0xc   : > { %s2841_s12 = smov (!%p239_p4, %s2478_s12), 3  ;;  %v2488_v42 = vmov 0.0   ;;  %vm1741_vm0 = vcmask 1040384  }
   0xd   : > { %s2006_s16 = sshll.u32 %s2841_s12, 6  ;;  %s2005_s20 = sshll.u32 %s2841_s12, 8 }
   0xe   : > { %s2533_s19 = scalar_lea.vmem %s2833_s1, %s2006_s16  ;;  %s2544_s23 = scalar_lea.vmem %s2832_s0, %s2005_s20 }
   0xf   : > { %v2424_v0 = vld [vmem:[%s2533_s19 + $0x38] sm:$0xff]   ;;  %v2425_v1 = vld [vmem:[%s2533_s19 + $0x30] sm:$0xff]   ;;  %v2426_v2 = vld [vmem:[%s2533_s19 + $0x28] sm:$0xff]   ;;  %s1898_s24 = sshll.u32 %s2841_s12, 1  ;;  %s2599_s30 = scalar_lea.vmem %s2834_s2, %s2005_s20 }
  0x10   : > { %2303 = vmatprep.subr.bf16.mxu0 %v2424_v0  ;;  %2383 = vmatprep.subr.bf16.mxu1 %v2424_v0  ;;  %v2427_v3 = vld [vmem:[%s2533_s19 + $0x20] sm:$0xff]   ;;  %v2428_v5 = vld [vmem:[%s2533_s19 + $0x18] sm:$0xff]   ;;  %v2429_v6 = vld [vmem:[%s2533_s19 + $0x10] sm:$0xff]   ;;  %s2589_s27 = scalar_lea.vmem %s2835_s3, %s1898_s24 }
  0x11   : > { %2304 = vmatpush3.bf16.msra.mxu0 %v2424_v0  ;;  %2391 = vmatpush3.bf16.msra.mxu1 %v2424_v0  ;;  %v2432_v4 = vld [vmem:[%s2544_s23] sm:$0xff]   ;;  %v2430_v7 = vld [vmem:[%s2533_s19 + $0x8] sm:$0xff]   ;;  %v2434_v11 = vld [vmem:[%s2544_s23 + $0x10] sm:$0xff]   ;;  %349 = vst [vmem:[%s2589_s27] sm:$0x3] %v2488_v42 }
  0x12   : > { %2305 = vmatprep.subr.bf16.mxu0 %v2425_v1  ;;  %2384 = vmatprep.subr.bf16.mxu1 %v2425_v1  ;;  %v2431_v8 = vld [vmem:[%s2533_s19] sm:$0xff]   ;;  %v2433_v10 = vld [vmem:[%s2544_s23 + $0x8] sm:$0xff]   ;;  %v2450_v13 = vld [vmem:[%s2544_s23 + $0x90] sm:$0xff]  }
  0x13   : > { %2319 = vmatprep.mubr.bf16.mxu0 %v2432_v4  ;;  %v2448_v9 = vld [vmem:[%s2544_s23 + $0x80] sm:$0xff]   ;;  %v2449_v12 = vld [vmem:[%s2544_s23 + $0x88] sm:$0xff]   ;;  %v2435_v14 = vld [vmem:[%s2544_s23 + $0x18] sm:$0xff]  }
  0x14   : > { %2351 = vmatprep.mubr.bf16.mxu1 %v2448_v9  ;;  %v2436_v15 = vld [vmem:[%s2544_s23 + $0x20] sm:$0xff]   ;;  %v2451_v16 = vld [vmem:[%s2544_s23 + $0x98] sm:$0xff]   ;;  %v2437_v18 = vld [vmem:[%s2544_s23 + $0x28] sm:$0xff]  }
  0x15   : > { %2306 = vmatpush3.bf16.msra.mxu0 %v2425_v1  ;;  %2392 = vmatpush3.bf16.msra.mxu1 %v2425_v1  ;;  %v2452_v17 = vld [vmem:[%s2544_s23 + $0xa0] sm:$0xff]   ;;  %v2453_v19 = vld [vmem:[%s2544_s23 + $0xa8] sm:$0xff]   ;;  %v2438_v20 = vld [vmem:[%s2544_s23 + $0x30] sm:$0xff]  }
  0x16   : > { %2307 = vmatprep.subr.bf16.mxu0 %v2426_v2  ;;  %2385 = vmatprep.subr.bf16.mxu1 %v2426_v2  ;;  %v2454_v21 = vld [vmem:[%s2544_s23 + $0xb0] sm:$0xff]   ;;  %v2439_v22 = vld [vmem:[%s2544_s23 + $0x38] sm:$0xff]   ;;  %v2440_v24 = vld [vmem:[%s2544_s23 + $0x40] sm:$0xff]  }
  0x17   : > { %v2455_v23 = vld [vmem:[%s2544_s23 + $0xb8] sm:$0xff]   ;;  %v2456_v25 = vld [vmem:[%s2544_s23 + $0xc0] sm:$0xff]   ;;  %v2441_v26 = vld [vmem:[%s2544_s23 + $0x48] sm:$0xff]  }
  0x18   : > { %v2457_v27 = vld [vmem:[%s2544_s23 + $0xc8] sm:$0xff]   ;;  %v2442_v28 = vld [vmem:[%s2544_s23 + $0x50] sm:$0xff]   ;;  %v2443_v30 = vld [vmem:[%s2544_s23 + $0x58] sm:$0xff]  }
  0x19   : > { %2308 = vmatpush3.bf16.msra.mxu0 %v2426_v2  ;;  %2393 = vmatpush3.bf16.msra.mxu1 %v2426_v2  ;;  %v2458_v29 = vld [vmem:[%s2544_s23 + $0xd0] sm:$0xff]   ;;  %v2459_v31 = vld [vmem:[%s2544_s23 + $0xd8] sm:$0xff]   ;;  %v2444_v32 = vld [vmem:[%s2544_s23 + $0x60] sm:$0xff]  }
  0x1a   : > { %2309 = vmatprep.subr.bf16.mxu0 %v2427_v3  ;;  %2386 = vmatprep.subr.bf16.mxu1 %v2427_v3  ;;  %v2460_v33 = vld [vmem:[%s2544_s23 + $0xe0] sm:$0xff]   ;;  %v2445_v34 = vld [vmem:[%s2544_s23 + $0x68] sm:$0xff]   ;;  %v2446_v36 = vld [vmem:[%s2544_s23 + $0x70] sm:$0xff]  }
  0x1b   : > { %v2461_v35 = vld [vmem:[%s2544_s23 + $0xe8] sm:$0xff]   ;;  %v2462_v37 = vld [vmem:[%s2544_s23 + $0xf0] sm:$0xff]   ;;  %v2447_v38 = vld [vmem:[%s2544_s23 + $0x78] sm:$0xff]  }
  0x1c   : > { %v2463_v39 = vld [vmem:[%s2544_s23 + $0xf8] sm:$0xff]  }
  0x1d   : > { %2310 = vmatpush3.bf16.msra.mxu0 %v2427_v3  ;;  %2394 = vmatpush3.bf16.msra.mxu1 %v2427_v3 }
  0x1e   : > { %2311 = vmatprep.subr.bf16.mxu0 %v2428_v5  ;;  %2387 = vmatprep.subr.bf16.mxu1 %v2428_v5 }
  0x21   : > { %2312 = vmatpush3.bf16.msra.mxu0 %v2428_v5  ;;  %2395 = vmatpush3.bf16.msra.mxu1 %v2428_v5 }
  0x22   : > { %2313 = vmatprep.subr.bf16.mxu0 %v2429_v6  ;;  %2388 = vmatprep.subr.bf16.mxu1 %v2429_v6 }
  0x25   : > { %2314 = vmatpush3.bf16.msra.mxu0 %v2429_v6  ;;  %2396 = vmatpush3.bf16.msra.mxu1 %v2429_v6 }
  0x26   : > { %2315 = vmatprep.subr.bf16.mxu0 %v2430_v7  ;;  %2389 = vmatprep.subr.bf16.mxu1 %v2430_v7 }
  0x29   : > { %2316 = vmatpush3.bf16.msra.mxu0 %v2430_v7  ;;  %2397 = vmatpush3.bf16.msra.mxu1 %v2430_v7 }
  0x2a   : > { %2317 = vmatprep.subr.bf16.mxu0 %v2431_v8  ;;  %2390 = vmatprep.subr.bf16.mxu1 %v2431_v8 }
  0x2d   : > { %2318 = vmatpush3.bf16.msra.mxu0 %v2431_v8  ;;  %2398 = vmatpush3.bf16.msra.mxu1 %v2431_v8 }
  0x30   : > { %2320 = vmatmul.mubr.bf16.vlgmr.msra.gmra.mxu0 %v2433_v10  ;;  %2352 = vmatmul.mubr.bf16.vlgmr.msra.gmra.mxu1 %v2449_v12 }
  0x31   : > { %2323 = vmatprep.mubr.bf16.mxu0 %v2434_v11  ;;  %2355 = vmatprep.mubr.bf16.mxu1 %v2450_v13 }
  0x38   : > { %2324 = vmatmul.mubr.bf16.gmra.mxu0 %v2435_v14  ;;  %2356 = vmatmul.mubr.bf16.gmra.mxu1 %v2451_v16 }
  0x39   : > { %2327 = vmatprep.mubr.bf16.mxu0 %v2436_v15  ;;  %2359 = vmatprep.mubr.bf16.mxu1 %v2452_v17 }
  0x40   : > { %2328 = vmatmul.mubr.bf16.gmra.mxu0 %v2437_v18  ;;  %2360 = vmatmul.mubr.bf16.gmra.mxu1 %v2453_v19 }
  0x41   : > { %2331 = vmatprep.mubr.bf16.mxu0 %v2438_v20  ;;  %2363 = vmatprep.mubr.bf16.mxu1 %v2454_v21 }
  0x48   : > { %2332 = vmatmul.mubr.bf16.gmra.mxu0 %v2439_v22  ;;  %2364 = vmatmul.mubr.bf16.gmra.mxu1 %v2455_v23 }
  0x49   : > { %2335 = vmatprep.mubr.bf16.mxu0 %v2440_v24  ;;  %2367 = vmatprep.mubr.bf16.mxu1 %v2456_v25 }
  0x50   : > { %2336 = vmatmul.mubr.bf16.gmra.mxu0 %v2441_v26  ;;  %2368 = vmatmul.mubr.bf16.gmra.mxu1 %v2457_v27 }
  0x51   : > { %2339 = vmatprep.mubr.bf16.mxu0 %v2442_v28  ;;  %2371 = vmatprep.mubr.bf16.mxu1 %v2458_v29 }
  0x58   : > { %2340 = vmatmul.mubr.bf16.gmra.mxu0 %v2443_v30  ;;  %2372 = vmatmul.mubr.bf16.gmra.mxu1 %v2459_v31 }
  0x59   : > { %2343 = vmatprep.mubr.bf16.mxu0 %v2444_v32  ;;  %2375 = vmatprep.mubr.bf16.mxu1 %v2460_v33 }
  0x60   : > { %2344 = vmatmul.mubr.bf16.gmra.mxu0 %v2445_v34  ;;  %2376 = vmatmul.mubr.bf16.gmra.mxu1 %v2461_v35 }
  0x61   : > { %2347 = vmatprep.mubr.bf16.mxu0 %v2446_v36  ;;  %2379 = vmatprep.mubr.bf16.mxu1 %v2462_v37 }
  0x68   : > { %2348 = vmatmul.mubr.bf16.gmra.mxu0 %v2447_v38  ;;  %2380 = vmatmul.mubr.bf16.gmra.mxu1 %v2463_v39 }
  0xf0   : > { %v2321_v40 = vpop.f32.mrf.mxu0  ;;  %v2584_v41 = vpop.f32.mrf.mxu1 }
  0xf1   : > { %v1610_v58 = vmul.f32 %v2321_v40, %v2321_v40 }
  0xf2   : > { %v768_v43 = vpop.f32.mrf.mxu0  ;;  %v2592_v44 = vpop.f32.mrf.mxu1 }
  0xf3   : > { %v1608_v49 = vmul.f32 %v768_v43, %v768_v43 }
  0xf4   : > { %v2322_v45 = vpop.f32.mrf.mxu0  ;;  %v2601_v46 = vpop.f32.mrf.mxu1 }
  0xf5   : > { %v2080_v47 = vpack.c.bf16 %v2322_v45, %v2321_v40  ;;  %v2160_v48 = vpack.c.bf16 %v2601_v46, %v2584_v41  ;;  %v1611_v63 = vmul.f32 %v2322_v45, %v2322_v45 }
  0xf6   : > { %v771_v50 = vpop.f32.mrf.mxu0  ;;  %v2605_v51 = vpop.f32.mrf.mxu1 }
  0xf7   : > { %2232 = vst [vmem:[%s2599_s30 + $0x8] sm:$0xff] %v2080_v47   ;;  %v2075_v52 = vpack.c.bf16 %v771_v50, %v768_v43  ;;  %v1539_v53 = vadd.f32 %v771_v50, %v768_v43  ;;  %v1609_v54 = vmul.f32 %v771_v50, %v771_v50  ;;  %2248 = vst [vmem:[%s2599_s30 + $0x88] sm:$0xff] %v2160_v48  }
  0xf8   : > { %v2155_v55 = vpack.c.bf16 %v2605_v51, %v2592_v44  ;;  %v2325_v56 = vpop.f32.mrf.mxu0  ;;  %v2611_v57 = vpop.f32.mrf.mxu1 }
  0xf9   : > { %2076 = vst [vmem:[%s2599_s30] sm:$0xff] %v2075_v52   ;;  %v1540_v59 = vadd.f32 %v2321_v40, %v1539_v53  ;;  %v1672_v60 = vadd.f32 %v1609_v54, %v1608_v49  ;;  %v1614_v18 = vmul.f32 %v2325_v56, %v2325_v56 }
  0xfa   : > { %2247 = vst [vmem:[%s2599_s30 + $0x80] sm:$0xff] %v2155_v55   ;;  %v784_v61 = vpop.f32.mrf.mxu0  ;;  %v2615_v62 = vpop.f32.mrf.mxu1 }
  0xfb   : > { %v1673_v0 = vadd.f32 %v1672_v60, %v1610_v58  ;;  %v1541_v1 = vadd.f32 %v2322_v45, %v1540_v59  ;;  %v1612_v5 = vmul.f32 %v784_v61, %v784_v61 }
  0xfc   : > { %v2326_v2 = vpop.f32.mrf.mxu0  ;;  %v2617_v3 = vpop.f32.mrf.mxu1 }
  0xfd   : > { %v1542_v4 = vadd.f32 %v1541_v1, %v784_v61  ;;  %v1674_v6 = vadd.f32 %v1673_v0, %v1611_v63  ;;  %v2090_v7 = vpack.c.bf16 %v2326_v2, %v2325_v56  ;;  %v2170_v9 = vpack.c.bf16 %v2617_v3, %v2611_v57 }
  0xfe   : > { %v787_v8 = vpop.f32.mrf.mxu0  ;;  %v2621_v10 = vpop.f32.mrf.mxu1  ;;  %v1615_v23 = vmul.f32 %v2326_v2, %v2326_v2 }
  0xff   : > { %v1675_v11 = vadd.f32 %v1674_v6, %v1612_v5  ;;  %2234 = vst [vmem:[%s2599_s30 + $0x18] sm:$0xff] %v2090_v7   ;;  %v2085_v12 = vpack.c.bf16 %v787_v8, %v784_v61  ;;  %v1543_v13 = vadd.f32 %v1542_v4, %v787_v8  ;;  %v1613_v14 = vmul.f32 %v787_v8, %v787_v8 }
 0x100   : > { %v2329_v15 = vpop.f32.mrf.mxu0  ;;  %2250 = vst [vmem:[%s2599_s30 + $0x98] sm:$0xff] %v2170_v9   ;;  %v2165_v16 = vpack.c.bf16 %v2621_v10, %v2615_v62  ;;  %v2627_v17 = vpop.f32.mrf.mxu1 }
 0x101   : > { %2233 = vst [vmem:[%s2599_s30 + $0x10] sm:$0xff] %v2085_v12   ;;  %v1544_v19 = vadd.f32 %v2325_v56, %v1543_v13  ;;  %v1676_v20 = vadd.f32 %v1675_v11, %v1613_v14  ;;  %v1618_v43 = vmul.f32 %v2329_v15, %v2329_v15 }
 0x102   : > { %v800_v21 = vpop.f32.mrf.mxu0  ;;  %2249 = vst [vmem:[%s2599_s30 + $0x90] sm:$0xff] %v2165_v16   ;;  %v2631_v22 = vpop.f32.mrf.mxu1 }
 0x103   : > { %v1677_v24 = vadd.f32 %v1676_v20, %v1614_v18  ;;  %v1545_v25 = vadd.f32 %v2326_v2, %v1544_v19  ;;  %v1616_v29 = vmul.f32 %v800_v21, %v800_v21 }
 0x104   : > { %v2330_v26 = vpop.f32.mrf.mxu0  ;;  %v2633_v27 = vpop.f32.mrf.mxu1 }
 0x105   : > { %v1546_v28 = vadd.f32 %v1545_v25, %v800_v21  ;;  %v1678_v30 = vadd.f32 %v1677_v24, %v1615_v23  ;;  %v2100_v31 = vpack.c.bf16 %v2330_v26, %v2329_v15  ;;  %v2180_v33 = vpack.c.bf16 %v2633_v27, %v2627_v17 }
 0x106   : > { %v803_v32 = vpop.f32.mrf.mxu0  ;;  %v2637_v34 = vpop.f32.mrf.mxu1  ;;  %v1619_v50 = vmul.f32 %v2330_v26, %v2330_v26 }
 0x107   : > { %v1679_v35 = vadd.f32 %v1678_v30, %v1616_v29  ;;  %2236 = vst [vmem:[%s2599_s30 + $0x28] sm:$0xff] %v2100_v31   ;;  %v2095_v36 = vpack.c.bf16 %v803_v32, %v800_v21  ;;  %v1547_v37 = vadd.f32 %v1546_v28, %v803_v32  ;;  %v1617_v38 = vmul.f32 %v803_v32, %v803_v32 }
 0x108   : > { %v2333_v39 = vpop.f32.mrf.mxu0  ;;  %2252 = vst [vmem:[%s2599_s30 + $0xa8] sm:$0xff] %v2180_v33   ;;  %v2175_v40 = vpack.c.bf16 %v2637_v34, %v2631_v22  ;;  %v2643_v42 = vpop.f32.mrf.mxu1 }
 0x109   : > { %2235 = vst [vmem:[%s2599_s30 + $0x20] sm:$0xff] %v2095_v36   ;;  %v1548_v45 = vadd.f32 %v2329_v15, %v1547_v37  ;;  %v1680_v47 = vadd.f32 %v1679_v35, %v1617_v38  ;;  %v1622_v9 = vmul.f32 %v2333_v39, %v2333_v39 }
 0x10a   : > { %v816_v48 = vpop.f32.mrf.mxu0  ;;  %2251 = vst [vmem:[%s2599_s30 + $0xa0] sm:$0xff] %v2175_v40   ;;  %v2647_v49 = vpop.f32.mrf.mxu1 }
 0x10b   : > { %v1681_v52 = vadd.f32 %v1680_v47, %v1618_v43  ;;  %v1549_v53 = vadd.f32 %v2330_v26, %v1548_v45  ;;  %v1620_v58 = vmul.f32 %v816_v48, %v816_v48 }
 0x10c   : > { %v2334_v54 = vpop.f32.mrf.mxu0  ;;  %v2649_v55 = vpop.f32.mrf.mxu1 }
 0x10d   : > { %v1550_v56 = vadd.f32 %v1549_v53, %v816_v48  ;;  %v1682_v59 = vadd.f32 %v1681_v52, %v1619_v50  ;;  %v2110_v60 = vpack.c.bf16 %v2334_v54, %v2333_v39  ;;  %v2190_v63 = vpack.c.bf16 %v2649_v55, %v2643_v42 }
 0x10e   : > { %v819_v61 = vpop.f32.mrf.mxu0  ;;  %v2653_v0 = vpop.f32.mrf.mxu1  ;;  %v1623_v15 = vmul.f32 %v2334_v54, %v2334_v54 }
 0x10f   : > { %v1683_v1 = vadd.f32 %v1682_v59, %v1620_v58  ;;  %2238 = vst [vmem:[%s2599_s30 + $0x38] sm:$0xff] %v2110_v60   ;;  %v2105_v2 = vpack.c.bf16 %v819_v61, %v816_v48  ;;  %v1551_v4 = vadd.f32 %v1550_v56, %v819_v61  ;;  %v1621_v5 = vmul.f32 %v819_v61, %v819_v61 }
 0x110   : > { %v2337_v6 = vpop.f32.mrf.mxu0  ;;  %2254 = vst [vmem:[%s2599_s30 + $0xb8] sm:$0xff] %v2190_v63   ;;  %v2185_v7 = vpack.c.bf16 %v2653_v0, %v2647_v49  ;;  %v2659_v8 = vpop.f32.mrf.mxu1 }
 0x111   : > { %2237 = vst [vmem:[%s2599_s30 + $0x30] sm:$0xff] %v2105_v2   ;;  %v1552_v11 = vadd.f32 %v2333_v39, %v1551_v4  ;;  %v1684_v12 = vadd.f32 %v1683_v1, %v1621_v5  ;;  %v1626_v38 = vmul.f32 %v2337_v6, %v2337_v6 }
 0x112   : > { %v832_v13 = vpop.f32.mrf.mxu0  ;;  %2253 = vst [vmem:[%s2599_s30 + $0xb0] sm:$0xff] %v2185_v7   ;;  %v2663_v14 = vpop.f32.mrf.mxu1 }
 0x113   : > { %v1685_v16 = vadd.f32 %v1684_v12, %v1622_v9  ;;  %v1553_v18 = vadd.f32 %v2334_v54, %v1552_v11  ;;  %v1624_v23 = vmul.f32 %v832_v13, %v832_v13 }
 0x114   : > { %v2338_v19 = vpop.f32.mrf.mxu0  ;;  %v2665_v20 = vpop.f32.mrf.mxu1 }
 0x115   : > { %v1554_v21 = vadd.f32 %v1553_v18, %v832_v13  ;;  %v1686_v24 = vadd.f32 %v1685_v16, %v1623_v15  ;;  %v2120_v25 = vpack.c.bf16 %v2338_v19, %v2337_v6  ;;  %v2200_v28 = vpack.c.bf16 %v2665_v20, %v2659_v8 }
 0x116   : > { %v835_v26 = vpop.f32.mrf.mxu0  ;;  %v2669_v29 = vpop.f32.mrf.mxu1  ;;  %v1627_v47 = vmul.f32 %v2338_v19, %v2338_v19 }
 0x117   : > { %v1687_v30 = vadd.f32 %v1686_v24, %v1624_v23  ;;  %2240 = vst [vmem:[%s2599_s30 + $0x48] sm:$0xff] %v2120_v25   ;;  %v2115_v31 = vpack.c.bf16 %v835_v26, %v832_v13  ;;  %v1555_v32 = vadd.f32 %v1554_v21, %v835_v26  ;;  %v1625_v33 = vmul.f32 %v835_v26, %v835_v26 }
 0x118   : > { %v2341_v35 = vpop.f32.mrf.mxu0  ;;  %2256 = vst [vmem:[%s2599_s30 + $0xc8] sm:$0xff] %v2200_v28   ;;  %v2195_v36 = vpack.c.bf16 %v2669_v29, %v2663_v14  ;;  %v2675_v37 = vpop.f32.mrf.mxu1 }
 0x119   : > { %2239 = vst [vmem:[%s2599_s30 + $0x40] sm:$0xff] %v2115_v31   ;;  %v1556_v39 = vadd.f32 %v2337_v6, %v1555_v32  ;;  %v1688_v40 = vadd.f32 %v1687_v30, %v1625_v33  ;;  %v1630_v11 = vmul.f32 %v2341_v35, %v2341_v35 }
 0x11a   : > { %v848_v43 = vpop.f32.mrf.mxu0  ;;  %2255 = vst [vmem:[%s2599_s30 + $0xc0] sm:$0xff] %v2195_v36   ;;  %v2679_v45 = vpop.f32.mrf.mxu1 }
 0x11b   : > { %v1689_v48 = vadd.f32 %v1688_v40, %v1626_v38  ;;  %v1557_v50 = vadd.f32 %v2338_v19, %v1556_v39  ;;  %v1628_v56 = vmul.f32 %v848_v43, %v848_v43 }
 0x11c   : > { %v2342_v52 = vpop.f32.mrf.mxu0  ;;  %v2681_v53 = vpop.f32.mrf.mxu1 }
 0x11d   : > { %v1558_v54 = vadd.f32 %v1557_v50, %v848_v43  ;;  %v1690_v58 = vadd.f32 %v1689_v48, %v1627_v47  ;;  %v2130_v59 = vpack.c.bf16 %v2342_v52, %v2341_v35  ;;  %v2210_v61 = vpack.c.bf16 %v2681_v53, %v2675_v37 }
 0x11e   : > { %v851_v60 = vpop.f32.mrf.mxu0  ;;  %v2685_v63 = vpop.f32.mrf.mxu1  ;;  %v1631_v18 = vmul.f32 %v2342_v52, %v2342_v52 }
 0x11f   : > { %v1691_v1 = vadd.f32 %v1690_v58, %v1628_v56  ;;  %2242 = vst [vmem:[%s2599_s30 + $0x58] sm:$0xff] %v2130_v59   ;;  %v2125_v2 = vpack.c.bf16 %v851_v60, %v848_v43  ;;  %v1559_v4 = vadd.f32 %v1558_v54, %v851_v60  ;;  %v1629_v5 = vmul.f32 %v851_v60, %v851_v60 }
 0x120   : > { %v2345_v6 = vpop.f32.mrf.mxu0  ;;  %2258 = vst [vmem:[%s2599_s30 + $0xd8] sm:$0xff] %v2210_v61   ;;  %v2205_v7 = vpack.c.bf16 %v2685_v63, %v2679_v45  ;;  %v2691_v9 = vpop.f32.mrf.mxu1 }
 0x121   : > { %2241 = vst [vmem:[%s2599_s30 + $0x50] sm:$0xff] %v2125_v2   ;;  %v1560_v12 = vadd.f32 %v2341_v35, %v1559_v4  ;;  %v1692_v13 = vadd.f32 %v1691_v1, %v1629_v5  ;;  %v1634_v48 = vmul.f32 %v2345_v6, %v2345_v6 }
 0x122   : > { %v864_v15 = vpop.f32.mrf.mxu0  ;;  %2257 = vst [vmem:[%s2599_s30 + $0xd0] sm:$0xff] %v2205_v7   ;;  %v2695_v16 = vpop.f32.mrf.mxu1 }
 0x123   : > { %v1693_v19 = vadd.f32 %v1692_v13, %v1630_v11  ;;  %v1561_v21 = vadd.f32 %v2342_v52, %v1560_v12  ;;  %v1632_v26 = vmul.f32 %v864_v15, %v864_v15 }
 0x124   : > { %v2346_v23 = vpop.f32.mrf.mxu0  ;;  %v2697_v24 = vpop.f32.mrf.mxu1 }
 0x125   : > { %v1562_v25 = vadd.f32 %v1561_v21, %v864_v15  ;;  %v1694_v28 = vadd.f32 %v1693_v19, %v1631_v18  ;;  %v2140_v30 = vpack.c.bf16 %v2346_v23, %v2345_v6  ;;  %v2220_v32 = vpack.c.bf16 %v2697_v24, %v2691_v9 }
 0x126   : > { %v867_v31 = vpop.f32.mrf.mxu0  ;;  %v2701_v33 = vpop.f32.mrf.mxu1  ;;  %v1635_v58 = vmul.f32 %v2346_v23, %v2346_v23 }
 0x127   : > { %v1695_v35 = vadd.f32 %v1694_v28, %v1632_v26  ;;  %2244 = vst [vmem:[%s2599_s30 + $0x68] sm:$0xff] %v2140_v30   ;;  %v2135_v36 = vpack.c.bf16 %v867_v31, %v864_v15  ;;  %v1563_v38 = vadd.f32 %v1562_v25, %v867_v31  ;;  %v1633_v39 = vmul.f32 %v867_v31, %v867_v31 }
 0x128   : > { %v2349_v40 = vpop.f32.mrf.mxu0  ;;  %2260 = vst [vmem:[%s2599_s30 + $0xe8] sm:$0xff] %v2220_v32   ;;  %v2215_v43 = vpack.c.bf16 %v2701_v33, %v2695_v16  ;;  %v2707_v47 = vpop.f32.mrf.mxu1  ;;  %v1640_v32 = vmul.f32 %v2592_v44, %v2592_v44 }
 0x129   : > { %2243 = vst [vmem:[%s2599_s30 + $0x60] sm:$0xff] %v2135_v36   ;;  %v1564_v50 = vadd.f32 %v2345_v6, %v1563_v38  ;;  %v1696_v52 = vadd.f32 %v1695_v35, %v1633_v39  ;;  %v1641_v39 = vmul.f32 %v2605_v51, %v2605_v51 }
 0x12a   : > { %v880_v54 = vpop.f32.mrf.mxu0  ;;  %2259 = vst [vmem:[%s2599_s30 + $0xe0] sm:$0xff] %v2215_v43   ;;  %v2711_v56 = vpop.f32.mrf.mxu1 }
 0x12b   : > { %v1697_v59 = vadd.f32 %v1696_v52, %v1634_v48  ;;  %v1565_v60 = vadd.f32 %v2346_v23, %v1564_v50  ;;  %v1636_v4 = vmul.f32 %v880_v54, %v880_v54  ;;  %v1638_v23 = vmul.f32 %v2349_v40, %v2349_v40 }
 0x12c   : > { %v2350_v61 = vpop.f32.mrf.mxu0  ;;  %v2713_v1 = vpop.f32.mrf.mxu1  ;;  %v1643_v52 = vmul.f32 %v2601_v46, %v2601_v46 }
 0x12d   : > { %v1566_v2 = vadd.f32 %v1565_v60, %v880_v54  ;;  %v1698_v5 = vadd.f32 %v1697_v59, %v1635_v58  ;;  %v2150_v7 = vpack.c.bf16 %v2350_v61, %v2349_v40  ;;  %v2230_v11 = vpack.c.bf16 %v2713_v1, %v2707_v47 }
 0x12e   : > { %v883_v6 = vpop.f32.mrf.mxu0  ;;  %v2717_v12 = vpop.f32.mrf.mxu1  ;;  %v1639_v28 = vmul.f32 %v2350_v61, %v2350_v61  ;;  %v1644_v59 = vmul.f32 %v2615_v62, %v2615_v62 }
 0x12f   : > { %v1699_v13 = vadd.f32 %v1698_v5, %v1636_v4  ;;  %2246 = vst [vmem:[%s2599_s30 + $0x78] sm:$0xff] %v2150_v7   ;;  %v2145_v15 = vpack.c.bf16 %v883_v6, %v880_v54  ;;  %v1567_v18 = vadd.f32 %v1566_v2, %v883_v6  ;;  %v1637_v19 = vmul.f32 %v883_v6, %v883_v6 }
 0x130   : > { %2262 = vst [vmem:[%s2599_s30 + $0xf8] sm:$0xff] %v2230_v11   ;;  %v2225_v21 = vpack.c.bf16 %v2717_v12, %v2711_v56  ;;  %v1645_v2 = vmul.f32 %v2621_v10, %v2621_v10  ;;  %v1648_v11 = vmul.f32 %v2631_v22, %v2631_v22 }
 0x131   : > { %2245 = vst [vmem:[%s2599_s30 + $0x70] sm:$0xff] %v2145_v15   ;;  %v1568_v25 = vadd.f32 %v2349_v40, %v1567_v18  ;;  %v1700_v26 = vadd.f32 %v1699_v13, %v1637_v19  ;;  %v1642_v40 = vmul.f32 %v2584_v41, %v2584_v41  ;;  %v1649_v18 = vmul.f32 %v2637_v34, %v2637_v34 }
 0x132   : > { %2261 = vst [vmem:[%s2599_s30 + $0xf0] sm:$0xff] %v2225_v21  }
 0x133   : > { %v1569_v30 = vadd.f32 %v2350_v61, %v1568_v25  ;;  %v1701_v31 = vadd.f32 %v1700_v26, %v1638_v23  ;;  %v1652_v26 = vmul.f32 %v2647_v49, %v2647_v49 }
 0x135   : > { %v1702_v35 = vadd.f32 %v1701_v31, %v1639_v28  ;;  %v1570_v36 = vadd.f32 %v1569_v30, %v2592_v44  ;;  %v1653_v31 = vmul.f32 %v2653_v0, %v2653_v0 }
 0x137   : > { %v1571_v38 = vadd.f32 %v1570_v36, %v2605_v51  ;;  %v1703_v43 = vadd.f32 %v1702_v35, %v1640_v32 }
 0x139   : > { %v1572_v48 = vadd.f32 %v2584_v41, %v1571_v38  ;;  %v1704_v50 = vadd.f32 %v1703_v43, %v1641_v39  ;;  %v1646_v41 = vmul.f32 %v2611_v57, %v2611_v57  ;;  %v1656_v39 = vmul.f32 %v2663_v14, %v2663_v14 }
 0x13b   : > { %v1705_v54 = vadd.f32 %v1704_v50, %v1642_v40  ;;  %v1573_v58 = vadd.f32 %v2601_v46, %v1572_v48  ;;  %v1647_v46 = vmul.f32 %v2617_v3, %v2617_v3  ;;  %v1657_v48 = vmul.f32 %v2669_v29, %v2669_v29 }
 0x13d   : > { %v1574_v44 = vadd.f32 %v1573_v58, %v2615_v62  ;;  %v1706_v60 = vadd.f32 %v1705_v54, %v1643_v52 }
 0x13f   : > { %v1707_v51 = vadd.f32 %v1706_v60, %v1644_v59  ;;  %v1575_v61 = vadd.f32 %v1574_v44, %v2621_v10  ;;  %v1660_v44 = vmul.f32 %v2679_v45, %v2679_v45 }
 0x141   : > { %v1576_v4 = vadd.f32 %v2611_v57, %v1575_v61  ;;  %v1708_v5 = vadd.f32 %v1707_v51, %v1645_v2  ;;  %v1650_v57 = vmul.f32 %v2627_v17, %v2627_v17  ;;  %v1661_v51 = vmul.f32 %v2685_v63, %v2685_v63 }
 0x143   : > { %v1709_v7 = vadd.f32 %v1708_v5, %v1646_v41  ;;  %v1577_v6 = vadd.f32 %v2617_v3, %v1576_v4  ;;  %v1651_v3 = vmul.f32 %v2633_v27, %v2633_v27  ;;  %v1664_v5 = vmul.f32 %v2695_v16, %v2695_v16 }
 0x145   : > { %v1578_v62 = vadd.f32 %v1577_v6, %v2631_v22  ;;  %v1710_v13 = vadd.f32 %v1709_v7, %v1647_v46  ;;  %v1665_v6 = vmul.f32 %v2701_v33, %v2701_v33 }
 0x147   : > { %v1711_v15 = vadd.f32 %v1710_v13, %v1648_v11  ;;  %v1579_v10 = vadd.f32 %v1578_v62, %v2637_v34 }
 0x149   : > { %v1580_v19 = vadd.f32 %v2627_v17, %v1579_v10  ;;  %v1712_v21 = vadd.f32 %v1711_v15, %v1649_v18  ;;  %v1654_v17 = vmul.f32 %v2643_v42, %v2643_v42  ;;  %v1668_v10 = vmul.f32 %v2711_v56, %v2711_v56 }
 0x14b   : > { %v1713_v23 = vadd.f32 %v1712_v21, %v1650_v57  ;;  %v1581_v25 = vadd.f32 %v2633_v27, %v1580_v19  ;;  %v1655_v27 = vmul.f32 %v2649_v55, %v2649_v55  ;;  %v1669_v19 = vmul.f32 %v2717_v12, %v2717_v12 }
 0x14d   : > { %v1582_v22 = vadd.f32 %v1581_v25, %v2647_v49  ;;  %v1714_v28 = vadd.f32 %v1713_v23, %v1651_v3 }
 0x14f   : > { %v1715_v30 = vadd.f32 %v1714_v28, %v1652_v26  ;;  %v1583_v34 = vadd.f32 %v1582_v22, %v2653_v0 }
 0x151   : > { %v1584_v32 = vadd.f32 %v2643_v42, %v1583_v34  ;;  %v1716_v35 = vadd.f32 %v1715_v30, %v1653_v31  ;;  %v1658_v42 = vmul.f32 %v2659_v8, %v2659_v8 }
 0x153   : > { %v1717_v36 = vadd.f32 %v1716_v35, %v1654_v17  ;;  %v1585_v38 = vadd.f32 %v2649_v55, %v1584_v32  ;;  %v1659_v55 = vmul.f32 %v2665_v20, %v2665_v20  ;;  %v1538_v35 = vld [vmem:[%s2589_s27] sm:$0x3] }
 0x155   : > { %v1586_v49 = vadd.f32 %v1585_v38, %v2663_v14  ;;  %v1718_v43 = vadd.f32 %v1717_v36, %v1655_v27 }
 0x157   : > { %v1719_v40 = vadd.f32 %v1718_v43, %v1656_v39  ;;  %v1587_v0 = vadd.f32 %v1586_v49, %v2669_v29 }
 0x159   : > { %v1588_v50 = vadd.f32 %v2659_v8, %v1587_v0  ;;  %v1720_v52 = vadd.f32 %v1719_v40, %v1657_v48  ;;  %v1662_v8 = vmul.f32 %v2675_v37, %v2675_v37 }
 0x15b   : > { %v1721_v54 = vadd.f32 %v1720_v52, %v1658_v42  ;;  %v1589_v58 = vadd.f32 %v2665_v20, %v1588_v50  ;;  %v1663_v20 = vmul.f32 %v2681_v53, %v2681_v53 }
 0x15d   : > { %v1590_v14 = vadd.f32 %v1589_v58, %v2679_v45  ;;  %v1722_v59 = vadd.f32 %v1721_v54, %v1659_v55 }
 0x15f   : > { %v1723_v60 = vadd.f32 %v1722_v59, %v1660_v44  ;;  %v1591_v29 = vadd.f32 %v1590_v14, %v2685_v63 }
 0x161   : > { %v1592_v61 = vadd.f32 %v2675_v37, %v1591_v29  ;;  %v1724_v2 = vadd.f32 %v1723_v60, %v1661_v51  ;;  %v1666_v37 = vmul.f32 %v2691_v9, %v2691_v9 }
 0x163   : > { %v1725_v41 = vadd.f32 %v1724_v2, %v1662_v8  ;;  %v1593_v4 = vadd.f32 %v2681_v53, %v1592_v61  ;;  %v1667_v53 = vmul.f32 %v2697_v24, %v2697_v24 }
 0x165   : > { %v1594_v45 = vadd.f32 %v1593_v4, %v2695_v16  ;;  %v1726_v46 = vadd.f32 %v1725_v41, %v1663_v20 }
 0x167   : > { %v1727_v7 = vadd.f32 %v1726_v46, %v1664_v5  ;;  %v1595_v63 = vadd.f32 %v1594_v45, %v2701_v33 }
 0x169   : > { %v1596_v62 = vadd.f32 %v2691_v9, %v1595_v63  ;;  %v1728_v11 = vadd.f32 %v1727_v7, %v1665_v6  ;;  %v1670_v9 = vmul.f32 %v2707_v47, %v2707_v47 }
 0x16b   : > { %v1729_v13 = vadd.f32 %v1728_v11, %v1666_v37  ;;  %v1597_v15 = vadd.f32 %v2697_v24, %v1596_v62  ;;  %v1671_v24 = vmul.f32 %v2713_v1, %v2713_v1 }
 0x16d   : > { %v1598_v16 = vadd.f32 %v1597_v15, %v2711_v56  ;;  %v1730_v18 = vadd.f32 %v1729_v13, %v1667_v53 }
 0x16f   : > { %v1731_v57 = vadd.f32 %v1730_v18, %v1668_v10  ;;  %v1599_v33 = vadd.f32 %v1598_v16, %v2717_v12 }
 0x171   : > { %v1600_v21 = vadd.f32 %v2707_v47, %v1599_v33  ;;  %v1732_v3 = vadd.f32 %v1731_v57, %v1669_v19 }
 0x173   : > { %v1601_v23 = vadd.f32 %v2713_v1, %v1600_v21  ;;  %v1733_v56 = vadd.f32 %v1732_v3, %v1670_v9 }
 0x175   : > { %v1602_v25 = vrot.slane %v1601_v23, 4  ;;  %v1734_v22 = vadd.f32 %v1733_v56, %v1671_v24 }
 0x177   : > { %v1603_v26 = vadd.f32 %v1602_v25, %v1601_v23  ;;  %v1735_v28 = vrot.slane %v1734_v22, 4 }
 0x179   : > { %v1604_v30 = vrot.slane %v1603_v26, 2  ;;  %v1736_v12 = vadd.f32 %v1735_v28, %v1734_v22 }
 0x17b   : > { %v1605_v34 = vadd.f32 %v1604_v30, %v1603_v26  ;;  %v1737_v31 = vrot.slane %v1736_v12, 2 }
 0x17d   : > { %v1606_v17 = vrot.slane %v1605_v34, 1  ;;  %v1738_v32 = vadd.f32 %v1737_v31, %v1736_v12 }
 0x17f   : > { %v1739_v47 = vrot.slane %v1738_v32, 1  ;;  %v1607_v27 = vadd.f32 %v1606_v17, %v1605_v34 }
 0x181   : > { %v1740_v36 = vadd.f32 %v1739_v47, %v1738_v32 }
 0x183   : > { %v1742_v38 = vsel %vm1741_vm0, %v1607_v27, %v1740_v36 }
 0x184   : > { %v1743_v49 = vadd.f32 %v1742_v38, %v1538_v35 }
 0x186   : > { %1744 = vst [vmem:[%s2589_s27] sm:$0x3] %v1743_v49 }
 0x187 PF: > { %s14_s14 = sadd.s32 1, %s2486_s14   ;;  %s2836_s12 = smov %s2482_s13 }
 0x188   : > { %p11_p5 = scmp.ge.s32.totalorder %s14_s14, 6   ;;  %s2837_s13 = smov %s2839_s15 }
 0x18a   :  { %13 = sbr.rel (!%p11_p5) target bundleno = 2 (0x2), region = 85 }

// kernel: generator_forward.17
= control target key start
LH: loop header
LB: loop body
LE: loop exit
PB: predicated region body
PF: predicated region fallthrough
CT: control target
= control target key end

     0   :  { %s3886_s9 = smov 0   ;;  %s3888_s10 = smov 0   ;;  %s4089_s0 = inlined_call_operand.vmem [shape: bf16[4,2048,128], index: 0, kind: input, shape index: {}]   ;;  %s4090_s1 = inlined_call_operand.vmem [shape: bf16[4,128,128], index: 1, kind: input, shape index: {}]   ;;  %s4091_s2 = inlined_call_operand.vmem [shape: bf16[4,2048,128], index: 2, kind: output, shape index: {}]  }
   0x1   :  { %s3890_s11 = smov 0   ;;  %s3892_s12 = smov 0  }
   0x2   :  { %s3894_s13 = smov 0  }
   0x3 LB: > { %s27_s14 = sadd.s32 1, %s3861_s11  ;;  %s31_s15 = sadd.s32 1, %s3865_s12  ;;  %s3869_s13 = sphi %s3894_s13, %s12_s13   ;;  %s3865_s12 = sphi %s3892_s12, %s4095_s12   ;;  %s3861_s11 = sphi %s3890_s11, %s4094_s11   ;;  %s3857_s10 = sphi %s3888_s10, %s4093_s10   ;;  %s3853_s9 = sphi %s3886_s9, %s4092_s9  }
   0x4   : > { %p29_p0 = scmp.ge.s32.totalorder %s27_s14, 2  ;;  %p2764_p1 = scmp.ge.s32.totalorder %s3869_s13, 1 }
   0x5   : > { %p162_p2 = scmp.lt.s32.totalorder %s3869_s13, 9 }
   0x6   : > { %s4097_s14 = smov (%p29_p0, %s27_s14), 0  ;;  %s4099_s15 = smov (!%p29_p0, %s31_s15), %s3865_s12 }
   0x7   : > { %p163_p3 = pnand %p2764_p1, %p162_p2  ;;  %p33_p4 = scmp.ge.s32.totalorder %s4099_s15, 4 }
   0x8   : > { %s2765_s16 = sshll.u32 (!%p163_p3), %s3853_s9, 7  ;;  %p205_p5 = scmp.lt.s32.totalorder (!%p163_p3), %s3857_s10, 3 }
   0x9   : > { %s4101_s15 = smov (%p33_p4, %s4099_s15), 0  ;;  %166 = sbr.rel (%p163_p3) target bundleno = 372 (0x174), region = 28 }
   0xa   : > { %p207_p6 = scmp.lt.s32.totalorder (!%p163_p3), %s2765_s16, 255 }
   0xe   : > { %s4103_s10 = smov (!%p205_p5, %s3857_s10), 3  ;;  %s4105_s16 = smov (!%p207_p6, %s2765_s16), 255 }
   0xf   : > { %s2766_s17 = sshll.u32 %s4103_s10, 8  ;;  %s2975_s18 = sshll.u32 %s4103_s10, 6 }
  0x10   : > { %s3916_s19 = sadd.s32 %s2766_s17, %s4105_s16  ;;  %s3921_s22 = scalar_lea.vmem %s4090_s1, %s2975_s18 }
  0x11   : > { %v3759_v0 = vld [vmem:[%s3921_s22 + $0x38] sm:$0xff]   ;;  %v3760_v1 = vld [vmem:[%s3921_s22 + $0x30] sm:$0xff]   ;;  %s2767_s23 = sshll.u32 %s3916_s19, 2  ;;  %v3761_v2 = vld [vmem:[%s3921_s22 + $0x28] sm:$0xff]  }
  0x12   : > { %3559 = vmatprep.subr.bf16.mxu0 %v3759_v0  ;;  %3703 = vmatprep.subr.bf16.mxu1 %v3759_v0  ;;  %s3932_s26 = scalar_lea.vmem %s4089_s0, %s2767_s23  ;;  %v3762_v3 = vld [vmem:[%s3921_s22 + $0x20] sm:$0xff]   ;;  %v3763_v6 = vld [vmem:[%s3921_s22 + $0x18] sm:$0xff]   ;;  %v3764_v7 = vld [vmem:[%s3921_s22 + $0x10] sm:$0xff]   ;;  %s4008_s29 = scalar_lea.vmem %s4091_s2, %s2767_s23 }
  0x13   : > { %3560 = vmatpush3.bf16.msra.mxu0 %v3759_v0  ;;  %3711 = vmatpush3.bf16.msra.mxu1 %v3759_v0  ;;  %v3767_v4 = vld [vmem:[%s3932_s26] sm:$0xff]   ;;  %v3765_v8 = vld [vmem:[%s3921_s22 + $0x8] sm:$0xff]   ;;  %v3771_v12 = vld [vmem:[%s3932_s26 + $0x10] sm:$0xff]  }
  0x14   : > { %3561 = vmatprep.subr.bf16.mxu0 %v3760_v1  ;;  %3704 = vmatprep.subr.bf16.mxu1 %v3760_v1  ;;  %v3768_v5 = vld [vmem:[%s3932_s26 + $0x100] sm:$0xff]   ;;  %v3769_v10 = vld [vmem:[%s3932_s26 + $0x8] sm:$0xff]   ;;  %v3772_v13 = vld [vmem:[%s3932_s26 + $0x110] sm:$0xff]  }
  0x15   : > { %3575 = vmatprep.mubr.bf16.mxu0 %v3767_v4  ;;  %3639 = vmatprep.mubr.bf16.mxu1 %v3768_v5  ;;  %v3766_v9 = vld [vmem:[%s3921_s22] sm:$0xff]   ;;  %v3770_v11 = vld [vmem:[%s3932_s26 + $0x108] sm:$0xff]   ;;  %v3773_v14 = vld [vmem:[%s3932_s26 + $0x18] sm:$0xff]  }
  0x16   : > { %v3774_v15 = vld [vmem:[%s3932_s26 + $0x118] sm:$0xff]   ;;  %v3775_v16 = vld [vmem:[%s3932_s26 + $0x20] sm:$0xff]   ;;  %v3777_v18 = vld [vmem:[%s3932_s26 + $0x28] sm:$0xff]  }
  0x17   : > { %3562 = vmatpush3.bf16.msra.mxu0 %v3760_v1  ;;  %3712 = vmatpush3.bf16.msra.mxu1 %v3760_v1  ;;  %v3776_v17 = vld [vmem:[%s3932_s26 + $0x120] sm:$0xff]   ;;  %v3778_v19 = vld [vmem:[%s3932_s26 + $0x128] sm:$0xff]   ;;  %v3779_v20 = vld [vmem:[%s3932_s26 + $0x30] sm:$0xff]  }
  0x18   : > { %3563 = vmatprep.subr.bf16.mxu0 %v3761_v2  ;;  %3705 = vmatprep.subr.bf16.mxu1 %v3761_v2  ;;  %v3780_v21 = vld [vmem:[%s3932_s26 + $0x130] sm:$0xff]   ;;  %v3781_v22 = vld [vmem:[%s3932_s26 + $0x38] sm:$0xff]   ;;  %v3783_v24 = vld [vmem:[%s3932_s26 + $0x40] sm:$0xff]  }
  0x19   : > { %v3782_v23 = vld [vmem:[%s3932_s26 + $0x138] sm:$0xff]   ;;  %v3784_v25 = vld [vmem:[%s3932_s26 + $0x140] sm:$0xff]   ;;  %v3785_v26 = vld [vmem:[%s3932_s26 + $0x48] sm:$0xff]  }
  0x1a   : > { %v3786_v27 = vld [vmem:[%s3932_s26 + $0x148] sm:$0xff]   ;;  %v3787_v28 = vld [vmem:[%s3932_s26 + $0x50] sm:$0xff]   ;;  %v3789_v30 = vld [vmem:[%s3932_s26 + $0x58] sm:$0xff]  }
  0x1b   : > { %3564 = vmatpush3.bf16.msra.mxu0 %v3761_v2  ;;  %3713 = vmatpush3.bf16.msra.mxu1 %v3761_v2  ;;  %v3788_v29 = vld [vmem:[%s3932_s26 + $0x150] sm:$0xff]   ;;  %v3790_v31 = vld [vmem:[%s3932_s26 + $0x158] sm:$0xff]   ;;  %v3791_v32 = vld [vmem:[%s3932_s26 + $0x60] sm:$0xff]  }
  0x1c   : > { %3565 = vmatprep.subr.bf16.mxu0 %v3762_v3  ;;  %3706 = vmatprep.subr.bf16.mxu1 %v3762_v3  ;;  %v3792_v33 = vld [vmem:[%s3932_s26 + $0x160] sm:$0xff]   ;;  %v3793_v34 = vld [vmem:[%s3932_s26 + $0x68] sm:$0xff]   ;;  %v3795_v36 = vld [vmem:[%s3932_s26 + $0x70] sm:$0xff]  }
  0x1d   : > { %v3794_v35 = vld [vmem:[%s3932_s26 + $0x168] sm:$0xff]   ;;  %v3796_v37 = vld [vmem:[%s3932_s26 + $0x170] sm:$0xff]   ;;  %v3797_v38 = vld [vmem:[%s3932_s26 + $0x78] sm:$0xff]  }
  0x1e   : > { %v3798_v39 = vld [vmem:[%s3932_s26 + $0x178] sm:$0xff]   ;;  %v3799_v40 = vld [vmem:[%s3932_s26 + $0x80] sm:$0xff]   ;;  %v3801_v42 = vld [vmem:[%s3932_s26 + $0x88] sm:$0xff]  }
  0x1f   : > { %3566 = vmatpush3.bf16.msra.mxu0 %v3762_v3  ;;  %3714 = vmatpush3.bf16.msra.mxu1 %v3762_v3  ;;  %v3800_v41 = vld [vmem:[%s3932_s26 + $0x180] sm:$0xff]   ;;  %v3802_v43 = vld [vmem:[%s3932_s26 + $0x188] sm:$0xff]   ;;  %v3803_v44 = vld [vmem:[%s3932_s26 + $0x90] sm:$0xff]  }
  0x20   : > { %3567 = vmatprep.subr.bf16.mxu0 %v3763_v6  ;;  %3707 = vmatprep.subr.bf16.mxu1 %v3763_v6  ;;  %v3804_v45 = vld [vmem:[%s3932_s26 + $0x190] sm:$0xff]   ;;  %v3805_v46 = vld [vmem:[%s3932_s26 + $0x98] sm:$0xff]   ;;  %v3807_v48 = vld [vmem:[%s3932_s26 + $0xa0] sm:$0xff]  }
  0x21   : > { %v3806_v47 = vld [vmem:[%s3932_s26 + $0x198] sm:$0xff]   ;;  %v3808_v49 = vld [vmem:[%s3932_s26 + $0x1a0] sm:$0xff]   ;;  %v3809_v50 = vld [vmem:[%s3932_s26 + $0xa8] sm:$0xff]  }
  0x22   : > { %v3810_v51 = vld [vmem:[%s3932_s26 + $0x1a8] sm:$0xff]   ;;  %v3811_v52 = vld [vmem:[%s3932_s26 + $0xb0] sm:$0xff]   ;;  %v3813_v54 = vld [vmem:[%s3932_s26 + $0xb8] sm:$0xff]  }
  0x23   : > { %3568 = vmatpush3.bf16.msra.mxu0 %v3763_v6  ;;  %3715 = vmatpush3.bf16.msra.mxu1 %v3763_v6  ;;  %v3812_v53 = vld [vmem:[%s3932_s26 + $0x1b0] sm:$0xff]   ;;  %v3814_v55 = vld [vmem:[%s3932_s26 + $0x1b8] sm:$0xff]   ;;  %v3815_v56 = vld [vmem:[%s3932_s26 + $0xc0] sm:$0xff]  }
  0x24   : > { %3569 = vmatprep.subr.bf16.mxu0 %v3764_v7  ;;  %3708 = vmatprep.subr.bf16.mxu1 %v3764_v7  ;;  %v3816_v57 = vld [vmem:[%s3932_s26 + $0x1c0] sm:$0xff]   ;;  %v3817_v58 = vld [vmem:[%s3932_s26 + $0xc8] sm:$0xff]   ;;  %v3819_v60 = vld [vmem:[%s3932_s26 + $0xd0] sm:$0xff]  }
  0x25   : > { %v3818_v59 = vld [vmem:[%s3932_s26 + $0x1c8] sm:$0xff]   ;;  %v3820_v61 = vld [vmem:[%s3932_s26 + $0x1d0] sm:$0xff]   ;;  %v3821_v62 = vld [vmem:[%s3932_s26 + $0xd8] sm:$0xff]  }
  0x26   : > { %v3822_v63 = vld [vmem:[%s3932_s26 + $0x1d8] sm:$0xff]   ;;  %v3823_v0 = vld [vmem:[%s3932_s26 + $0xe0] sm:$0xff]   ;;  %v3825_v2 = vld [vmem:[%s3932_s26 + $0xe8] sm:$0xff]  }
  0x27   : > { %3570 = vmatpush3.bf16.msra.mxu0 %v3764_v7  ;;  %3716 = vmatpush3.bf16.msra.mxu1 %v3764_v7  ;;  %v3824_v1 = vld [vmem:[%s3932_s26 + $0x1e0] sm:$0xff]   ;;  %v3826_v3 = vld [vmem:[%s3932_s26 + $0x1e8] sm:$0xff]   ;;  %v3827_v4 = vld [vmem:[%s3932_s26 + $0xf0] sm:$0xff]  }
  0x28   : > { %3571 = vmatprep.subr.bf16.mxu0 %v3765_v8  ;;  %3709 = vmatprep.subr.bf16.mxu1 %v3765_v8  ;;  %v3828_v5 = vld [vmem:[%s3932_s26 + $0x1f0] sm:$0xff]   ;;  %v3829_v6 = vld [vmem:[%s3932_s26 + $0xf8] sm:$0xff]  }
  0x29   : > { %v3830_v7 = vld [vmem:[%s3932_s26 + $0x1f8] sm:$0xff]  }
  0x2b   : > { %3572 = vmatpush3.bf16.msra.mxu0 %v3765_v8  ;;  %3717 = vmatpush3.bf16.msra.mxu1 %v3765_v8 }
  0x2c   : > { %3573 = vmatprep.subr.bf16.mxu0 %v3766_v9  ;;  %3710 = vmatprep.subr.bf16.mxu1 %v3766_v9 }
  0x2f   : > { %3574 = vmatpush3.bf16.msra.mxu0 %v3766_v9  ;;  %3718 = vmatpush3.bf16.msra.mxu1 %v3766_v9 }
  0x32   : > { %3576 = vmatmul.mubr.bf16.vlgmr.msra.gmra.mxu0 %v3769_v10  ;;  %3640 = vmatmul.mubr.bf16.vlgmr.msra.gmra.mxu1 %v3770_v11 }
  0x33   : > { %3579 = vmatprep.mubr.bf16.mxu0 %v3771_v12  ;;  %3643 = vmatprep.mubr.bf16.mxu1 %v3772_v13 }
  0x3a   : > { %3580 = vmatmul.mubr.bf16.gmra.mxu0 %v3773_v14  ;;  %3644 = vmatmul.mubr.bf16.gmra.mxu1 %v3774_v15 }
  0x3b   : > { %3583 = vmatprep.mubr.bf16.mxu0 %v3775_v16  ;;  %3647 = vmatprep.mubr.bf16.mxu1 %v3776_v17 }
  0x42   : > { %3584 = vmatmul.mubr.bf16.gmra.mxu0 %v3777_v18  ;;  %3648 = vmatmul.mubr.bf16.gmra.mxu1 %v3778_v19 }
  0x43   : > { %3587 = vmatprep.mubr.bf16.mxu0 %v3779_v20  ;;  %3651 = vmatprep.mubr.bf16.mxu1 %v3780_v21 }
  0x4a   : > { %3588 = vmatmul.mubr.bf16.gmra.mxu0 %v3781_v22  ;;  %3652 = vmatmul.mubr.bf16.gmra.mxu1 %v3782_v23 }
  0x4b   : > { %3591 = vmatprep.mubr.bf16.mxu0 %v3783_v24  ;;  %3655 = vmatprep.mubr.bf16.mxu1 %v3784_v25 }
  0x52   : > { %3592 = vmatmul.mubr.bf16.gmra.mxu0 %v3785_v26  ;;  %3656 = vmatmul.mubr.bf16.gmra.mxu1 %v3786_v27 }
  0x53   : > { %3595 = vmatprep.mubr.bf16.mxu0 %v3787_v28  ;;  %3659 = vmatprep.mubr.bf16.mxu1 %v3788_v29 }
  0x5a   : > { %3596 = vmatmul.mubr.bf16.gmra.mxu0 %v3789_v30  ;;  %3660 = vmatmul.mubr.bf16.gmra.mxu1 %v3790_v31 }
  0x5b   : > { %3599 = vmatprep.mubr.bf16.mxu0 %v3791_v32  ;;  %3663 = vmatprep.mubr.bf16.mxu1 %v3792_v33 }
  0x62   : > { %3600 = vmatmul.mubr.bf16.gmra.mxu0 %v3793_v34  ;;  %3664 = vmatmul.mubr.bf16.gmra.mxu1 %v3794_v35 }
  0x63   : > { %3603 = vmatprep.mubr.bf16.mxu0 %v3795_v36  ;;  %3667 = vmatprep.mubr.bf16.mxu1 %v3796_v37 }
  0x6a   : > { %3604 = vmatmul.mubr.bf16.gmra.mxu0 %v3797_v38  ;;  %3668 = vmatmul.mubr.bf16.gmra.mxu1 %v3798_v39 }
  0x6b   : > { %3607 = vmatprep.mubr.bf16.mxu0 %v3799_v40  ;;  %3671 = vmatprep.mubr.bf16.mxu1 %v3800_v41 }
  0x72   : > { %3608 = vmatmul.mubr.bf16.gmra.mxu0 %v3801_v42  ;;  %3672 = vmatmul.mubr.bf16.gmra.mxu1 %v3802_v43 }
  0x73   : > { %3611 = vmatprep.mubr.bf16.mxu0 %v3803_v44  ;;  %3675 = vmatprep.mubr.bf16.mxu1 %v3804_v45 }
  0x7a   : > { %3612 = vmatmul.mubr.bf16.gmra.mxu0 %v3805_v46  ;;  %3676 = vmatmul.mubr.bf16.gmra.mxu1 %v3806_v47 }
  0x7b   : > { %3615 = vmatprep.mubr.bf16.mxu0 %v3807_v48  ;;  %3679 = vmatprep.mubr.bf16.mxu1 %v3808_v49 }
  0x82   : > { %3616 = vmatmul.mubr.bf16.gmra.mxu0 %v3809_v50  ;;  %3680 = vmatmul.mubr.bf16.gmra.mxu1 %v3810_v51 }
  0x83   : > { %3619 = vmatprep.mubr.bf16.mxu0 %v3811_v52  ;;  %3683 = vmatprep.mubr.bf16.mxu1 %v3812_v53 }
  0x8a   : > { %3620 = vmatmul.mubr.bf16.gmra.mxu0 %v3813_v54  ;;  %3684 = vmatmul.mubr.bf16.gmra.mxu1 %v3814_v55 }
  0x8b   : > { %3623 = vmatprep.mubr.bf16.mxu0 %v3815_v56  ;;  %3687 = vmatprep.mubr.bf16.mxu1 %v3816_v57 }
  0x92   : > { %3624 = vmatmul.mubr.bf16.gmra.mxu0 %v3817_v58  ;;  %3688 = vmatmul.mubr.bf16.gmra.mxu1 %v3818_v59 }
  0x93   : > { %3627 = vmatprep.mubr.bf16.mxu0 %v3819_v60  ;;  %3691 = vmatprep.mubr.bf16.mxu1 %v3820_v61 }
  0x9a   : > { %3628 = vmatmul.mubr.bf16.gmra.mxu0 %v3821_v62  ;;  %3692 = vmatmul.mubr.bf16.gmra.mxu1 %v3822_v63 }
  0x9b   : > { %3631 = vmatprep.mubr.bf16.mxu0 %v3823_v0  ;;  %3695 = vmatprep.mubr.bf16.mxu1 %v3824_v1 }
  0xa2   : > { %3632 = vmatmul.mubr.bf16.gmra.mxu0 %v3825_v2  ;;  %3696 = vmatmul.mubr.bf16.gmra.mxu1 %v3826_v3 }
  0xa3   : > { %3635 = vmatprep.mubr.bf16.mxu0 %v3827_v4  ;;  %3699 = vmatprep.mubr.bf16.mxu1 %v3828_v5 }
  0xaa   : > { %3636 = vmatmul.mubr.bf16.gmra.mxu0 %v3829_v6  ;;  %3700 = vmatmul.mubr.bf16.gmra.mxu1 %v3830_v7 }
  0xf2   : > { %v3577_v8 = vpop.f32.mrf.mxu0  ;;  %v3641_v9 = vpop.f32.mrf.mxu1 }
  0xf4   : > { %v1108_v10 = vpop.f32.mrf.mxu0  ;;  %v1364_v11 = vpop.f32.mrf.mxu1 }
  0xf6   : > { %v3578_v12 = vpop.f32.mrf.mxu0  ;;  %v3642_v13 = vpop.f32.mrf.mxu1 }
  0xf7   : > { %v3112_v14 = vpack.c.bf16 %v3578_v12, %v3577_v8  ;;  %v3272_v15 = vpack.c.bf16 %v3642_v13, %v3641_v9 }
  0xf8   : > { %v1111_v16 = vpop.f32.mrf.mxu0  ;;  %v1367_v17 = vpop.f32.mrf.mxu1 }
  0xf9   : > { %3424 = vst [vmem:[%s4008_s29 + $0x8] sm:$0xff] %v3112_v14   ;;  %3456 = vst [vmem:[%s4008_s29 + $0x108] sm:$0xff] %v3272_v15   ;;  %v3107_v18 = vpack.c.bf16 %v1111_v16, %v1108_v10  ;;  %v3267_v19 = vpack.c.bf16 %v1367_v17, %v1364_v11 }
  0xfa   : > { %v3581_v20 = vpop.f32.mrf.mxu0  ;;  %v3645_v21 = vpop.f32.mrf.mxu1 }
  0xfb   : > { %3108 = vst [vmem:[%s4008_s29] sm:$0xff] %v3107_v18   ;;  %3455 = vst [vmem:[%s4008_s29 + $0x100] sm:$0xff] %v3267_v19  }
  0xfc   : > { %v1124_v22 = vpop.f32.mrf.mxu0  ;;  %v1380_v23 = vpop.f32.mrf.mxu1 }
  0xfe   : > { %v3582_v24 = vpop.f32.mrf.mxu0  ;;  %v3646_v25 = vpop.f32.mrf.mxu1 }
  0xff   : > { %v3122_v26 = vpack.c.bf16 %v3582_v24, %v3581_v20  ;;  %v3282_v27 = vpack.c.bf16 %v3646_v25, %v3645_v21 }
 0x100   : > { %v1127_v28 = vpop.f32.mrf.mxu0  ;;  %v1383_v29 = vpop.f32.mrf.mxu1 }
 0x101   : > { %3426 = vst [vmem:[%s4008_s29 + $0x18] sm:$0xff] %v3122_v26   ;;  %3458 = vst [vmem:[%s4008_s29 + $0x118] sm:$0xff] %v3282_v27   ;;  %v3117_v30 = vpack.c.bf16 %v1127_v28, %v1124_v22  ;;  %v3277_v31 = vpack.c.bf16 %v1383_v29, %v1380_v23 }
 0x102   : > { %v3585_v32 = vpop.f32.mrf.mxu0  ;;  %v3649_v33 = vpop.f32.mrf.mxu1 }
 0x103   : > { %3425 = vst [vmem:[%s4008_s29 + $0x10] sm:$0xff] %v3117_v30   ;;  %3457 = vst [vmem:[%s4008_s29 + $0x110] sm:$0xff] %v3277_v31  }
 0x104   : > { %v1140_v34 = vpop.f32.mrf.mxu0  ;;  %v1396_v35 = vpop.f32.mrf.mxu1 }
 0x106   : > { %v3586_v36 = vpop.f32.mrf.mxu0  ;;  %v3650_v37 = vpop.f32.mrf.mxu1 }
 0x107   : > { %v3132_v38 = vpack.c.bf16 %v3586_v36, %v3585_v32  ;;  %v3292_v39 = vpack.c.bf16 %v3650_v37, %v3649_v33 }
 0x108   : > { %v1143_v40 = vpop.f32.mrf.mxu0  ;;  %v1399_v41 = vpop.f32.mrf.mxu1 }
 0x109   : > { %3428 = vst [vmem:[%s4008_s29 + $0x28] sm:$0xff] %v3132_v38   ;;  %3460 = vst [vmem:[%s4008_s29 + $0x128] sm:$0xff] %v3292_v39   ;;  %v3127_v42 = vpack.c.bf16 %v1143_v40, %v1140_v34  ;;  %v3287_v43 = vpack.c.bf16 %v1399_v41, %v1396_v35 }
 0x10a   : > { %v3589_v44 = vpop.f32.mrf.mxu0  ;;  %v3653_v45 = vpop.f32.mrf.mxu1 }
 0x10b   : > { %3427 = vst [vmem:[%s4008_s29 + $0x20] sm:$0xff] %v3127_v42   ;;  %3459 = vst [vmem:[%s4008_s29 + $0x120] sm:$0xff] %v3287_v43  }
 0x10c   : > { %v1156_v46 = vpop.f32.mrf.mxu0  ;;  %v1412_v47 = vpop.f32.mrf.mxu1 }
 0x10e   : > { %v3590_v48 = vpop.f32.mrf.mxu0  ;;  %v3654_v49 = vpop.f32.mrf.mxu1 }
 0x10f   : > { %v3142_v50 = vpack.c.bf16 %v3590_v48, %v3589_v44  ;;  %v3302_v51 = vpack.c.bf16 %v3654_v49, %v3653_v45 }
 0x110   : > { %v1159_v52 = vpop.f32.mrf.mxu0  ;;  %v1415_v53 = vpop.f32.mrf.mxu1 }
 0x111   : > { %3430 = vst [vmem:[%s4008_s29 + $0x38] sm:$0xff] %v3142_v50   ;;  %3462 = vst [vmem:[%s4008_s29 + $0x138] sm:$0xff] %v3302_v51   ;;  %v3137_v54 = vpack.c.bf16 %v1159_v52, %v1156_v46  ;;  %v3297_v55 = vpack.c.bf16 %v1415_v53, %v1412_v47 }
 0x112   : > { %v3593_v56 = vpop.f32.mrf.mxu0  ;;  %v3657_v57 = vpop.f32.mrf.mxu1 }
 0x113   : > { %3429 = vst [vmem:[%s4008_s29 + $0x30] sm:$0xff] %v3137_v54   ;;  %3461 = vst [vmem:[%s4008_s29 + $0x130] sm:$0xff] %v3297_v55  }
 0x114   : > { %v1172_v58 = vpop.f32.mrf.mxu0  ;;  %v1428_v59 = vpop.f32.mrf.mxu1 }
 0x116   : > { %v3594_v60 = vpop.f32.mrf.mxu0  ;;  %v3658_v61 = vpop.f32.mrf.mxu1 }
 0x117   : > { %v3152_v62 = vpack.c.bf16 %v3594_v60, %v3593_v56  ;;  %v3312_v63 = vpack.c.bf16 %v3658_v61, %v3657_v57 }
 0x118   : > { %v1175_v0 = vpop.f32.mrf.mxu0  ;;  %v1431_v1 = vpop.f32.mrf.mxu1 }
 0x119   : > { %3432 = vst [vmem:[%s4008_s29 + $0x48] sm:$0xff] %v3152_v62   ;;  %3464 = vst [vmem:[%s4008_s29 + $0x148] sm:$0xff] %v3312_v63   ;;  %v3147_v2 = vpack.c.bf16 %v1175_v0, %v1172_v58  ;;  %v3307_v3 = vpack.c.bf16 %v1431_v1, %v1428_v59 }
 0x11a   : > { %v3597_v4 = vpop.f32.mrf.mxu0  ;;  %v3661_v5 = vpop.f32.mrf.mxu1 }
 0x11b   : > { %3431 = vst [vmem:[%s4008_s29 + $0x40] sm:$0xff] %v3147_v2   ;;  %3463 = vst [vmem:[%s4008_s29 + $0x140] sm:$0xff] %v3307_v3  }
 0x11c   : > { %v1188_v6 = vpop.f32.mrf.mxu0  ;;  %v1444_v7 = vpop.f32.mrf.mxu1 }
 0x11e   : > { %v3598_v8 = vpop.f32.mrf.mxu0  ;;  %v3662_v9 = vpop.f32.mrf.mxu1 }
 0x11f   : > { %v3162_v10 = vpack.c.bf16 %v3598_v8, %v3597_v4  ;;  %v3322_v11 = vpack.c.bf16 %v3662_v9, %v3661_v5 }
 0x120   : > { %v1191_v12 = vpop.f32.mrf.mxu0  ;;  %v1447_v13 = vpop.f32.mrf.mxu1 }
 0x121   : > { %3434 = vst [vmem:[%s4008_s29 + $0x58] sm:$0xff] %v3162_v10   ;;  %3466 = vst [vmem:[%s4008_s29 + $0x158] sm:$0xff] %v3322_v11   ;;  %v3157_v14 = vpack.c.bf16 %v1191_v12, %v1188_v6  ;;  %v3317_v15 = vpack.c.bf16 %v1447_v13, %v1444_v7 }
 0x122   : > { %v3601_v16 = vpop.f32.mrf.mxu0  ;;  %v3665_v17 = vpop.f32.mrf.mxu1 }
 0x123   : > { %3433 = vst [vmem:[%s4008_s29 + $0x50] sm:$0xff] %v3157_v14   ;;  %3465 = vst [vmem:[%s4008_s29 + $0x150] sm:$0xff] %v3317_v15  }
 0x124   : > { %v1204_v18 = vpop.f32.mrf.mxu0  ;;  %v1460_v19 = vpop.f32.mrf.mxu1 }
 0x126   : > { %v3602_v20 = vpop.f32.mrf.mxu0  ;;  %v3666_v21 = vpop.f32.mrf.mxu1 }
 0x127   : > { %v3172_v22 = vpack.c.bf16 %v3602_v20, %v3601_v16  ;;  %v3332_v23 = vpack.c.bf16 %v3666_v21, %v3665_v17 }
 0x128   : > { %v1207_v24 = vpop.f32.mrf.mxu0  ;;  %v1463_v25 = vpop.f32.mrf.mxu1 }
 0x129   : > { %3436 = vst [vmem:[%s4008_s29 + $0x68] sm:$0xff] %v3172_v22   ;;  %3468 = vst [vmem:[%s4008_s29 + $0x168] sm:$0xff] %v3332_v23   ;;  %v3167_v26 = vpack.c.bf16 %v1207_v24, %v1204_v18  ;;  %v3327_v27 = vpack.c.bf16 %v1463_v25, %v1460_v19 }
 0x12a   : > { %v3605_v28 = vpop.f32.mrf.mxu0  ;;  %v3669_v29 = vpop.f32.mrf.mxu1 }
 0x12b   : > { %3435 = vst [vmem:[%s4008_s29 + $0x60] sm:$0xff] %v3167_v26   ;;  %3467 = vst [vmem:[%s4008_s29 + $0x160] sm:$0xff] %v3327_v27  }
 0x12c   : > { %v1220_v30 = vpop.f32.mrf.mxu0  ;;  %v1476_v31 = vpop.f32.mrf.mxu1 }
 0x12e   : > { %v3606_v32 = vpop.f32.mrf.mxu0  ;;  %v3670_v33 = vpop.f32.mrf.mxu1 }
 0x12f   : > { %v3182_v34 = vpack.c.bf16 %v3606_v32, %v3605_v28  ;;  %v3342_v35 = vpack.c.bf16 %v3670_v33, %v3669_v29 }
 0x130   : > { %v1223_v36 = vpop.f32.mrf.mxu0  ;;  %v1479_v37 = vpop.f32.mrf.mxu1 }
 0x131   : > { %3438 = vst [vmem:[%s4008_s29 + $0x78] sm:$0xff] %v3182_v34   ;;  %3470 = vst [vmem:[%s4008_s29 + $0x178] sm:$0xff] %v3342_v35   ;;  %v3177_v38 = vpack.c.bf16 %v1223_v36, %v1220_v30  ;;  %v3337_v39 = vpack.c.bf16 %v1479_v37, %v1476_v31 }
 0x132   : > { %v3609_v40 = vpop.f32.mrf.mxu0  ;;  %v3673_v41 = vpop.f32.mrf.mxu1 }
 0x133   : > { %3437 = vst [vmem:[%s4008_s29 + $0x70] sm:$0xff] %v3177_v38   ;;  %3469 = vst [vmem:[%s4008_s29 + $0x170] sm:$0xff] %v3337_v39  }
 0x134   : > { %v1236_v42 = vpop.f32.mrf.mxu0  ;;  %v1492_v43 = vpop.f32.mrf.mxu1 }
 0x136   : > { %v3610_v44 = vpop.f32.mrf.mxu0  ;;  %v3674_v45 = vpop.f32.mrf.mxu1 }
 0x137   : > { %v3192_v46 = vpack.c.bf16 %v3610_v44, %v3609_v40  ;;  %v3352_v47 = vpack.c.bf16 %v3674_v45, %v3673_v41 }
 0x138   : > { %v1239_v48 = vpop.f32.mrf.mxu0  ;;  %v1495_v49 = vpop.f32.mrf.mxu1 }
 0x139   : > { %3440 = vst [vmem:[%s4008_s29 + $0x88] sm:$0xff] %v3192_v46   ;;  %3472 = vst [vmem:[%s4008_s29 + $0x188] sm:$0xff] %v3352_v47   ;;  %v3187_v50 = vpack.c.bf16 %v1239_v48, %v1236_v42  ;;  %v3347_v51 = vpack.c.bf16 %v1495_v49, %v1492_v43 }
 0x13a   : > { %v3613_v52 = vpop.f32.mrf.mxu0  ;;  %v3677_v53 = vpop.f32.mrf.mxu1 }
 0x13b   : > { %3439 = vst [vmem:[%s4008_s29 + $0x80] sm:$0xff] %v3187_v50   ;;  %3471 = vst [vmem:[%s4008_s29 + $0x180] sm:$0xff] %v3347_v51  }
 0x13c   : > { %v1252_v54 = vpop.f32.mrf.mxu0  ;;  %v1508_v55 = vpop.f32.mrf.mxu1 }
 0x13e   : > { %v3614_v56 = vpop.f32.mrf.mxu0  ;;  %v3678_v57 = vpop.f32.mrf.mxu1 }
 0x13f   : > { %v3202_v58 = vpack.c.bf16 %v3614_v56, %v3613_v52  ;;  %v3362_v59 = vpack.c.bf16 %v3678_v57, %v3677_v53 }
 0x140   : > { %v1255_v60 = vpop.f32.mrf.mxu0  ;;  %v1511_v61 = vpop.f32.mrf.mxu1 }
 0x141   : > { %3442 = vst [vmem:[%s4008_s29 + $0x98] sm:$0xff] %v3202_v58   ;;  %3474 = vst [vmem:[%s4008_s29 + $0x198] sm:$0xff] %v3362_v59   ;;  %v3197_v62 = vpack.c.bf16 %v1255_v60, %v1252_v54  ;;  %v3357_v63 = vpack.c.bf16 %v1511_v61, %v1508_v55 }
 0x142   : > { %v3617_v0 = vpop.f32.mrf.mxu0  ;;  %v3681_v1 = vpop.f32.mrf.mxu1 }
 0x143   : > { %3441 = vst [vmem:[%s4008_s29 + $0x90] sm:$0xff] %v3197_v62   ;;  %3473 = vst [vmem:[%s4008_s29 + $0x190] sm:$0xff] %v3357_v63  }
 0x144   : > { %v1268_v2 = vpop.f32.mrf.mxu0  ;;  %v1524_v3 = vpop.f32.mrf.mxu1 }
 0x146   : > { %v3618_v4 = vpop.f32.mrf.mxu0  ;;  %v3682_v5 = vpop.f32.mrf.mxu1 }
 0x147   : > { %v3212_v6 = vpack.c.bf16 %v3618_v4, %v3617_v0  ;;  %v3372_v7 = vpack.c.bf16 %v3682_v5, %v3681_v1 }
 0x148   : > { %v1271_v8 = vpop.f32.mrf.mxu0  ;;  %v1527_v9 = vpop.f32.mrf.mxu1 }
 0x149   : > { %3444 = vst [vmem:[%s4008_s29 + $0xa8] sm:$0xff] %v3212_v6   ;;  %3476 = vst [vmem:[%s4008_s29 + $0x1a8] sm:$0xff] %v3372_v7   ;;  %v3207_v10 = vpack.c.bf16 %v1271_v8, %v1268_v2  ;;  %v3367_v11 = vpack.c.bf16 %v1527_v9, %v1524_v3 }
 0x14a   : > { %v3621_v12 = vpop.f32.mrf.mxu0  ;;  %v3685_v13 = vpop.f32.mrf.mxu1 }
 0x14b   : > { %3443 = vst [vmem:[%s4008_s29 + $0xa0] sm:$0xff] %v3207_v10   ;;  %3475 = vst [vmem:[%s4008_s29 + $0x1a0] sm:$0xff] %v3367_v11  }
 0x14c   : > { %v1284_v14 = vpop.f32.mrf.mxu0  ;;  %v1540_v15 = vpop.f32.mrf.mxu1 }
 0x14e   : > { %v3622_v16 = vpop.f32.mrf.mxu0  ;;  %v3686_v17 = vpop.f32.mrf.mxu1 }
 0x14f   : > { %v3222_v18 = vpack.c.bf16 %v3622_v16, %v3621_v12  ;;  %v3382_v19 = vpack.c.bf16 %v3686_v17, %v3685_v13 }
 0x150   : > { %v1287_v20 = vpop.f32.mrf.mxu0  ;;  %v1543_v21 = vpop.f32.mrf.mxu1 }
 0x151   : > { %3446 = vst [vmem:[%s4008_s29 + $0xb8] sm:$0xff] %v3222_v18   ;;  %3478 = vst [vmem:[%s4008_s29 + $0x1b8] sm:$0xff] %v3382_v19   ;;  %v3217_v22 = vpack.c.bf16 %v1287_v20, %v1284_v14  ;;  %v3377_v23 = vpack.c.bf16 %v1543_v21, %v1540_v15 }
 0x152   : > { %v3625_v24 = vpop.f32.mrf.mxu0  ;;  %v3689_v25 = vpop.f32.mrf.mxu1 }
 0x153   : > { %3445 = vst [vmem:[%s4008_s29 + $0xb0] sm:$0xff] %v3217_v22   ;;  %3477 = vst [vmem:[%s4008_s29 + $0x1b0] sm:$0xff] %v3377_v23  }
 0x154   : > { %v1300_v26 = vpop.f32.mrf.mxu0  ;;  %v1556_v27 = vpop.f32.mrf.mxu1 }
 0x156   : > { %v3626_v28 = vpop.f32.mrf.mxu0  ;;  %v3690_v29 = vpop.f32.mrf.mxu1 }
 0x157   : > { %v3232_v30 = vpack.c.bf16 %v3626_v28, %v3625_v24  ;;  %v3392_v31 = vpack.c.bf16 %v3690_v29, %v3689_v25 }
 0x158   : > { %v1303_v32 = vpop.f32.mrf.mxu0  ;;  %v1559_v33 = vpop.f32.mrf.mxu1 }
 0x159   : > { %3448 = vst [vmem:[%s4008_s29 + $0xc8] sm:$0xff] %v3232_v30   ;;  %3480 = vst [vmem:[%s4008_s29 + $0x1c8] sm:$0xff] %v3392_v31   ;;  %v3227_v34 = vpack.c.bf16 %v1303_v32, %v1300_v26  ;;  %v3387_v35 = vpack.c.bf16 %v1559_v33, %v1556_v27 }
 0x15a   : > { %v3629_v36 = vpop.f32.mrf.mxu0  ;;  %v3693_v37 = vpop.f32.mrf.mxu1 }
 0x15b   : > { %3447 = vst [vmem:[%s4008_s29 + $0xc0] sm:$0xff] %v3227_v34   ;;  %3479 = vst [vmem:[%s4008_s29 + $0x1c0] sm:$0xff] %v3387_v35  }
 0x15c   : > { %v1316_v38 = vpop.f32.mrf.mxu0  ;;  %v1572_v39 = vpop.f32.mrf.mxu1 }
 0x15e   : > { %v3630_v40 = vpop.f32.mrf.mxu0  ;;  %v3694_v41 = vpop.f32.mrf.mxu1 }
 0x15f   : > { %v3242_v42 = vpack.c.bf16 %v3630_v40, %v3629_v36  ;;  %v3402_v43 = vpack.c.bf16 %v3694_v41, %v3693_v37 }
 0x160   : > { %v1319_v44 = vpop.f32.mrf.mxu0  ;;  %v1575_v45 = vpop.f32.mrf.mxu1 }
 0x161   : > { %3450 = vst [vmem:[%s4008_s29 + $0xd8] sm:$0xff] %v3242_v42   ;;  %3482 = vst [vmem:[%s4008_s29 + $0x1d8] sm:$0xff] %v3402_v43   ;;  %v3237_v46 = vpack.c.bf16 %v1319_v44, %v1316_v38  ;;  %v3397_v47 = vpack.c.bf16 %v1575_v45, %v1572_v39 }
 0x162   : > { %v3633_v48 = vpop.f32.mrf.mxu0  ;;  %v3697_v49 = vpop.f32.mrf.mxu1 }
 0x163   : > { %3449 = vst [vmem:[%s4008_s29 + $0xd0] sm:$0xff] %v3237_v46   ;;  %3481 = vst [vmem:[%s4008_s29 + $0x1d0] sm:$0xff] %v3397_v47  }
 0x164   : > { %v1332_v50 = vpop.f32.mrf.mxu0  ;;  %v1588_v51 = vpop.f32.mrf.mxu1 }
 0x166   : > { %v3634_v52 = vpop.f32.mrf.mxu0  ;;  %v3698_v53 = vpop.f32.mrf.mxu1 }
 0x167   : > { %v3252_v54 = vpack.c.bf16 %v3634_v52, %v3633_v48  ;;  %v3412_v55 = vpack.c.bf16 %v3698_v53, %v3697_v49 }
 0x168   : > { %v1335_v56 = vpop.f32.mrf.mxu0  ;;  %v1591_v57 = vpop.f32.mrf.mxu1 }
 0x169   : > { %3452 = vst [vmem:[%s4008_s29 + $0xe8] sm:$0xff] %v3252_v54   ;;  %3484 = vst [vmem:[%s4008_s29 + $0x1e8] sm:$0xff] %v3412_v55   ;;  %v3247_v58 = vpack.c.bf16 %v1335_v56, %v1332_v50  ;;  %v3407_v59 = vpack.c.bf16 %v1591_v57, %v1588_v51 }
 0x16a   : > { %v3637_v60 = vpop.f32.mrf.mxu0  ;;  %v3701_v61 = vpop.f32.mrf.mxu1 }
 0x16b   : > { %3451 = vst [vmem:[%s4008_s29 + $0xe0] sm:$0xff] %v3247_v58   ;;  %3483 = vst [vmem:[%s4008_s29 + $0x1e0] sm:$0xff] %v3407_v59  }
 0x16c   : > { %v1348_v62 = vpop.f32.mrf.mxu0  ;;  %v1604_v63 = vpop.f32.mrf.mxu1 }
 0x16e   : > { %v3638_v0 = vpop.f32.mrf.mxu0  ;;  %v3702_v1 = vpop.f32.mrf.mxu1 }
 0x16f   : > { %v3262_v2 = vpack.c.bf16 %v3638_v0, %v3637_v60  ;;  %v3422_v3 = vpack.c.bf16 %v3702_v1, %v3701_v61 }
 0x170   : > { %v1351_v4 = vpop.f32.mrf.mxu0  ;;  %v1607_v5 = vpop.f32.mrf.mxu1 }
 0x171   : > { %3454 = vst [vmem:[%s4008_s29 + $0xf8] sm:$0xff] %v3262_v2   ;;  %3486 = vst [vmem:[%s4008_s29 + $0x1f8] sm:$0xff] %v3422_v3   ;;  %v3257_v6 = vpack.c.bf16 %v1351_v4, %v1348_v62  ;;  %v3417_v7 = vpack.c.bf16 %v1607_v5, %v1604_v63 }
 0x173   : > { %3453 = vst [vmem:[%s4008_s29 + $0xf0] sm:$0xff] %v3257_v6   ;;  %3485 = vst [vmem:[%s4008_s29 + $0x1f0] sm:$0xff] %v3417_v7  }
 0x174 PF: > { %s12_s13 = sadd.s32 1, %s3869_s13   ;;  %s4092_s9 = smov %s3861_s11 }
 0x175   : > { %p9_p7 = scmp.ge.s32.totalorder %s12_s13, 10   ;;  %s4093_s10 = smov %s3865_s12 }
 0x176   : > { %s4094_s11 = smov %s4097_s14  ;;  %s4095_s12 = smov %s4101_s15 }
 0x177   :  { %11 = sbr.rel (!%p9_p7) target bundleno = 3 (0x3), region = 69 }

</bundles_post_ra>
